<compile_context>
chip_gen: v6e
topology: v6e:2x2x1
jax: 0.10.0
libtpu: 0.0.40
codegen_flags: <defaults>
</compile_context>

<pallas_src>
import functools
import math

import jax
import jax.numpy as jnp
from jax import lax
from jax.experimental import pallas as pl
from jax.experimental.pallas import tpu as pltpu


# ---------------------------------------------------------------------------
# Helpers
# ---------------------------------------------------------------------------

def _round_up(n, m):
    return ((n + m - 1) // m) * m


def _row_plan(n, max_tile=512):
    """Row tile (multiple of 8, <= max_tile) and padded row count."""
    tile = max_tile if n >= max_tile else _round_up(n, 8)
    return tile, _round_up(n, tile)


def _const_spec(arr):
    nd = arr.ndim
    return pl.BlockSpec(arr.shape, lambda *_, _nd=nd: (0,) * _nd)


def _parallel(n_axes=1):
    return pltpu.CompilerParams(dimension_semantics=("parallel",) * n_axes)


def _rowwise_call(kernel, row_inputs, consts, out_widths, max_tile=512):
    """Run `kernel` over row tiles of the 2-D `row_inputs` (zero-padded to tile)."""
    n = row_inputs[0].shape[0]
    tile, n_pad = _row_plan(n, max_tile)
    if n_pad != n:
        row_inputs = [jnp.pad(a, ((0, n_pad - n), (0, 0))) for a in row_inputs]
    in_specs = [pl.BlockSpec((tile, a.shape[1]), lambda i: (i, 0)) for a in row_inputs]
    in_specs += [_const_spec(c) for c in consts]
    out_specs = tuple(pl.BlockSpec((tile, w), lambda i: (i, 0)) for w in out_widths)
    out_shape = tuple(jax.ShapeDtypeStruct((n_pad, w), jnp.float32) for w in out_widths)
    multi = len(out_widths) > 1
    res = pl.pallas_call(
        kernel,
        grid=(n_pad // tile,),
        in_specs=in_specs,
        out_specs=out_specs if multi else out_specs[0],
        out_shape=out_shape if multi else out_shape[0],
        compiler_params=_parallel(),
    )(*row_inputs, *consts)
    if multi:
        return tuple(r[:n] for r in res)
    return res[:n]


def _bf16(x):
    return x.astype(jnp.bfloat16)


def _mm(a, w):
    # bf16 operands, f32 accumulation on the MXU.
    return jnp.dot(_bf16(a), _bf16(w), preferred_element_type=jnp.float32)


def _ln(x, g, b, eps=1e-5):
    mu = jnp.mean(x, axis=-1, keepdims=True)
    var = jnp.mean(jnp.square(x - mu), axis=-1, keepdims=True)
    return (x - mu) * lax.rsqrt(var + eps) * g + b


# ---------------------------------------------------------------------------
# Pallas kernels
# ---------------------------------------------------------------------------

def _linear_kernel(x_ref, w_ref, b_ref, o_ref, *, activation="none"):
    y = _mm(x_ref[...], w_ref[...]) + b_ref[...]
    if activation == "relu":
        y = jnp.maximum(y, 0.0)
    elif activation == "swish":
        y = y * jax.nn.sigmoid(y)
    o_ref[...] = y


def _linear_res_kernel(x_ref, res_ref, w_ref, b_ref, o_ref):
    o_ref[...] = res_ref[...] + _mm(x_ref[...], w_ref[...]) + b_ref[...]


def _ffn_body(x, g, b, w1, b1, w2, b2):
    xn = _ln(x, g, b)
    h = _mm(xn, w1) + b1
    h = h * jax.nn.sigmoid(h)                       # Swish
    return x + 0.5 * (_mm(h, w2) + b2)              # half-step residual fused


def _ff_kernel(x_ref, g_ref, b_ref, w1_ref, b1_ref, w2_ref, b2_ref, o_ref):
    o_ref[...] = _ffn_body(x_ref[...], g_ref[...], b_ref[...],
                           w1_ref[...], b1_ref[...], w2_ref[...], b2_ref[...])


def _ff_ln_kernel(x_ref, g_ref, b_ref, w1_ref, b1_ref, w2_ref, b2_ref,
                  g2_ref, bb2_ref, o_ref):
    y = _ffn_body(x_ref[...], g_ref[...], b_ref[...],
                  w1_ref[...], b1_ref[...], w2_ref[...], b2_ref[...])
    o_ref[...] = _ln(y, g2_ref[...], bb2_ref[...])   # final block LayerNorm fused


def _ln_qkv_kernel(x_ref, g_ref, b_ref, wq_ref, bq_ref, wk_ref, bk_ref,
                   wv_ref, bv_ref, q_ref, k_ref, v_ref):
    xn = _ln(x_ref[...], g_ref[...], b_ref[...])
    q_ref[...] = _mm(xn, wq_ref[...]) + bq_ref[...]
    k_ref[...] = _mm(xn, wk_ref[...]) + bk_ref[...]
    v_ref[...] = _mm(xn, wv_ref[...]) + bv_ref[...]


def _ln_glu_kernel(x_ref, g_ref, b_ref, wa_ref, ba_ref, wb_ref, bb_ref, o_ref):
    xn = _ln(x_ref[...], g_ref[...], b_ref[...])
    a = _mm(xn, wa_ref[...]) + ba_ref[...]
    gate = _mm(xn, wb_ref[...]) + bb_ref[...]
    o_ref[...] = a * jax.nn.sigmoid(gate)            # GLU with pre-split weights


def _fc_logsoftmax_kernel(x_ref, w_ref, o_ref, *, valid):
    logits = _mm(x_ref[...], w_ref[...])             # (rows, padded classes)
    cols = lax.broadcasted_iota(jnp.int32, logits.shape, 1)
    logits = jnp.where(cols < valid, logits, -1e30)  # mask the lane padding
    m = jnp.max(logits, axis=-1, keepdims=True)
    s = logits - m
    o_ref[...] = s - jnp.log(jnp.sum(jnp.exp(s), axis=-1, keepdims=True))


def _pos_score_kernel(qv_ref, pos_ref, o_ref):
    # All heads of one batch element: (H,T,dh) x (H,T,dh) -> (H,T,T)
    o_ref[...] = jnp.einsum("htd,hsd->hts", _bf16(qv_ref[...]), _bf16(pos_ref[...]),
                            preferred_element_type=jnp.float32)


def _attn_kernel(q_ref, k_ref, v_ref, ps_ref, o_ref, *, scale):
    # Fused: content QK^T + shifted pos score + softmax + PV (scores stay in VMEM).
    content = jnp.einsum("htd,hsd->hts", _bf16(q_ref[...]), _bf16(k_ref[...]),
                         preferred_element_type=jnp.float32)
    s = (content + ps_ref[...]) * scale
    m = jnp.max(s, axis=-1, keepdims=True)
    e = jnp.exp(s - m)
    p = e * pl.reciprocal(jnp.sum(e, axis=-1, keepdims=True), approx=True)
    o_ref[...] = jnp.einsum("hts,hsd->htd", _bf16(p), _bf16(v_ref[...]),
                            preferred_element_type=jnp.float32)


def _dwconv_pw_kernel(xp_ref, res_ref, dw_ref, bns_ref, bnb_ref, w2_ref, b2_ref,
                      o_ref, *, T, K):
    xp = xp_ref[...]                                  # (T + K - 1, C)
    w = dw_ref[...]                                   # (K, C)
    acc = xp[0:T, :] * w[0][None, :]
    for k in range(1, K):
        acc = acc + xp[k:k + T, :] * w[k][None, :]
    y = acc * bns_ref[...] + bnb_ref[...]             # BatchNorm1d (eval) folded in
    y = y * jax.nn.sigmoid(y)                         # Swish
    o_ref[...] = res_ref[...] + _mm(y, w2_ref[...]) + b2_ref[...]  # pointwise + residual


# ---------------------------------------------------------------------------
# Model pieces (thin JAX glue around the fused kernels)
# ---------------------------------------------------------------------------

def linear_rows(x2d, w, b=None, activation="none", residual=None):
    m = w.shape[1]
    if b is None:
        b = jnp.zeros((m,), jnp.float32)
    b2 = b.reshape(1, m)
    if residual is not None:
        return _rowwise_call(_linear_res_kernel, [x2d, residual], [w, b2], [m])
    return _rowwise_call(functools.partial(_linear_kernel, activation=activation),
                         [x2d], [w, b2], [m])


def conv2d_s2_relu(x, w, b):
    # x: (B, H, W, Cin) NHWC, kernel 3x3, stride 2, VALID; w: (3, 3, Cin, Cout)
    # TODO(synk): move the im2col patch gather into the kernel to avoid the 9x
    # HBM expansion of the feature map.
    B, H, W, Cin = x.shape
    Cout = w.shape[-1]
    Ho = (H - 3) // 2 + 1
    Wo = (W - 3) // 2 + 1
    patches = []
    for di in range(3):
        for dj in range(3):
            patches.append(
                x[:, di:di + 2 * (Ho - 1) + 1:2, dj:dj + 2 * (Wo - 1) + 1:2, :])
    p = jnp.stack(patches, axis=-2).reshape(B * Ho * Wo, 9 * Cin)
    y = linear_rows(p, w.reshape(9 * Cin, Cout), b, activation="relu")
    return y.reshape(B, Ho, Wo, Cout)


def sinusoidal_pe(length, d_model):
    pos = jnp.arange(length, dtype=jnp.float32)[:, None]
    div = jnp.exp(jnp.arange(0, d_model, 2, dtype=jnp.float32)
                  * (-math.log(10000.0) / d_model))
    pe = jnp.zeros((length, d_model), jnp.float32)
    pe = pe.at[:, 0::2].set(jnp.sin(pos * div))
    pe = pe.at[:, 1::2].set(jnp.cos(pos * div))
    return pe


def _relative_shift(ps):
    # TODO(synk): the reshape-trick relative shift stays in JAX glue; only the
    # (B,H,T,T) pos-score tensor round-trips HBM, content/attn never do.
    B, H, T1, T2 = ps.shape
    zeros = jnp.zeros((B, H, T1, 1), ps.dtype)
    padded = jnp.concatenate([zeros, ps], axis=-1)
    padded = padded.reshape(B, H, T2 + 1, T1)
    return padded[:, :, 1:].reshape(B, H, T1, T2)


def ff_module(x, p, post_ln=None):
    B, T, D = x.shape
    consts = [p["ln_g"].reshape(1, D), p["ln_b"].reshape(1, D),
              p["w1"], p["b1"].reshape(1, -1), p["w2"], p["b2"].reshape(1, D)]
    if post_ln is None:
        out = _rowwise_call(_ff_kernel, [x.reshape(B * T, D)], consts, [D])
    else:
        g2, b2 = post_ln
        consts = consts + [g2.reshape(1, D), b2.reshape(1, D)]
        out = _rowwise_call(_ff_ln_kernel, [x.reshape(B * T, D)], consts, [D])
    return out.reshape(B, T, D)


def mhsa_module(x, p, num_heads, pe):
    B, T, D = x.shape
    dh = D // num_heads
    x2 = x.reshape(B * T, D)

    q, k, v = _rowwise_call(
        _ln_qkv_kernel, [x2],
        [p["ln_g"].reshape(1, D), p["ln_b"].reshape(1, D),
         p["wq"], p["bq"].reshape(1, D),
         p["wk"], p["bk"].reshape(1, D),
         p["wv"], p["bv"].reshape(1, D)],
        [D, D, D])

    pos = linear_rows(pe, p["wpos"])                            # (T, D), no bias
    pos_h = pos.reshape(T, num_heads, dh).transpose(1, 0, 2)    # (H, T, dh)

    q4 = q.reshape(B, T, num_heads, dh)
    k_h = k.reshape(B, T, num_heads, dh).transpose(0, 2, 1, 3)
    v_h = v.reshape(B, T, num_heads, dh).transpose(0, 2, 1, 3)
    q_u = (q4 + p["u_bias"][None, None]).transpose(0, 2, 1, 3)
    q_v = (q4 + p["v_bias"][None, None]).transpose(0, 2, 1, 3)

    def head_spec():
        return pl.BlockSpec((None, num_heads, T, dh), lambda bi: (bi, 0, 0, 0))

    score_spec = pl.BlockSpec((None, num_heads, T, T), lambda bi: (bi, 0, 0, 0))

    ps = pl.pallas_call(
        _pos_score_kernel,
        grid=(B,),
        in_specs=[head_spec(), _const_spec(pos_h)],
        out_specs=score_spec,
        out_shape=jax.ShapeDtypeStruct((B, num_heads, T, T), jnp.float32),
        compiler_params=_parallel(),
    )(q_v, pos_h)
    ps = _relative_shift(ps)

    ctx = pl.pallas_call(
        functools.partial(_attn_kernel, scale=1.0 / math.sqrt(D)),
        grid=(B,),
        in_specs=[head_spec(), head_spec(), head_spec(), score_spec],
        out_specs=head_spec(),
        out_shape=jax.ShapeDtypeStruct((B, num_heads, T, dh), jnp.float32),
        compiler_params=_parallel(),
    )(q_u, k_h, v_h, ps)

    ctx2 = ctx.transpose(0, 2, 1, 3).reshape(B * T, D)
    out = linear_rows(ctx2, p["wo"], p["bo"], residual=x2)      # residual fused
    return out.reshape(B, T, D)


def conv_module(x, p):
    B, T, D = x.shape
    x2 = x.reshape(B * T, D)
    wa, wb = p["w1"][:, :D], p["w1"][:, D:]
    ba, bb = p["b1"][:D], p["b1"][D:]
    h = _rowwise_call(
        _ln_glu_kernel, [x2],
        [p["ln_g"].reshape(1, D), p["ln_b"].reshape(1, D),
         wa, ba.reshape(1, D), wb, bb.reshape(1, D)],
        [D]).reshape(B, T, D)

    K = p["dw"].shape[0]
    pad = (K - 1) // 2
    xp = jnp.pad(h, ((0, 0), (pad, pad), (0, 0)))
    Tp = T + 2 * pad
    consts = [p["dw"], p["bn_scale"].reshape(1, D), p["bn_shift"].reshape(1, D),
              p["w2"], p["b2"].reshape(1, D)]
    out = pl.pallas_call(
        functools.partial(_dwconv_pw_kernel, T=T, K=K),
        grid=(B,),
        in_specs=[pl.BlockSpec((None, Tp, D), lambda i: (i, 0, 0)),
                  pl.BlockSpec((None, T, D), lambda i: (i, 0, 0))]
                 + [_const_spec(c) for c in consts],
        out_specs=pl.BlockSpec((None, T, D), lambda i: (i, 0, 0)),
        out_shape=jax.ShapeDtypeStruct((B, T, D), jnp.float32),
        compiler_params=_parallel(),
    )(xp, x, *consts)
    return out


def conformer_block(x, p, num_heads, pe):
    x = ff_module(x, p["ff1"])                                   # + 0.5*res fused
    x = mhsa_module(x, p["mhsa"], num_heads, pe)                 # + res fused
    x = conv_module(x, p["conv"])                                # + res fused
    x = ff_module(x, p["ff2"], post_ln=(p["ln_g"], p["ln_b"]))   # + 0.5*res, final LN
    return x


def conformer_forward(params, inputs, input_lengths, *, num_heads):
    B, T, F = inputs.shape
    x = inputs[..., None]                                        # (B, T, F, 1)
    x = conv2d_s2_relu(x, params["sub_w1"], params["sub_b1"])
    x = conv2d_s2_relu(x, params["sub_w2"], params["sub_b2"])
    _, T2, F2, D = x.shape
    # matches torch (B, D, T2, F2).permute(0, 2, 1, 3).reshape(B, T2, D*F2)
    x = x.transpose(0, 1, 3, 2).reshape(B, T2, D * F2)
    out_lengths = (input_lengths >> 2) - 1
    x = linear_rows(x.reshape(B * T2, D * F2),
                    params["proj_w"], params["proj_b"]).reshape(B, T2, D)
    # TODO(synk): dropout layers are identity (inference); BatchNorm uses running stats.
    pe = sinusoidal_pe(T2, D)
    for lp in params["layers"]:
        x = conformer_block(x, lp, num_heads, pe)

    num_classes = params["fc_w"].shape[1]
    c_pad = _round_up(num_classes, 128)                          # lane-dense stores
    fc_w = jnp.pad(params["fc_w"], ((0, 0), (0, c_pad - num_classes)))
    logp = _rowwise_call(
        functools.partial(_fc_logsoftmax_kernel, valid=num_classes),
        [x.reshape(B * T2, D)], [fc_w], [c_pad])
    out = logp[:, :num_classes].reshape(B, T2, num_classes)
    return out, out_lengths


# ---------------------------------------------------------------------------
# Deterministic parameter init
# ---------------------------------------------------------------------------

def init_params(key, *, num_classes, input_dim, d, num_layers, heads,
                ff_exp, conv_exp, kernel_size):
    kit = iter(jax.random.split(key, 256))

    def w(shape, scale=0.02):
        return jax.random.normal(next(kit), shape, jnp.float32) * scale

    dh = d // heads
    freq2 = ((input_dim - 1) // 2 - 1) // 2
    bn_eps = 1e-5

    def ff_params():
        return {"ln_g": jnp.ones((d,)), "ln_b": jnp.zeros((d,)),
                "w1": w((d, d * ff_exp)), "b1": jnp.zeros((d * ff_exp,)),
                "w2": w((d * ff_exp, d)), "b2": jnp.zeros((d,))}

    params = {
        "sub_w1": w((3, 3, 1, d)), "sub_b1": jnp.zeros((d,)),
        "sub_w2": w((3, 3, d, d)), "sub_b2": jnp.zeros((d,)),
        "proj_w": w((d * freq2, d)), "proj_b": jnp.zeros((d,)),
        "fc_w": w((d, num_classes)),
        "layers": [],
    }
    for _ in range(num_layers):
        params["layers"].append({
            "ff1": ff_params(),
            "mhsa": {"ln_g": jnp.ones((d,)), "ln_b": jnp.zeros((d,)),
                     "wq": w((d, d)), "bq": jnp.zeros((d,)),
                     "wk": w((d, d)), "bk": jnp.zeros((d,)),
                     "wv": w((d, d)), "bv": jnp.zeros((d,)),
                     "wpos": w((d, d)),
                     "u_bias": w((heads, dh)), "v_bias": w((heads, dh)),
                     "wo": w((d, d)), "bo": jnp.zeros((d,))},
            "conv": {"ln_g": jnp.ones((d,)), "ln_b": jnp.zeros((d,)),
                     "w1": w((d, d * conv_exp)), "b1": jnp.zeros((d * conv_exp,)),
                     "dw": w((kernel_size, d)),
                     "bn_scale": jnp.full((d,), 1.0 / math.sqrt(1.0 + bn_eps),
                                          jnp.float32),
                     "bn_shift": jnp.zeros((d,)),
                     "w2": w((d, d)), "b2": jnp.zeros((d,))},
            "ff2": ff_params(),
            "ln_g": jnp.ones((d,)), "ln_b": jnp.zeros((d,)),
        })
    return params


# ---------------------------------------------------------------------------

if __name__ == "__main__":
    B, T, F = 2, 32, 16
    num_classes, D, num_layers, heads = 12, 32, 2, 4
    ff_exp, conv_exp, conv_kernel = 4, 2, 7

    key = jax.random.PRNGKey(0)
    pkey, xkey = jax.random.split(key)
    params = init_params(pkey, num_classes=num_classes, input_dim=F, d=D,
                         num_layers=num_layers, heads=heads,
                         ff_exp=ff_exp, conv_exp=conv_exp,
                         kernel_size=conv_kernel)
    inputs = jax.random.normal(xkey, (B, T, F), jnp.float32)
    input_lengths = jnp.array([T, T - 4], jnp.int32)

    fwd = jax.jit(conformer_forward, static_argnames=("num_heads",))
    out, out_lens = fwd(params, inputs, input_lengths, num_heads=heads)
    jax.block_until_ready(out)
    jax.block_until_ready(out_lens)

    T2 = (((T - 3) // 2 + 1) - 3) // 2 + 1
    assert out.shape == (B, T2, num_classes), out.shape
    assert out_lens.shape == (B,)
    probs = jnp.exp(out).sum(axis=-1)
    assert bool(jnp.all(jnp.isfinite(out)))
    assert bool(jnp.allclose(probs, 1.0, atol=1e-3))
    print("KERNEL_OK")
</pallas_src>

<mosaic_0001>
module attributes {stable_mosaic.version = 11 : i64} {
  func.func @_linear_kernel(%arg0: i32, %arg1: memref<216x9xf32, #tpu.memory_space<vmem>>, %arg2: memref<9x32xf32, #tpu.memory_space<vmem>>, %arg3: memref<1x32xf32, #tpu.memory_space<vmem>>, %arg4: memref<216x32xf32, #tpu.memory_space<vmem>>) attributes {dimension_semantics = [#tpu.dimension_semantics<parallel>], iteration_bounds = array<i64: 1>, scalar_prefetch = 0 : i64, scratch_operands = 0 : i64, tpu.core_type = #tpu.core_type<tc>, window_params = [{transform_indices = @transform_0, window_bounds = array<i64: 216, 9>}, {pipeline_mode = #tpu.pipeline_mode<synchronous>, transform_indices = @transform_1, window_bounds = array<i64: 9, 32>}, {pipeline_mode = #tpu.pipeline_mode<synchronous>, transform_indices = @transform_2, window_bounds = array<i64: 1, 32>}, {transform_indices = @transform_3, window_bounds = array<i64: 216, 32>}]} {
    %c0 = arith.constant 0 : index
    %c0_0 = arith.constant 0 : index
    %0 = vector.load %arg1[%c0, %c0_0] : memref<216x9xf32, #tpu.memory_space<vmem>>, vector<216x9xf32>
    %c0_1 = arith.constant 0 : index
    %c0_2 = arith.constant 0 : index
    %1 = vector.load %arg2[%c0_1, %c0_2] : memref<9x32xf32, #tpu.memory_space<vmem>>, vector<9x32xf32>
    %2 = arith.truncf %0 : vector<216x9xf32> to vector<216x9xbf16>
    %3 = arith.truncf %1 : vector<9x32xf32> to vector<9x32xbf16>
    %cst = arith.constant dense<0.000000e+00> : vector<216x32xf32>
    %4 = tpu.matmul %2, %3, %cst {dimension_numbers = #tpu.dot_dimension_numbers<[1], [0], [0], [1], [0, 0, 1, 1], [], []>} : vector<216x9xbf16>, vector<9x32xbf16>, vector<216x32xf32> -> vector<216x32xf32>
    %c0_3 = arith.constant 0 : index
    %c0_4 = arith.constant 0 : index
    %5 = vector.load %arg3[%c0_3, %c0_4] : memref<1x32xf32, #tpu.memory_space<vmem>>, vector<1x32xf32>
    %6 = vector.broadcast %5 : vector<1x32xf32> to vector<216x32xf32>
    %7 = arith.addf %4, %6 : vector<216x32xf32>
    %cst_5 = arith.constant 0.000000e+00 : f32
    %8 = vector.broadcast %cst_5 : f32 to vector<216x32xf32>
    %9 = arith.maximumf %7, %8 : vector<216x32xf32>
    %c0_6 = arith.constant 0 : index
    %c0_7 = arith.constant 0 : index
    %10 = vector.load %arg4[%c0_6, %c0_7] : memref<216x32xf32, #tpu.memory_space<vmem>>, vector<216x32xf32>
    tpu.vector_store %arg4[%c0_6, %c0_7], %9 {strides = array<i32>} : memref<216x32xf32, #tpu.memory_space<vmem>>, vector<216x32xf32>,
    return
  }
  func.func @transform_0(%arg0: i32) -> (i32, i32) {
    %c0_i32 = arith.constant 0 : i32
    %c0_i32_0 = arith.constant 0 : i32
    return %arg0, %c0_i32 : i32, i32
  }
  func.func @transform_1(%arg0: i32) -> (i32, i32) {
    %c0_i32 = arith.constant 0 : i32
    %c0_i32_0 = arith.constant 0 : i32
    %c0_i32_1 = arith.constant 0 : i32
    return %c0_i32, %c0_i32_0 : i32, i32
  }
  func.func @transform_2(%arg0: i32) -> (i32, i32) {
    %c0_i32 = arith.constant 0 : i32
    %c0_i32_0 = arith.constant 0 : i32
    %c0_i32_1 = arith.constant 0 : i32
    return %c0_i32, %c0_i32_0 : i32, i32
  }
  func.func @transform_3(%arg0: i32) -> (i32, i32) {
    %c0_i32 = arith.constant 0 : i32
    %c0_i32_0 = arith.constant 0 : i32
    return %arg0, %c0_i32 : i32, i32
  }
}

module attributes {stable_mosaic.version = 11 : i64} {
  func.func @_linear_kernel(%arg0: i32, %arg1: memref<48x288xf32, #tpu.memory_space<vmem>>, %arg2: memref<288x32xf32, #tpu.memory_space<vmem>>, %arg3: memref<1x32xf32, #tpu.memory_space<vmem>>, %arg4: memref<48x32xf32, #tpu.memory_space<vmem>>) attributes {dimension_semantics = [#tpu.dimension_semantics<parallel>], iteration_bounds = array<i64: 1>, scalar_prefetch = 0 : i64, scratch_operands = 0 : i64, tpu.core_type = #tpu.core_type<tc>, window_params = [{transform_indices = @transform_0, window_bounds = array<i64: 48, 288>}, {pipeline_mode = #tpu.pipeline_mode<synchronous>, transform_indices = @transform_1, window_bounds = array<i64: 288, 32>}, {pipeline_mode = #tpu.pipeline_mode<synchronous>, transform_indices = @transform_2, window_bounds = array<i64: 1, 32>}, {transform_indices = @transform_3, window_bounds = array<i64: 48, 32>}]} {
    %c0 = arith.constant 0 : index
    %c0_0 = arith.constant 0 : index
    %0 = vector.load %arg1[%c0, %c0_0] : memref<48x288xf32, #tpu.memory_space<vmem>>, vector<48x288xf32>
    %c0_1 = arith.constant 0 : index
    %c0_2 = arith.constant 0 : index
    %1 = vector.load %arg2[%c0_1, %c0_2] : memref<288x32xf32, #tpu.memory_space<vmem>>, vector<288x32xf32>
    %2 = arith.truncf %0 : vector<48x288xf32> to vector<48x288xbf16>
    %3 = arith.truncf %1 : vector<288x32xf32> to vector<288x32xbf16>
    %cst = arith.constant dense<0.000000e+00> : vector<48x32xf32>
    %4 = tpu.matmul %2, %3, %cst {dimension_numbers = #tpu.dot_dimension_numbers<[1], [0], [0], [1], [0, 0, 1, 1], [], []>} : vector<48x288xbf16>, vector<288x32xbf16>, vector<48x32xf32> -> vector<48x32xf32>
    %c0_3 = arith.constant 0 : index
    %c0_4 = arith.constant 0 : index
    %5 = vector.load %arg3[%c0_3, %c0_4] : memref<1x32xf32, #tpu.memory_space<vmem>>, vector<1x32xf32>
    %6 = vector.broadcast %5 : vector<1x32xf32> to vector<48x32xf32>
    %7 = arith.addf %4, %6 : vector<48x32xf32>
    %cst_5 = arith.constant 0.000000e+00 : f32
    %8 = vector.broadcast %cst_5 : f32 to vector<48x32xf32>
    %9 = arith.maximumf %7, %8 : vector<48x32xf32>
    %c0_6 = arith.constant 0 : index
    %c0_7 = arith.constant 0 : index
    %10 = vector.load %arg4[%c0_6, %c0_7] : memref<48x32xf32, #tpu.memory_space<vmem>>, vector<48x32xf32>
    tpu.vector_store %arg4[%c0_6, %c0_7], %9 {strides = array<i32>} : memref<48x32xf32, #tpu.memory_space<vmem>>, vector<48x32xf32>,
    return
  }
  func.func @transform_0(%arg0: i32) -> (i32, i32) {
    %c0_i32 = arith.constant 0 : i32
    %c0_i32_0 = arith.constant 0 : i32
    return %arg0, %c0_i32 : i32, i32
  }
  func.func @transform_1(%arg0: i32) -> (i32, i32) {
    %c0_i32 = arith.constant 0 : i32
    %c0_i32_0 = arith.constant 0 : i32
    %c0_i32_1 = arith.constant 0 : i32
    return %c0_i32, %c0_i32_0 : i32, i32
  }
  func.func @transform_2(%arg0: i32) -> (i32, i32) {
    %c0_i32 = arith.constant 0 : i32
    %c0_i32_0 = arith.constant 0 : i32
    %c0_i32_1 = arith.constant 0 : i32
    return %c0_i32, %c0_i32_0 : i32, i32
  }
  func.func @transform_3(%arg0: i32) -> (i32, i32) {
    %c0_i32 = arith.constant 0 : i32
    %c0_i32_0 = arith.constant 0 : i32
    return %arg0, %c0_i32 : i32, i32
  }
}

module attributes {stable_mosaic.version = 11 : i64} {
  func.func @_linear_kernel(%arg0: i32, %arg1: memref<16x96xf32, #tpu.memory_space<vmem>>, %arg2: memref<96x32xf32, #tpu.memory_space<vmem>>, %arg3: memref<1x32xf32, #tpu.memory_space<vmem>>, %arg4: memref<16x32xf32, #tpu.memory_space<vmem>>) attributes {dimension_semantics = [#tpu.dimension_semantics<parallel>], iteration_bounds = array<i64: 1>, scalar_prefetch = 0 : i64, scratch_operands = 0 : i64, tpu.core_type = #tpu.core_type<tc>, window_params = [{transform_indices = @transform_0, window_bounds = array<i64: 16, 96>}, {pipeline_mode = #tpu.pipeline_mode<synchronous>, transform_indices = @transform_1, window_bounds = array<i64: 96, 32>}, {pipeline_mode = #tpu.pipeline_mode<synchronous>, transform_indices = @transform_2, window_bounds = array<i64: 1, 32>}, {transform_indices = @transform_3, window_bounds = array<i64: 16, 32>}]} {
    %c0 = arith.constant 0 : index
    %c0_0 = arith.constant 0 : index
    %0 = vector.load %arg1[%c0, %c0_0] : memref<16x96xf32, #tpu.memory_space<vmem>>, vector<16x96xf32>
    %c0_1 = arith.constant 0 : index
    %c0_2 = arith.constant 0 : index
    %1 = vector.load %arg2[%c0_1, %c0_2] : memref<96x32xf32, #tpu.memory_space<vmem>>, vector<96x32xf32>
    %2 = arith.truncf %0 : vector<16x96xf32> to vector<16x96xbf16>
    %3 = arith.truncf %1 : vector<96x32xf32> to vector<96x32xbf16>
    %cst = arith.constant dense<0.000000e+00> : vector<16x32xf32>
    %4 = tpu.matmul %2, %3, %cst {dimension_numbers = #tpu.dot_dimension_numbers<[1], [0], [0], [1], [0, 0, 1, 1], [], []>} : vector<16x96xbf16>, vector<96x32xbf16>, vector<16x32xf32> -> vector<16x32xf32>
    %c0_3 = arith.constant 0 : index
    %c0_4 = arith.constant 0 : index
    %5 = vector.load %arg3[%c0_3, %c0_4] : memref<1x32xf32, #tpu.memory_space<vmem>>, vector<1x32xf32>
    %6 = vector.broadcast %5 : vector<1x32xf32> to vector<16x32xf32>
    %7 = arith.addf %4, %6 : vector<16x32xf32>
    %c0_5 = arith.constant 0 : index
    %c0_6 = arith.constant 0 : index
    %8 = vector.load %arg4[%c0_5, %c0_6] : memref<16x32xf32, #tpu.memory_space<vmem>>, vector<16x32xf32>
    tpu.vector_store %arg4[%c0_5, %c0_6], %7 {strides = array<i32>} : memref<16x32xf32, #tpu.memory_space<vmem>>, vector<16x32xf32>,
    return
  }
  func.func @transform_0(%arg0: i32) -> (i32, i32) {
    %c0_i32 = arith.constant 0 : i32
    %c0_i32_0 = arith.constant 0 : i32
    return %arg0, %c0_i32 : i32, i32
  }
  func.func @transform_1(%arg0: i32) -> (i32, i32) {
    %c0_i32 = arith.constant 0 : i32
    %c0_i32_0 = arith.constant 0 : i32
    %c0_i32_1 = arith.constant 0 : i32
    return %c0_i32, %c0_i32_0 : i32, i32
  }
  func.func @transform_2(%arg0: i32) -> (i32, i32) {
    %c0_i32 = arith.constant 0 : i32
    %c0_i32_0 = arith.constant 0 : i32
    %c0_i32_1 = arith.constant 0 : i32
    return %c0_i32, %c0_i32_0 : i32, i32
  }
  func.func @transform_3(%arg0: i32) -> (i32, i32) {
    %c0_i32 = arith.constant 0 : i32
    %c0_i32_0 = arith.constant 0 : i32
    return %arg0, %c0_i32 : i32, i32
  }
}

module attributes {stable_mosaic.version = 11 : i64} {
  func.func @_ln_qkv_kernel(%arg0: i32, %arg1: memref<16x32xf32, #tpu.memory_space<vmem>>, %arg2: memref<1x32xf32, #tpu.memory_space<vmem>>, %arg3: memref<1x32xf32, #tpu.memory_space<vmem>>, %arg4: memref<32x32xf32, #tpu.memory_space<vmem>>, %arg5: memref<1x32xf32, #tpu.memory_space<vmem>>, %arg6: memref<32x32xf32, #tpu.memory_space<vmem>>, %arg7: memref<1x32xf32, #tpu.memory_space<vmem>>, %arg8: memref<32x32xf32, #tpu.memory_space<vmem>>, %arg9: memref<1x32xf32, #tpu.memory_space<vmem>>, %arg10: memref<16x32xf32, #tpu.memory_space<vmem>>, %arg11: memref<16x32xf32, #tpu.memory_space<vmem>>, %arg12: memref<16x32xf32, #tpu.memory_space<vmem>>) attributes {dimension_semantics = [#tpu.dimension_semantics<parallel>], iteration_bounds = array<i64: 1>, scalar_prefetch = 0 : i64, scratch_operands = 0 : i64, tpu.core_type = #tpu.core_type<tc>, window_params = [{transform_indices = @transform_0, window_bounds = array<i64: 16, 32>}, {pipeline_mode = #tpu.pipeline_mode<synchronous>, transform_indices = @transform_1, window_bounds = array<i64: 1, 32>}, {pipeline_mode = #tpu.pipeline_mode<synchronous>, transform_indices = @transform_2, window_bounds = array<i64: 1, 32>}, {pipeline_mode = #tpu.pipeline_mode<synchronous>, transform_indices = @transform_3, window_bounds = array<i64: 32, 32>}, {pipeline_mode = #tpu.pipeline_mode<synchronous>, transform_indices = @transform_4, window_bounds = array<i64: 1, 32>}, {pipeline_mode = #tpu.pipeline_mode<synchronous>, transform_indices = @transform_5, window_bounds = array<i64: 32, 32>}, {pipeline_mode = #tpu.pipeline_mode<synchronous>, transform_indices = @transform_6, window_bounds = array<i64: 1, 32>}, {pipeline_mode = #tpu.pipeline_mode<synchronous>, transform_indices = @transform_7, window_bounds = array<i64: 32, 32>}, {pipeline_mode = #tpu.pipeline_mode<synchronous>, transform_indices = @transform_8, window_bounds = array<i64: 1, 32>}, {transform_indices = @transform_9, window_bounds = array<i64: 16, 32>}, {transform_indices = @transform_10, window_bounds = array<i64: 16, 32>}, {transform_indices = @transform_11, window_bounds = array<i64: 16, 32>}]} {
    %c0 = arith.constant 0 : index
    %c0_0 = arith.constant 0 : index
    %0 = vector.load %arg1[%c0, %c0_0] : memref<16x32xf32, #tpu.memory_space<vmem>>, vector<16x32xf32>
    %c0_1 = arith.constant 0 : index
    %c0_2 = arith.constant 0 : index
    %1 = vector.load %arg2[%c0_1, %c0_2] : memref<1x32xf32, #tpu.memory_space<vmem>>, vector<1x32xf32>
    %c0_3 = arith.constant 0 : index
    %c0_4 = arith.constant 0 : index
    %2 = vector.load %arg3[%c0_3, %c0_4] : memref<1x32xf32, #tpu.memory_space<vmem>>, vector<1x32xf32>
    %cst = arith.constant dense<0.000000e+00> : vector<16xf32>
    %3 = vector.multi_reduction <add>, %0, %cst [1] : vector<16x32xf32> to vector<16xf32>
    %4 = vector.shape_cast %3 : vector<16xf32> to vector<16x1xf32>
    %cst_5 = arith.constant 3.200000e+01 : f32
    %5 = vector.broadcast %cst_5 : f32 to vector<16x1xf32>
    %6 = arith.divf %4, %5 : vector<16x1xf32>
    %7 = vector.broadcast %6 : vector<16x1xf32> to vector<16x32xf32>
    %8 = arith.subf %0, %7 : vector<16x32xf32>
    %9 = arith.mulf %8, %8 : vector<16x32xf32>
    %cst_6 = arith.constant dense<0.000000e+00> : vector<16xf32>
    %10 = vector.multi_reduction <add>, %9, %cst_6 [1] : vector<16x32xf32> to vector<16xf32>
    %11 = vector.shape_cast %10 : vector<16xf32> to vector<16x1xf32>
    %cst_7 = arith.constant 3.200000e+01 : f32
    %12 = vector.broadcast %cst_7 : f32 to vector<16x1xf32>
    %13 = arith.divf %11, %12 : vector<16x1xf32>
    %14 = vector.broadcast %6 : vector<16x1xf32> to vector<16x32xf32>
    %15 = arith.subf %0, %14 : vector<16x32xf32>
    %cst_8 = arith.constant 9.99999974E-6 : f32
    %16 = vector.broadcast %cst_8 : f32 to vector<16x1xf32>
    %17 = arith.addf %13, %16 : vector<16x1xf32>
    %18 = math.rsqrt %17 : vector<16x1xf32>
    %19 = vector.broadcast %18 : vector<16x1xf32> to vector<16x32xf32>
    %20 = arith.mulf %15, %19 : vector<16x32xf32>
    %21 = vector.broadcast %1 : vector<1x32xf32> to vector<16x32xf32>
    %22 = arith.mulf %20, %21 : vector<16x32xf32>
    %23 = vector.broadcast %2 : vector<1x32xf32> to vector<16x32xf32>
    %24 = arith.addf %22, %23 : vector<16x32xf32>
    %c0_9 = arith.constant 0 : index
    %c0_10 = arith.constant 0 : index
    %25 = vector.load %arg4[%c0_9, %c0_10] : memref<32x32xf32, #tpu.memory_space<vmem>>, vector<32x32xf32>
    %26 = arith.truncf %24 : vector<16x32xf32> to vector<16x32xbf16>
    %27 = arith.truncf %25 : vector<32x32xf32> to vector<32x32xbf16>
    %cst_11 = arith.constant dense<0.000000e+00> : vector<16x32xf32>
    %28 = tpu.matmul %26, %27, %cst_11 {dimension_numbers = #tpu.dot_dimension_numbers<[1], [0], [0], [1], [0, 0, 1, 1], [], []>} : vector<16x32xbf16>, vector<32x32xbf16>, vector<16x32xf32> -> vector<16x32xf32>
    %c0_12 = arith.constant 0 : index
    %c0_13 = arith.constant 0 : index
    %29 = vector.load %arg5[%c0_12, %c0_13] : memref<1x32xf32, #tpu.memory_space<vmem>>, vector<1x32xf32>
    %30 = vector.broadcast %29 : vector<1x32xf32> to vector<16x32xf32>
    %31 = arith.addf %28, %30 : vector<16x32xf32>
    %c0_14 = arith.constant 0 : index
    %c0_15 = arith.constant 0 : index
    %32 = vector.load %arg10[%c0_14, %c0_15] : memref<16x32xf32, #tpu.memory_space<vmem>>, vector<16x32xf32>
    tpu.vector_store %arg10[%c0_14, %c0_15], %31 {strides = array<i32>} : memref<16x32xf32, #tpu.memory_space<vmem>>, vector<16x32xf32>,
    %c0_16 = arith.constant 0 : index
    %c0_17 = arith.constant 0 : index
    %33 = vector.load %arg6[%c0_16, %c0_17] : memref<32x32xf32, #tpu.memory_space<vmem>>, vector<32x32xf32>
    %34 = arith.truncf %24 : vector<16x32xf32> to vector<16x32xbf16>
    %35 = arith.truncf %33 : vector<32x32xf32> to vector<32x32xbf16>
    %cst_18 = arith.constant dense<0.000000e+00> : vector<16x32xf32>
    %36 = tpu.matmul %34, %35, %cst_18 {dimension_numbers = #tpu.dot_dimension_numbers<[1], [0], [0], [1], [0, 0, 1, 1], [], []>} : vector<16x32xbf16>, vector<32x32xbf16>, vector<16x32xf32> -> vector<16x32xf32>
    %c0_19 = arith.constant 0 : index
    %c0_20 = arith.constant 0 : index
    %37 = vector.load %arg7[%c0_19, %c0_20] : memref<1x32xf32, #tpu.memory_space<vmem>>, vector<1x32xf32>
    %38 = vector.broadcast %37 : vector<1x32xf32> to vector<16x32xf32>
    %39 = arith.addf %36, %38 : vector<16x32xf32>
    %c0_21 = arith.constant 0 : index
    %c0_22 = arith.constant 0 : index
    %40 = vector.load %arg11[%c0_21, %c0_22] : memref<16x32xf32, #tpu.memory_space<vmem>>, vector<16x32xf32>
    tpu.vector_store %arg11[%c0_21, %c0_22], %39 {strides = array<i32>} : memref<16x32xf32, #tpu.memory_space<vmem>>, vector<16x32xf32>,
    %c0_23 = arith.constant 0 : index
    %c0_24 = arith.constant 0 : index
    %41 = vector.load %arg8[%c0_23, %c0_24] : memref<32x32xf32, #tpu.memory_space<vmem>>, vector<32x32xf32>
    %42 = arith.truncf %24 : vector<16x32xf32> to vector<16x32xbf16>
    %43 = arith.truncf %41 : vector<32x32xf32> to vector<32x32xbf16>
    %cst_25 = arith.constant dense<0.000000e+00> : vector<16x32xf32>
    %44 = tpu.matmul %42, %43, %cst_25 {dimension_numbers = #tpu.dot_dimension_numbers<[1], [0], [0], [1], [0, 0, 1, 1], [], []>} : vector<16x32xbf16>, vector<32x32xbf16>, vector<16x32xf32> -> vector<16x32xf32>
    %c0_26 = arith.constant 0 : index
    %c0_27 = arith.constant 0 : index
    %45 = vector.load %arg9[%c0_26, %c0_27] : memref<1x32xf32, #tpu.memory_space<vmem>>, vector<1x32xf32>
    %46 = vector.broadcast %45 : vector<1x32xf32> to vector<16x32xf32>
    %47 = arith.addf %44, %46 : vector<16x32xf32>
    %c0_28 = arith.constant 0 : index
    %c0_29 = arith.constant 0 : index
    %48 = vector.load %arg12[%c0_28, %c0_29] : memref<16x32xf32, #tpu.memory_space<vmem>>, vector<16x32xf32>
    tpu.vector_store %arg12[%c0_28, %c0_29], %47 {strides = array<i32>} : memref<16x32xf32, #tpu.memory_space<vmem>>, vector<16x32xf32>,
    return
  }
  func.func @transform_0(%arg0: i32) -> (i32, i32) {
    %c0_i32 = arith.constant 0 : i32
    %c0_i32_0 = arith.constant 0 : i32
    return %arg0, %c0_i32 : i32, i32
  }
  func.func @transform_1(%arg0: i32) -> (i32, i32) {
    %c0_i32 = arith.constant 0 : i32
    %c0_i32_0 = arith.constant 0 : i32
    %c0_i32_1 = arith.constant 0 : i32
    return %c0_i32, %c0_i32_0 : i32, i32
  }
  func.func @transform_2(%arg0: i32) -> (i32, i32) {
    %c0_i32 = arith.constant 0 : i32
    %c0_i32_0 = arith.constant 0 : i32
    %c0_i32_1 = arith.constant 0 : i32
    return %c0_i32, %c0_i32_0 : i32, i32
  }
  func.func @transform_3(%arg0: i32) -> (i32, i32) {
    %c0_i32 = arith.constant 0 : i32
    %c0_i32_0 = arith.constant 0 : i32
    %c0_i32_1 = arith.constant 0 : i32
    return %c0_i32, %c0_i32_0 : i32, i32
  }
  func.func @transform_4(%arg0: i32) -> (i32, i32) {
    %c0_i32 = arith.constant 0 : i32
    %c0_i32_0 = arith.constant 0 : i32
    %c0_i32_1 = arith.constant 0 : i32
    return %c0_i32, %c0_i32_0 : i32, i32
  }
  func.func @transform_5(%arg0: i32) -> (i32, i32) {
    %c0_i32 = arith.constant 0 : i32
    %c0_i32_0 = arith.constant 0 : i32
    %c0_i32_1 = arith.constant 0 : i32
    return %c0_i32, %c0_i32_0 : i32, i32
  }
  func.func @transform_6(%arg0: i32) -> (i32, i32) {
    %c0_i32 = arith.constant 0 : i32
    %c0_i32_0 = arith.constant 0 : i32
    %c0_i32_1 = arith.constant 0 : i32
    return %c0_i32, %c0_i32_0 : i32, i32
  }
  func.func @transform_7(%arg0: i32) -> (i32, i32) {
    %c0_i32 = arith.constant 0 : i32
    %c0_i32_0 = arith.constant 0 : i32
    %c0_i32_1 = arith.constant 0 : i32
    return %c0_i32, %c0_i32_0 : i32, i32
  }
  func.func @transform_8(%arg0: i32) -> (i32, i32) {
    %c0_i32 = arith.constant 0 : i32
    %c0_i32_0 = arith.constant 0 : i32
    %c0_i32_1 = arith.constant 0 : i32
    return %c0_i32, %c0_i32_0 : i32, i32
  }
  func.func @transform_9(%arg0: i32) -> (i32, i32) {
    %c0_i32 = arith.constant 0 : i32
    %c0_i32_0 = arith.constant 0 : i32
    return %arg0, %c0_i32 : i32, i32
  }
  func.func @transform_10(%arg0: i32) -> (i32, i32) {
    %c0_i32 = arith.constant 0 : i32
    %c0_i32_0 = arith.constant 0 : i32
    return %arg0, %c0_i32 : i32, i32
  }
  func.func @transform_11(%arg0: i32) -> (i32, i32) {
    %c0_i32 = arith.constant 0 : i32
    %c0_i32_0 = arith.constant 0 : i32
    return %arg0, %c0_i32 : i32, i32
  }
}

module attributes {stable_mosaic.version = 11 : i64} {
  func.func @_ff_kernel(%arg0: i32, %arg1: memref<16x32xf32, #tpu.memory_space<vmem>>, %arg2: memref<1x32xf32, #tpu.memory_space<vmem>>, %arg3: memref<1x32xf32, #tpu.memory_space<vmem>>, %arg4: memref<32x128xf32, #tpu.memory_space<vmem>>, %arg5: memref<1x128xf32, #tpu.memory_space<vmem>>, %arg6: memref<128x32xf32, #tpu.memory_space<vmem>>, %arg7: memref<1x32xf32, #tpu.memory_space<vmem>>, %arg8: memref<16x32xf32, #tpu.memory_space<vmem>>) attributes {dimension_semantics = [#tpu.dimension_semantics<parallel>], iteration_bounds = array<i64: 1>, scalar_prefetch = 0 : i64, scratch_operands = 0 : i64, tpu.core_type = #tpu.core_type<tc>, window_params = [{transform_indices = @transform_0, window_bounds = array<i64: 16, 32>}, {pipeline_mode = #tpu.pipeline_mode<synchronous>, transform_indices = @transform_1, window_bounds = array<i64: 1, 32>}, {pipeline_mode = #tpu.pipeline_mode<synchronous>, transform_indices = @transform_2, window_bounds = array<i64: 1, 32>}, {pipeline_mode = #tpu.pipeline_mode<synchronous>, transform_indices = @transform_3, window_bounds = array<i64: 32, 128>}, {pipeline_mode = #tpu.pipeline_mode<synchronous>, transform_indices = @transform_4, window_bounds = array<i64: 1, 128>}, {pipeline_mode = #tpu.pipeline_mode<synchronous>, transform_indices = @transform_5, window_bounds = array<i64: 128, 32>}, {pipeline_mode = #tpu.pipeline_mode<synchronous>, transform_indices = @transform_6, window_bounds = array<i64: 1, 32>}, {transform_indices = @transform_7, window_bounds = array<i64: 16, 32>}]} {
    %c0 = arith.constant 0 : index
    %c0_0 = arith.constant 0 : index
    %0 = vector.load %arg1[%c0, %c0_0] : memref<16x32xf32, #tpu.memory_space<vmem>>, vector<16x32xf32>
    %c0_1 = arith.constant 0 : index
    %c0_2 = arith.constant 0 : index
    %1 = vector.load %arg2[%c0_1, %c0_2] : memref<1x32xf32, #tpu.memory_space<vmem>>, vector<1x32xf32>
    %c0_3 = arith.constant 0 : index
    %c0_4 = arith.constant 0 : index
    %2 = vector.load %arg3[%c0_3, %c0_4] : memref<1x32xf32, #tpu.memory_space<vmem>>, vector<1x32xf32>
    %c0_5 = arith.constant 0 : index
    %c0_6 = arith.constant 0 : index
    %3 = vector.load %arg4[%c0_5, %c0_6] : memref<32x128xf32, #tpu.memory_space<vmem>>, vector<32x128xf32>
    %c0_7 = arith.constant 0 : index
    %c0_8 = arith.constant 0 : index
    %4 = vector.load %arg5[%c0_7, %c0_8] : memref<1x128xf32, #tpu.memory_space<vmem>>, vector<1x128xf32>
    %c0_9 = arith.constant 0 : index
    %c0_10 = arith.constant 0 : index
    %5 = vector.load %arg6[%c0_9, %c0_10] : memref<128x32xf32, #tpu.memory_space<vmem>>, vector<128x32xf32>
    %c0_11 = arith.constant 0 : index
    %c0_12 = arith.constant 0 : index
    %6 = vector.load %arg7[%c0_11, %c0_12] : memref<1x32xf32, #tpu.memory_space<vmem>>, vector<1x32xf32>
    %cst = arith.constant dense<0.000000e+00> : vector<16xf32>
    %7 = vector.multi_reduction <add>, %0, %cst [1] : vector<16x32xf32> to vector<16xf32>
    %8 = vector.shape_cast %7 : vector<16xf32> to vector<16x1xf32>
    %cst_13 = arith.constant 3.200000e+01 : f32
    %9 = vector.broadcast %cst_13 : f32 to vector<16x1xf32>
    %10 = arith.divf %8, %9 : vector<16x1xf32>
    %11 = vector.broadcast %10 : vector<16x1xf32> to vector<16x32xf32>
    %12 = arith.subf %0, %11 : vector<16x32xf32>
    %13 = arith.mulf %12, %12 : vector<16x32xf32>
    %cst_14 = arith.constant dense<0.000000e+00> : vector<16xf32>
    %14 = vector.multi_reduction <add>, %13, %cst_14 [1] : vector<16x32xf32> to vector<16xf32>
    %15 = vector.shape_cast %14 : vector<16xf32> to vector<16x1xf32>
    %cst_15 = arith.constant 3.200000e+01 : f32
    %16 = vector.broadcast %cst_15 : f32 to vector<16x1xf32>
    %17 = arith.divf %15, %16 : vector<16x1xf32>
    %18 = vector.broadcast %10 : vector<16x1xf32> to vector<16x32xf32>
    %19 = arith.subf %0, %18 : vector<16x32xf32>
    %cst_16 = arith.constant 9.99999974E-6 : f32
    %20 = vector.broadcast %cst_16 : f32 to vector<16x1xf32>
    %21 = arith.addf %17, %20 : vector<16x1xf32>
    %22 = math.rsqrt %21 : vector<16x1xf32>
    %23 = vector.broadcast %22 : vector<16x1xf32> to vector<16x32xf32>
    %24 = arith.mulf %19, %23 : vector<16x32xf32>
    %25 = vector.broadcast %1 : vector<1x32xf32> to vector<16x32xf32>
    %26 = arith.mulf %24, %25 : vector<16x32xf32>
    %27 = vector.broadcast %2 : vector<1x32xf32> to vector<16x32xf32>
    %28 = arith.addf %26, %27 : vector<16x32xf32>
    %29 = arith.truncf %28 : vector<16x32xf32> to vector<16x32xbf16>
    %30 = arith.truncf %3 : vector<32x128xf32> to vector<32x128xbf16>
    %cst_17 = arith.constant dense<0.000000e+00> : vector<16x128xf32>
    %31 = tpu.matmul %29, %30, %cst_17 {dimension_numbers = #tpu.dot_dimension_numbers<[1], [0], [0], [1], [0, 0, 1, 1], [], []>} : vector<16x32xbf16>, vector<32x128xbf16>, vector<16x128xf32> -> vector<16x128xf32>
    %32 = vector.broadcast %4 : vector<1x128xf32> to vector<16x128xf32>
    %33 = arith.addf %31, %32 : vector<16x128xf32>
    %34 = arith.negf %33 : vector<16x128xf32>
    %35 = math.exp %34 : vector<16x128xf32>
    %cst_18 = arith.constant 1.000000e+00 : f32
    %36 = vector.broadcast %cst_18 : f32 to vector<16x128xf32>
    %37 = arith.addf %36, %35 : vector<16x128xf32>
    %38 = arith.divf %36, %37 : vector<16x128xf32>
    %39 = arith.mulf %33, %38 : vector<16x128xf32>
    %40 = arith.truncf %39 : vector<16x128xf32> to vector<16x128xbf16>
    %41 = arith.truncf %5 : vector<128x32xf32> to vector<128x32xbf16>
    %cst_19 = arith.constant dense<0.000000e+00> : vector<16x32xf32>
    %42 = tpu.matmul %40, %41, %cst_19 {dimension_numbers = #tpu.dot_dimension_numbers<[1], [0], [0], [1], [0, 0, 1, 1], [], []>} : vector<16x128xbf16>, vector<128x32xbf16>, vector<16x32xf32> -> vector<16x32xf32>
    %43 = vector.broadcast %6 : vector<1x32xf32> to vector<16x32xf32>
    %44 = arith.addf %42, %43 : vector<16x32xf32>
    %cst_20 = arith.constant 5.000000e-01 : f32
    %45 = vector.broadcast %cst_20 : f32 to vector<16x32xf32>
    %46 = arith.mulf %45, %44 : vector<16x32xf32>
    %47 = arith.addf %0, %46 : vector<16x32xf32>
    %c0_21 = arith.constant 0 : index
    %c0_22 = arith.constant 0 : index
    %48 = vector.load %arg8[%c0_21, %c0_22] : memref<16x32xf32, #tpu.memory_space<vmem>>, vector<16x32xf32>
    tpu.vector_store %arg8[%c0_21, %c0_22], %47 {strides = array<i32>} : memref<16x32xf32, #tpu.memory_space<vmem>>, vector<16x32xf32>,
    return
  }
  func.func @transform_0(%arg0: i32) -> (i32, i32) {
    %c0_i32 = arith.constant 0 : i32
    %c0_i32_0 = arith.constant 0 : i32
    return %arg0, %c0_i32 : i32, i32
  }
  func.func @transform_1(%arg0: i32) -> (i32, i32) {
    %c0_i32 = arith.constant 0 : i32
    %c0_i32_0 = arith.constant 0 : i32
    %c0_i32_1 = arith.constant 0 : i32
    return %c0_i32, %c0_i32_0 : i32, i32
  }
  func.func @transform_2(%arg0: i32) -> (i32, i32) {
    %c0_i32 = arith.constant 0 : i32
    %c0_i32_0 = arith.constant 0 : i32
    %c0_i32_1 = arith.constant 0 : i32
    return %c0_i32, %c0_i32_0 : i32, i32
  }
  func.func @transform_3(%arg0: i32) -> (i32, i32) {
    %c0_i32 = arith.constant 0 : i32
    %c0_i32_0 = arith.constant 0 : i32
    %c0_i32_1 = arith.constant 0 : i32
    return %c0_i32, %c0_i32_0 : i32, i32
  }
  func.func @transform_4(%arg0: i32) -> (i32, i32) {
    %c0_i32 = arith.constant 0 : i32
    %c0_i32_0 = arith.constant 0 : i32
    %c0_i32_1 = arith.constant 0 : i32
    return %c0_i32, %c0_i32_0 : i32, i32
  }
  func.func @transform_5(%arg0: i32) -> (i32, i32) {
    %c0_i32 = arith.constant 0 : i32
    %c0_i32_0 = arith.constant 0 : i32
    %c0_i32_1 = arith.constant 0 : i32
    return %c0_i32, %c0_i32_0 : i32, i32
  }
  func.func @transform_6(%arg0: i32) -> (i32, i32) {
    %c0_i32 = arith.constant 0 : i32
    %c0_i32_0 = arith.constant 0 : i32
    %c0_i32_1 = arith.constant 0 : i32
    return %c0_i32, %c0_i32_0 : i32, i32
  }
  func.func @transform_7(%arg0: i32) -> (i32, i32) {
    %c0_i32 = arith.constant 0 : i32
    %c0_i32_0 = arith.constant 0 : i32
    return %arg0, %c0_i32 : i32, i32
  }
}

module attributes {stable_mosaic.version = 11 : i64} {
  func.func @_pos_score_kernel(%arg0: i32, %arg1: memref<1x4x7x8xf32, #tpu.memory_space<vmem>>, %arg2: memref<4x7x8xf32, #tpu.memory_space<vmem>>, %arg3: memref<1x4x7x7xf32, #tpu.memory_space<vmem>>) attributes {dimension_semantics = [#tpu.dimension_semantics<parallel>], iteration_bounds = array<i64: 2>, scalar_prefetch = 0 : i64, scratch_operands = 0 : i64, tpu.core_type = #tpu.core_type<tc>, window_params = [{transform_indices = @transform_0, window_bounds = array<i64: 1, 4, 7, 8>}, {pipeline_mode = #tpu.pipeline_mode<synchronous>, transform_indices = @transform_1, window_bounds = array<i64: 4, 7, 8>}, {transform_indices = @transform_2, window_bounds = array<i64: 1, 4, 7, 7>}]} {
    %c0 = arith.constant 0 : index
    %c0_0 = arith.constant 0 : index
    %c0_1 = arith.constant 0 : index
    %c0_2 = arith.constant 0 : index
    %0 = vector.load %arg1[%c0, %c0_0, %c0_1, %c0_2] : memref<1x4x7x8xf32, #tpu.memory_space<vmem>>, vector<1x4x7x8xf32>
    %1 = vector.shape_cast %0 : vector<1x4x7x8xf32> to vector<4x7x8xf32>
    %2 = arith.truncf %1 : vector<4x7x8xf32> to vector<4x7x8xbf16>
    %c0_3 = arith.constant 0 : index
    %c0_4 = arith.constant 0 : index
    %c0_5 = arith.constant 0 : index
    %3 = vector.load %arg2[%c0_3, %c0_4, %c0_5] : memref<4x7x8xf32, #tpu.memory_space<vmem>>, vector<4x7x8xf32>
    %4 = arith.truncf %3 : vector<4x7x8xf32> to vector<4x7x8xbf16>
    "tpu.trace_start"() <{level = 10 : i32, message = "htd,hsd->hts"}> : () -> ()
    %cst = arith.constant dense<0.000000e+00> : vector<4x7x7xf32>
    %5 = tpu.matmul %2, %4, %cst {dimension_numbers = #tpu.dot_dimension_numbers<[2], [2], [1], [1], [0, 0, 0, 1, 1, 1], [0], [0]>} : vector<4x7x8xbf16>, vector<4x7x8xbf16>, vector<4x7x7xf32> -> vector<4x7x7xf32>
    "tpu.trace_stop"() : () -> ()
    %c0_6 = arith.constant 0 : index
    %c0_7 = arith.constant 0 : index
    %c0_8 = arith.constant 0 : index
    %c0_9 = arith.constant 0 : index
    %6 = vector.load %arg3[%c0_6, %c0_7, %c0_8, %c0_9] : memref<1x4x7x7xf32, #tpu.memory_space<vmem>>, vector<1x4x7x7xf32>
    %7 = vector.shape_cast %6 : vector<1x4x7x7xf32> to vector<4x7x7xf32>
    %8 = vector.shape_cast %5 : vector<4x7x7xf32> to vector<1x4x7x7xf32>
    tpu.vector_store %arg3[%c0_6, %c0_7, %c0_8, %c0_9], %8 {strides = array<i32>} : memref<1x4x7x7xf32, #tpu.memory_space<vmem>>, vector<1x4x7x7xf32>,
    return
  }
  func.func @transform_0(%arg0: i32) -> (i32, i32, i32, i32) {
    %c0_i32 = arith.constant 0 : i32
    %c0_i32_0 = arith.constant 0 : i32
    %c0_i32_1 = arith.constant 0 : i32
    %c0_i32_2 = arith.constant 0 : i32
    return %arg0, %c0_i32, %c0_i32_0, %c0_i32_1 : i32, i32, i32, i32
  }
  func.func @transform_1(%arg0: i32) -> (i32, i32, i32) {
    %c0_i32 = arith.constant 0 : i32
    %c0_i32_0 = arith.constant 0 : i32
    %c0_i32_1 = arith.constant 0 : i32
    %c0_i32_2 = arith.constant 0 : i32
    return %c0_i32, %c0_i32_0, %c0_i32_1 : i32, i32, i32
  }
  func.func @transform_2(%arg0: i32) -> (i32, i32, i32, i32) {
    %c0_i32 = arith.constant 0 : i32
    %c0_i32_0 = arith.constant 0 : i32
    %c0_i32_1 = arith.constant 0 : i32
    %c0_i32_2 = arith.constant 0 : i32
    return %arg0, %c0_i32, %c0_i32_0, %c0_i32_1 : i32, i32, i32, i32
  }
}

module attributes {stable_mosaic.version = 11 : i64} {
  func.func @_linear_kernel(%arg0: i32, %arg1: memref<8x32xf32, #tpu.memory_space<vmem>>, %arg2: memref<32x32xf32, #tpu.memory_space<vmem>>, %arg3: memref<1x32xf32, #tpu.memory_space<vmem>>, %arg4: memref<8x32xf32, #tpu.memory_space<vmem>>) attributes {dimension_semantics = [#tpu.dimension_semantics<parallel>], iteration_bounds = array<i64: 1>, scalar_prefetch = 0 : i64, scratch_operands = 0 : i64, tpu.core_type = #tpu.core_type<tc>, window_params = [{transform_indices = @transform_0, window_bounds = array<i64: 8, 32>}, {pipeline_mode = #tpu.pipeline_mode<synchronous>, transform_indices = @transform_1, window_bounds = array<i64: 32, 32>}, {pipeline_mode = #tpu.pipeline_mode<synchronous>, transform_indices = @transform_2, window_bounds = array<i64: 1, 32>}, {transform_indices = @transform_3, window_bounds = array<i64: 8, 32>}]} {
    %c0 = arith.constant 0 : index
    %c0_0 = arith.constant 0 : index
    %0 = vector.load %arg1[%c0, %c0_0] : memref<8x32xf32, #tpu.memory_space<vmem>>, vector<8x32xf32>
    %c0_1 = arith.constant 0 : index
    %c0_2 = arith.constant 0 : index
    %1 = vector.load %arg2[%c0_1, %c0_2] : memref<32x32xf32, #tpu.memory_space<vmem>>, vector<32x32xf32>
    %2 = arith.truncf %0 : vector<8x32xf32> to vector<8x32xbf16>
    %3 = arith.truncf %1 : vector<32x32xf32> to vector<32x32xbf16>
    %cst = arith.constant dense<0.000000e+00> : vector<8x32xf32>
    %4 = tpu.matmul %2, %3, %cst {dimension_numbers = #tpu.dot_dimension_numbers<[1], [0], [0], [1], [0, 0, 1, 1], [], []>} : vector<8x32xbf16>, vector<32x32xbf16>, vector<8x32xf32> -> vector<8x32xf32>
    %c0_3 = arith.constant 0 : index
    %c0_4 = arith.constant 0 : index
    %5 = vector.load %arg3[%c0_3, %c0_4] : memref<1x32xf32, #tpu.memory_space<vmem>>, vector<1x32xf32>
    %6 = vector.broadcast %5 : vector<1x32xf32> to vector<8x32xf32>
    %7 = arith.addf %4, %6 : vector<8x32xf32>
    %c0_5 = arith.constant 0 : index
    %c0_6 = arith.constant 0 : index
    %8 = vector.load %arg4[%c0_5, %c0_6] : memref<8x32xf32, #tpu.memory_space<vmem>>, vector<8x32xf32>
    tpu.vector_store %arg4[%c0_5, %c0_6], %7 {strides = array<i32>} : memref<8x32xf32, #tpu.memory_space<vmem>>, vector<8x32xf32>,
    return
  }
  func.func @transform_0(%arg0: i32) -> (i32, i32) {
    %c0_i32 = arith.constant 0 : i32
    %c0_i32_0 = arith.constant 0 : i32
    return %arg0, %c0_i32 : i32, i32
  }
  func.func @transform_1(%arg0: i32) -> (i32, i32) {
    %c0_i32 = arith.constant 0 : i32
    %c0_i32_0 = arith.constant 0 : i32
    %c0_i32_1 = arith.constant 0 : i32
    return %c0_i32, %c0_i32_0 : i32, i32
  }
  func.func @transform_2(%arg0: i32) -> (i32, i32) {
    %c0_i32 = arith.constant 0 : i32
    %c0_i32_0 = arith.constant 0 : i32
    %c0_i32_1 = arith.constant 0 : i32
    return %c0_i32, %c0_i32_0 : i32, i32
  }
  func.func @transform_3(%arg0: i32) -> (i32, i32) {
    %c0_i32 = arith.constant 0 : i32
    %c0_i32_0 = arith.constant 0 : i32
    return %arg0, %c0_i32 : i32, i32
  }
}

module attributes {stable_mosaic.version = 11 : i64} {
  func.func @_attn_kernel(%arg0: i32, %arg1: memref<1x4x7x8xf32, #tpu.memory_space<vmem>>, %arg2: memref<1x4x7x8xf32, #tpu.memory_space<vmem>>, %arg3: memref<1x4x7x8xf32, #tpu.memory_space<vmem>>, %arg4: memref<1x4x7x7xf32, #tpu.memory_space<vmem>>, %arg5: memref<1x4x7x8xf32, #tpu.memory_space<vmem>>) attributes {dimension_semantics = [#tpu.dimension_semantics<parallel>], iteration_bounds = array<i64: 2>, scalar_prefetch = 0 : i64, scratch_operands = 0 : i64, tpu.core_type = #tpu.core_type<tc>, window_params = [{transform_indices = @transform_0, window_bounds = array<i64: 1, 4, 7, 8>}, {transform_indices = @transform_1, window_bounds = array<i64: 1, 4, 7, 8>}, {transform_indices = @transform_2, window_bounds = array<i64: 1, 4, 7, 8>}, {transform_indices = @transform_3, window_bounds = array<i64: 1, 4, 7, 7>}, {transform_indices = @transform_4, window_bounds = array<i64: 1, 4, 7, 8>}]} {
    %c0 = arith.constant 0 : index
    %c0_0 = arith.constant 0 : index
    %c0_1 = arith.constant 0 : index
    %c0_2 = arith.constant 0 : index
    %0 = vector.load %arg1[%c0, %c0_0, %c0_1, %c0_2] : memref<1x4x7x8xf32, #tpu.memory_space<vmem>>, vector<1x4x7x8xf32>
    %1 = vector.shape_cast %0 : vector<1x4x7x8xf32> to vector<4x7x8xf32>
    %2 = arith.truncf %1 : vector<4x7x8xf32> to vector<4x7x8xbf16>
    %c0_3 = arith.constant 0 : index
    %c0_4 = arith.constant 0 : index
    %c0_5 = arith.constant 0 : index
    %c0_6 = arith.constant 0 : index
    %3 = vector.load %arg2[%c0_3, %c0_4, %c0_5, %c0_6] : memref<1x4x7x8xf32, #tpu.memory_space<vmem>>, vector<1x4x7x8xf32>
    %4 = vector.shape_cast %3 : vector<1x4x7x8xf32> to vector<4x7x8xf32>
    %5 = arith.truncf %4 : vector<4x7x8xf32> to vector<4x7x8xbf16>
    "tpu.trace_start"() <{level = 10 : i32, message = "htd,hsd->hts"}> : () -> ()
    %cst = arith.constant dense<0.000000e+00> : vector<4x7x7xf32>
    %6 = tpu.matmul %2, %5, %cst {dimension_numbers = #tpu.dot_dimension_numbers<[2], [2], [1], [1], [0, 0, 0, 1, 1, 1], [0], [0]>} : vector<4x7x8xbf16>, vector<4x7x8xbf16>, vector<4x7x7xf32> -> vector<4x7x7xf32>
    "tpu.trace_stop"() : () -> ()
    %c0_7 = arith.constant 0 : index
    %c0_8 = arith.constant 0 : index
    %c0_9 = arith.constant 0 : index
    %c0_10 = arith.constant 0 : index
    %7 = vector.load %arg4[%c0_7, %c0_8, %c0_9, %c0_10] : memref<1x4x7x7xf32, #tpu.memory_space<vmem>>, vector<1x4x7x7xf32>
    %8 = vector.shape_cast %7 : vector<1x4x7x7xf32> to vector<4x7x7xf32>
    %9 = arith.addf %6, %8 : vector<4x7x7xf32>
    %cst_11 = arith.constant 0.176776692 : f32
    %10 = vector.broadcast %cst_11 : f32 to vector<4x7x7xf32>
    %11 = arith.mulf %9, %10 : vector<4x7x7xf32>
    %cst_12 = arith.constant dense<0xFF800000> : vector<4x7xf32>
    %12 = vector.multi_reduction <maximumf>, %11, %cst_12 [2] : vector<4x7x7xf32> to vector<4x7xf32>
    %13 = vector.shape_cast %12 : vector<4x7xf32> to vector<4x7x1xf32>
    %14 = vector.broadcast %13 : vector<4x7x1xf32> to vector<4x7x7xf32>
    %15 = arith.subf %11, %14 : vector<4x7x7xf32>
    %16 = math.exp %15 : vector<4x7x7xf32>
    %cst_13 = arith.constant dense<0.000000e+00> : vector<4x7xf32>
    %17 = vector.multi_reduction <add>, %16, %cst_13 [2] : vector<4x7x7xf32> to vector<4x7xf32>
    %18 = vector.shape_cast %17 : vector<4x7xf32> to vector<4x7x1xf32>
    %19 = tpu.reciprocal %18 {approx = true} : vector<4x7x1xf32> -> vector<4x7x1xf32>
    %20 = vector.broadcast %19 : vector<4x7x1xf32> to vector<4x7x7xf32>
    %21 = arith.mulf %16, %20 : vector<4x7x7xf32>
    %22 = arith.truncf %21 : vector<4x7x7xf32> to vector<4x7x7xbf16>
    %c0_14 = arith.constant 0 : index
    %c0_15 = arith.constant 0 : index
    %c0_16 = arith.constant 0 : index
    %c0_17 = arith.constant 0 : index
    %23 = vector.load %arg3[%c0_14, %c0_15, %c0_16, %c0_17] : memref<1x4x7x8xf32, #tpu.memory_space<vmem>>, vector<1x4x7x8xf32>
    %24 = vector.shape_cast %23 : vector<1x4x7x8xf32> to vector<4x7x8xf32>
    %25 = arith.truncf %24 : vector<4x7x8xf32> to vector<4x7x8xbf16>
    "tpu.trace_start"() <{level = 10 : i32, message = "hts,hsd->htd"}> : () -> ()
    %cst_18 = arith.constant dense<0.000000e+00> : vector<4x7x8xf32>
    %26 = tpu.matmul %22, %25, %cst_18 {dimension_numbers = #tpu.dot_dimension_numbers<[2], [1], [1], [2], [0, 0, 0, 1, 1, 2], [0], [0]>} : vector<4x7x7xbf16>, vector<4x7x8xbf16>, vector<4x7x8xf32> -> vector<4x7x8xf32>
    "tpu.trace_stop"() : () -> ()
    %c0_19 = arith.constant 0 : index
    %c0_20 = arith.constant 0 : index
    %c0_21 = arith.constant 0 : index
    %c0_22 = arith.constant 0 : index
    %27 = vector.load %arg5[%c0_19, %c0_20, %c0_21, %c0_22] : memref<1x4x7x8xf32, #tpu.memory_space<vmem>>, vector<1x4x7x8xf32>
    %28 = vector.shape_cast %27 : vector<1x4x7x8xf32> to vector<4x7x8xf32>
    %29 = vector.shape_cast %26 : vector<4x7x8xf32> to vector<1x4x7x8xf32>
    tpu.vector_store %arg5[%c0_19, %c0_20, %c0_21, %c0_22], %29 {strides = array<i32>} : memref<1x4x7x8xf32, #tpu.memory_space<vmem>>, vector<1x4x7x8xf32>,
    return
  }
  func.func @transform_0(%arg0: i32) -> (i32, i32, i32, i32) {
    %c0_i32 = arith.constant 0 : i32
    %c0_i32_0 = arith.constant 0 : i32
    %c0_i32_1 = arith.constant 0 : i32
    %c0_i32_2 = arith.constant 0 : i32
    return %arg0, %c0_i32, %c0_i32_0, %c0_i32_1 : i32, i32, i32, i32
  }
  func.func @transform_1(%arg0: i32) -> (i32, i32, i32, i32) {
    %c0_i32 = arith.constant 0 : i32
    %c0_i32_0 = arith.constant 0 : i32
    %c0_i32_1 = arith.constant 0 : i32
    %c0_i32_2 = arith.constant 0 : i32
    return %arg0, %c0_i32, %c0_i32_0, %c0_i32_1 : i32, i32, i32, i32
  }
  func.func @transform_2(%arg0: i32) -> (i32, i32, i32, i32) {
    %c0_i32 = arith.constant 0 : i32
    %c0_i32_0 = arith.constant 0 : i32
    %c0_i32_1 = arith.constant 0 : i32
    %c0_i32_2 = arith.constant 0 : i32
    return %arg0, %c0_i32, %c0_i32_0, %c0_i32_1 : i32, i32, i32, i32
  }
  func.func @transform_3(%arg0: i32) -> (i32, i32, i32, i32) {
    %c0_i32 = arith.constant 0 : i32
    %c0_i32_0 = arith.constant 0 : i32
    %c0_i32_1 = arith.constant 0 : i32
    %c0_i32_2 = arith.constant 0 : i32
    return %arg0, %c0_i32, %c0_i32_0, %c0_i32_1 : i32, i32, i32, i32
  }
  func.func @transform_4(%arg0: i32) -> (i32, i32, i32, i32) {
    %c0_i32 = arith.constant 0 : i32
    %c0_i32_0 = arith.constant 0 : i32
    %c0_i32_1 = arith.constant 0 : i32
    %c0_i32_2 = arith.constant 0 : i32
    return %arg0, %c0_i32, %c0_i32_0, %c0_i32_1 : i32, i32, i32, i32
  }
}

module attributes {stable_mosaic.version = 11 : i64} {
  func.func @_linear_res_kernel(%arg0: i32, %arg1: memref<16x32xf32, #tpu.memory_space<vmem>>, %arg2: memref<16x32xf32, #tpu.memory_space<vmem>>, %arg3: memref<32x32xf32, #tpu.memory_space<vmem>>, %arg4: memref<1x32xf32, #tpu.memory_space<vmem>>, %arg5: memref<16x32xf32, #tpu.memory_space<vmem>>) attributes {dimension_semantics = [#tpu.dimension_semantics<parallel>], iteration_bounds = array<i64: 1>, scalar_prefetch = 0 : i64, scratch_operands = 0 : i64, tpu.core_type = #tpu.core_type<tc>, window_params = [{transform_indices = @transform_0, window_bounds = array<i64: 16, 32>}, {transform_indices = @transform_1, window_bounds = array<i64: 16, 32>}, {pipeline_mode = #tpu.pipeline_mode<synchronous>, transform_indices = @transform_2, window_bounds = array<i64: 32, 32>}, {pipeline_mode = #tpu.pipeline_mode<synchronous>, transform_indices = @transform_3, window_bounds = array<i64: 1, 32>}, {transform_indices = @transform_4, window_bounds = array<i64: 16, 32>}]} {
    %c0 = arith.constant 0 : index
    %c0_0 = arith.constant 0 : index
    %0 = vector.load %arg2[%c0, %c0_0] : memref<16x32xf32, #tpu.memory_space<vmem>>, vector<16x32xf32>
    %c0_1 = arith.constant 0 : index
    %c0_2 = arith.constant 0 : index
    %1 = vector.load %arg1[%c0_1, %c0_2] : memref<16x32xf32, #tpu.memory_space<vmem>>, vector<16x32xf32>
    %c0_3 = arith.constant 0 : index
    %c0_4 = arith.constant 0 : index
    %2 = vector.load %arg3[%c0_3, %c0_4] : memref<32x32xf32, #tpu.memory_space<vmem>>, vector<32x32xf32>
    %3 = arith.truncf %1 : vector<16x32xf32> to vector<16x32xbf16>
    %4 = arith.truncf %2 : vector<32x32xf32> to vector<32x32xbf16>
    %cst = arith.constant dense<0.000000e+00> : vector<16x32xf32>
    %5 = tpu.matmul %3, %4, %cst {dimension_numbers = #tpu.dot_dimension_numbers<[1], [0], [0], [1], [0, 0, 1, 1], [], []>} : vector<16x32xbf16>, vector<32x32xbf16>, vector<16x32xf32> -> vector<16x32xf32>
    %6 = arith.addf %0, %5 : vector<16x32xf32>
    %c0_5 = arith.constant 0 : index
    %c0_6 = arith.constant 0 : index
    %7 = vector.load %arg4[%c0_5, %c0_6] : memref<1x32xf32, #tpu.memory_space<vmem>>, vector<1x32xf32>
    %8 = vector.broadcast %7 : vector<1x32xf32> to vector<16x32xf32>
    %9 = arith.addf %6, %8 : vector<16x32xf32>
    %c0_7 = arith.constant 0 : index
    %c0_8 = arith.constant 0 : index
    %10 = vector.load %arg5[%c0_7, %c0_8] : memref<16x32xf32, #tpu.memory_space<vmem>>, vector<16x32xf32>
    tpu.vector_store %arg5[%c0_7, %c0_8], %9 {strides = array<i32>} : memref<16x32xf32, #tpu.memory_space<vmem>>, vector<16x32xf32>,
    return
  }
  func.func @transform_0(%arg0: i32) -> (i32, i32) {
    %c0_i32 = arith.constant 0 : i32
    %c0_i32_0 = arith.constant 0 : i32
    return %arg0, %c0_i32 : i32, i32
  }
  func.func @transform_1(%arg0: i32) -> (i32, i32) {
    %c0_i32 = arith.constant 0 : i32
    %c0_i32_0 = arith.constant 0 : i32
    return %arg0, %c0_i32 : i32, i32
  }
  func.func @transform_2(%arg0: i32) -> (i32, i32) {
    %c0_i32 = arith.constant 0 : i32
    %c0_i32_0 = arith.constant 0 : i32
    %c0_i32_1 = arith.constant 0 : i32
    return %c0_i32, %c0_i32_0 : i32, i32
  }
  func.func @transform_3(%arg0: i32) -> (i32, i32) {
    %c0_i32 = arith.constant 0 : i32
    %c0_i32_0 = arith.constant 0 : i32
    %c0_i32_1 = arith.constant 0 : i32
    return %c0_i32, %c0_i32_0 : i32, i32
  }
  func.func @transform_4(%arg0: i32) -> (i32, i32) {
    %c0_i32 = arith.constant 0 : i32
    %c0_i32_0 = arith.constant 0 : i32
    return %arg0, %c0_i32 : i32, i32
  }
}

module attributes {stable_mosaic.version = 11 : i64} {
  func.func @_ln_glu_kernel(%arg0: i32, %arg1: memref<16x32xf32, #tpu.memory_space<vmem>>, %arg2: memref<1x32xf32, #tpu.memory_space<vmem>>, %arg3: memref<1x32xf32, #tpu.memory_space<vmem>>, %arg4: memref<32x32xf32, #tpu.memory_space<vmem>>, %arg5: memref<1x32xf32, #tpu.memory_space<vmem>>, %arg6: memref<32x32xf32, #tpu.memory_space<vmem>>, %arg7: memref<1x32xf32, #tpu.memory_space<vmem>>, %arg8: memref<16x32xf32, #tpu.memory_space<vmem>>) attributes {dimension_semantics = [#tpu.dimension_semantics<parallel>], iteration_bounds = array<i64: 1>, scalar_prefetch = 0 : i64, scratch_operands = 0 : i64, tpu.core_type = #tpu.core_type<tc>, window_params = [{transform_indices = @transform_0, window_bounds = array<i64: 16, 32>}, {pipeline_mode = #tpu.pipeline_mode<synchronous>, transform_indices = @transform_1, window_bounds = array<i64: 1, 32>}, {pipeline_mode = #tpu.pipeline_mode<synchronous>, transform_indices = @transform_2, window_bounds = array<i64: 1, 32>}, {pipeline_mode = #tpu.pipeline_mode<synchronous>, transform_indices = @transform_3, window_bounds = array<i64: 32, 32>}, {pipeline_mode = #tpu.pipeline_mode<synchronous>, transform_indices = @transform_4, window_bounds = array<i64: 1, 32>}, {pipeline_mode = #tpu.pipeline_mode<synchronous>, transform_indices = @transform_5, window_bounds = array<i64: 32, 32>}, {pipeline_mode = #tpu.pipeline_mode<synchronous>, transform_indices = @transform_6, window_bounds = array<i64: 1, 32>}, {transform_indices = @transform_7, window_bounds = array<i64: 16, 32>}]} {
    %c0 = arith.constant 0 : index
    %c0_0 = arith.constant 0 : index
    %0 = vector.load %arg1[%c0, %c0_0] : memref<16x32xf32, #tpu.memory_space<vmem>>, vector<16x32xf32>
    %c0_1 = arith.constant 0 : index
    %c0_2 = arith.constant 0 : index
    %1 = vector.load %arg2[%c0_1, %c0_2] : memref<1x32xf32, #tpu.memory_space<vmem>>, vector<1x32xf32>
    %c0_3 = arith.constant 0 : index
    %c0_4 = arith.constant 0 : index
    %2 = vector.load %arg3[%c0_3, %c0_4] : memref<1x32xf32, #tpu.memory_space<vmem>>, vector<1x32xf32>
    %cst = arith.constant dense<0.000000e+00> : vector<16xf32>
    %3 = vector.multi_reduction <add>, %0, %cst [1] : vector<16x32xf32> to vector<16xf32>
    %4 = vector.shape_cast %3 : vector<16xf32> to vector<16x1xf32>
    %cst_5 = arith.constant 3.200000e+01 : f32
    %5 = vector.broadcast %cst_5 : f32 to vector<16x1xf32>
    %6 = arith.divf %4, %5 : vector<16x1xf32>
    %7 = vector.broadcast %6 : vector<16x1xf32> to vector<16x32xf32>
    %8 = arith.subf %0, %7 : vector<16x32xf32>
    %9 = arith.mulf %8, %8 : vector<16x32xf32>
    %cst_6 = arith.constant dense<0.000000e+00> : vector<16xf32>
    %10 = vector.multi_reduction <add>, %9, %cst_6 [1] : vector<16x32xf32> to vector<16xf32>
    %11 = vector.shape_cast %10 : vector<16xf32> to vector<16x1xf32>
    %cst_7 = arith.constant 3.200000e+01 : f32
    %12 = vector.broadcast %cst_7 : f32 to vector<16x1xf32>
    %13 = arith.divf %11, %12 : vector<16x1xf32>
    %14 = vector.broadcast %6 : vector<16x1xf32> to vector<16x32xf32>
    %15 = arith.subf %0, %14 : vector<16x32xf32>
    %cst_8 = arith.constant 9.99999974E-6 : f32
    %16 = vector.broadcast %cst_8 : f32 to vector<16x1xf32>
    %17 = arith.addf %13, %16 : vector<16x1xf32>
    %18 = math.rsqrt %17 : vector<16x1xf32>
    %19 = vector.broadcast %18 : vector<16x1xf32> to vector<16x32xf32>
    %20 = arith.mulf %15, %19 : vector<16x32xf32>
    %21 = vector.broadcast %1 : vector<1x32xf32> to vector<16x32xf32>
    %22 = arith.mulf %20, %21 : vector<16x32xf32>
    %23 = vector.broadcast %2 : vector<1x32xf32> to vector<16x32xf32>
    %24 = arith.addf %22, %23 : vector<16x32xf32>
    %c0_9 = arith.constant 0 : index
    %c0_10 = arith.constant 0 : index
    %25 = vector.load %arg4[%c0_9, %c0_10] : memref<32x32xf32, #tpu.memory_space<vmem>>, vector<32x32xf32>
    %26 = arith.truncf %24 : vector<16x32xf32> to vector<16x32xbf16>
    %27 = arith.truncf %25 : vector<32x32xf32> to vector<32x32xbf16>
    %cst_11 = arith.constant dense<0.000000e+00> : vector<16x32xf32>
    %28 = tpu.matmul %26, %27, %cst_11 {dimension_numbers = #tpu.dot_dimension_numbers<[1], [0], [0], [1], [0, 0, 1, 1], [], []>} : vector<16x32xbf16>, vector<32x32xbf16>, vector<16x32xf32> -> vector<16x32xf32>
    %c0_12 = arith.constant 0 : index
    %c0_13 = arith.constant 0 : index
    %29 = vector.load %arg5[%c0_12, %c0_13] : memref<1x32xf32, #tpu.memory_space<vmem>>, vector<1x32xf32>
    %30 = vector.broadcast %29 : vector<1x32xf32> to vector<16x32xf32>
    %31 = arith.addf %28, %30 : vector<16x32xf32>
    %c0_14 = arith.constant 0 : index
    %c0_15 = arith.constant 0 : index
    %32 = vector.load %arg6[%c0_14, %c0_15] : memref<32x32xf32, #tpu.memory_space<vmem>>, vector<32x32xf32>
    %33 = arith.truncf %24 : vector<16x32xf32> to vector<16x32xbf16>
    %34 = arith.truncf %32 : vector<32x32xf32> to vector<32x32xbf16>
    %cst_16 = arith.constant dense<0.000000e+00> : vector<16x32xf32>
    %35 = tpu.matmul %33, %34, %cst_16 {dimension_numbers = #tpu.dot_dimension_numbers<[1], [0], [0], [1], [0, 0, 1, 1], [], []>} : vector<16x32xbf16>, vector<32x32xbf16>, vector<16x32xf32> -> vector<16x32xf32>
    %c0_17 = arith.constant 0 : index
    %c0_18 = arith.constant 0 : index
    %36 = vector.load %arg7[%c0_17, %c0_18] : memref<1x32xf32, #tpu.memory_space<vmem>>, vector<1x32xf32>
    %37 = vector.broadcast %36 : vector<1x32xf32> to vector<16x32xf32>
    %38 = arith.addf %35, %37 : vector<16x32xf32>
    %39 = arith.negf %38 : vector<16x32xf32>
    %40 = math.exp %39 : vector<16x32xf32>
    %cst_19 = arith.constant 1.000000e+00 : f32
    %41 = vector.broadcast %cst_19 : f32 to vector<16x32xf32>
    %42 = arith.addf %41, %40 : vector<16x32xf32>
    %43 = arith.divf %41, %42 : vector<16x32xf32>
    %44 = arith.mulf %31, %43 : vector<16x32xf32>
    %c0_20 = arith.constant 0 : index
    %c0_21 = arith.constant 0 : index
    %45 = vector.load %arg8[%c0_20, %c0_21] : memref<16x32xf32, #tpu.memory_space<vmem>>, vector<16x32xf32>
    tpu.vector_store %arg8[%c0_20, %c0_21], %44 {strides = array<i32>} : memref<16x32xf32, #tpu.memory_space<vmem>>, vector<16x32xf32>,
    return
  }
  func.func @transform_0(%arg0: i32) -> (i32, i32) {
    %c0_i32 = arith.constant 0 : i32
    %c0_i32_0 = arith.constant 0 : i32
    return %arg0, %c0_i32 : i32, i32
  }
  func.func @transform_1(%arg0: i32) -> (i32, i32) {
    %c0_i32 = arith.constant 0 : i32
    %c0_i32_0 = arith.constant 0 : i32
    %c0_i32_1 = arith.constant 0 : i32
    return %c0_i32, %c0_i32_0 : i32, i32
  }
  func.func @transform_2(%arg0: i32) -> (i32, i32) {
    %c0_i32 = arith.constant 0 : i32
    %c0_i32_0 = arith.constant 0 : i32
    %c0_i32_1 = arith.constant 0 : i32
    return %c0_i32, %c0_i32_0 : i32, i32
  }
  func.func @transform_3(%arg0: i32) -> (i32, i32) {
    %c0_i32 = arith.constant 0 : i32
    %c0_i32_0 = arith.constant 0 : i32
    %c0_i32_1 = arith.constant 0 : i32
    return %c0_i32, %c0_i32_0 : i32, i32
  }
  func.func @transform_4(%arg0: i32) -> (i32, i32) {
    %c0_i32 = arith.constant 0 : i32
    %c0_i32_0 = arith.constant 0 : i32
    %c0_i32_1 = arith.constant 0 : i32
    return %c0_i32, %c0_i32_0 : i32, i32
  }
  func.func @transform_5(%arg0: i32) -> (i32, i32) {
    %c0_i32 = arith.constant 0 : i32
    %c0_i32_0 = arith.constant 0 : i32
    %c0_i32_1 = arith.constant 0 : i32
    return %c0_i32, %c0_i32_0 : i32, i32
  }
  func.func @transform_6(%arg0: i32) -> (i32, i32) {
    %c0_i32 = arith.constant 0 : i32
    %c0_i32_0 = arith.constant 0 : i32
    %c0_i32_1 = arith.constant 0 : i32
    return %c0_i32, %c0_i32_0 : i32, i32
  }
  func.func @transform_7(%arg0: i32) -> (i32, i32) {
    %c0_i32 = arith.constant 0 : i32
    %c0_i32_0 = arith.constant 0 : i32
    return %arg0, %c0_i32 : i32, i32
  }
}

module attributes {stable_mosaic.version = 11 : i64} {
  func.func @_dwconv_pw_kernel(%arg0: i32, %arg1: memref<1x13x32xf32, #tpu.memory_space<vmem>>, %arg2: memref<1x7x32xf32, #tpu.memory_space<vmem>>, %arg3: memref<7x32xf32, #tpu.memory_space<vmem>>, %arg4: memref<1x32xf32, #tpu.memory_space<vmem>>, %arg5: memref<1x32xf32, #tpu.memory_space<vmem>>, %arg6: memref<32x32xf32, #tpu.memory_space<vmem>>, %arg7: memref<1x32xf32, #tpu.memory_space<vmem>>, %arg8: memref<1x7x32xf32, #tpu.memory_space<vmem>>) attributes {dimension_semantics = [#tpu.dimension_semantics<parallel>], iteration_bounds = array<i64: 2>, scalar_prefetch = 0 : i64, scratch_operands = 0 : i64, tpu.core_type = #tpu.core_type<tc>, window_params = [{transform_indices = @transform_0, window_bounds = array<i64: 1, 13, 32>}, {transform_indices = @transform_1, window_bounds = array<i64: 1, 7, 32>}, {pipeline_mode = #tpu.pipeline_mode<synchronous>, transform_indices = @transform_2, window_bounds = array<i64: 7, 32>}, {pipeline_mode = #tpu.pipeline_mode<synchronous>, transform_indices = @transform_3, window_bounds = array<i64: 1, 32>}, {pipeline_mode = #tpu.pipeline_mode<synchronous>, transform_indices = @transform_4, window_bounds = array<i64: 1, 32>}, {pipeline_mode = #tpu.pipeline_mode<synchronous>, transform_indices = @transform_5, window_bounds = array<i64: 32, 32>}, {pipeline_mode = #tpu.pipeline_mode<synchronous>, transform_indices = @transform_6, window_bounds = array<i64: 1, 32>}, {transform_indices = @transform_7, window_bounds = array<i64: 1, 7, 32>}]} {
    %c0 = arith.constant 0 : index
    %c0_0 = arith.constant 0 : index
    %c0_1 = arith.constant 0 : index
    %0 = vector.load %arg1[%c0, %c0_0, %c0_1] : memref<1x13x32xf32, #tpu.memory_space<vmem>>, vector<1x13x32xf32>
    %1 = vector.shape_cast %0 : vector<1x13x32xf32> to vector<13x32xf32>
    %c0_2 = arith.constant 0 : index
    %c0_3 = arith.constant 0 : index
    %2 = vector.load %arg3[%c0_2, %c0_3] : memref<7x32xf32, #tpu.memory_space<vmem>>, vector<7x32xf32>
    %3 = vector.extract_strided_slice %1 {offsets = [0, 0], sizes = [7, 32], strides = [1, 1]} : vector<13x32xf32> to vector<7x32xf32>
    %4 = vector.extract_strided_slice %2 {offsets = [0, 0], sizes = [1, 32], strides = [1, 1]} : vector<7x32xf32> to vector<1x32xf32>
    %5 = vector.shape_cast %4 : vector<1x32xf32> to vector<32xf32>
    %6 = vector.shape_cast %5 : vector<32xf32> to vector<1x32xf32>
    %7 = vector.broadcast %6 : vector<1x32xf32> to vector<7x32xf32>
    %8 = arith.mulf %3, %7 : vector<7x32xf32>
    %9 = vector.extract_strided_slice %1 {offsets = [1, 0], sizes = [7, 32], strides = [1, 1]} : vector<13x32xf32> to vector<7x32xf32>
    %10 = vector.extract_strided_slice %2 {offsets = [1, 0], sizes = [1, 32], strides = [1, 1]} : vector<7x32xf32> to vector<1x32xf32>
    %11 = vector.shape_cast %10 : vector<1x32xf32> to vector<32xf32>
    %12 = vector.shape_cast %11 : vector<32xf32> to vector<1x32xf32>
    %13 = vector.broadcast %12 : vector<1x32xf32> to vector<7x32xf32>
    %14 = arith.mulf %9, %13 : vector<7x32xf32>
    %15 = arith.addf %8, %14 : vector<7x32xf32>
    %16 = vector.extract_strided_slice %1 {offsets = [2, 0], sizes = [7, 32], strides = [1, 1]} : vector<13x32xf32> to vector<7x32xf32>
    %17 = vector.extract_strided_slice %2 {offsets = [2, 0], sizes = [1, 32], strides = [1, 1]} : vector<7x32xf32> to vector<1x32xf32>
    %18 = vector.shape_cast %17 : vector<1x32xf32> to vector<32xf32>
    %19 = vector.shape_cast %18 : vector<32xf32> to vector<1x32xf32>
    %20 = vector.broadcast %19 : vector<1x32xf32> to vector<7x32xf32>
    %21 = arith.mulf %16, %20 : vector<7x32xf32>
    %22 = arith.addf %15, %21 : vector<7x32xf32>
    %23 = vector.extract_strided_slice %1 {offsets = [3, 0], sizes = [7, 32], strides = [1, 1]} : vector<13x32xf32> to vector<7x32xf32>
    %24 = vector.extract_strided_slice %2 {offsets = [3, 0], sizes = [1, 32], strides = [1, 1]} : vector<7x32xf32> to vector<1x32xf32>
    %25 = vector.shape_cast %24 : vector<1x32xf32> to vector<32xf32>
    %26 = vector.shape_cast %25 : vector<32xf32> to vector<1x32xf32>
    %27 = vector.broadcast %26 : vector<1x32xf32> to vector<7x32xf32>
    %28 = arith.mulf %23, %27 : vector<7x32xf32>
    %29 = arith.addf %22, %28 : vector<7x32xf32>
    %30 = vector.extract_strided_slice %1 {offsets = [4, 0], sizes = [7, 32], strides = [1, 1]} : vector<13x32xf32> to vector<7x32xf32>
    %31 = vector.extract_strided_slice %2 {offsets = [4, 0], sizes = [1, 32], strides = [1, 1]} : vector<7x32xf32> to vector<1x32xf32>
    %32 = vector.shape_cast %31 : vector<1x32xf32> to vector<32xf32>
    %33 = vector.shape_cast %32 : vector<32xf32> to vector<1x32xf32>
    %34 = vector.broadcast %33 : vector<1x32xf32> to vector<7x32xf32>
    %35 = arith.mulf %30, %34 : vector<7x32xf32>
    %36 = arith.addf %29, %35 : vector<7x32xf32>
    %37 = vector.extract_strided_slice %1 {offsets = [5, 0], sizes = [7, 32], strides = [1, 1]} : vector<13x32xf32> to vector<7x32xf32>
    %38 = vector.extract_strided_slice %2 {offsets = [5, 0], sizes = [1, 32], strides = [1, 1]} : vector<7x32xf32> to vector<1x32xf32>
    %39 = vector.shape_cast %38 : vector<1x32xf32> to vector<32xf32>
    %40 = vector.shape_cast %39 : vector<32xf32> to vector<1x32xf32>
    %41 = vector.broadcast %40 : vector<1x32xf32> to vector<7x32xf32>
    %42 = arith.mulf %37, %41 : vector<7x32xf32>
    %43 = arith.addf %36, %42 : vector<7x32xf32>
    %44 = vector.extract_strided_slice %1 {offsets = [6, 0], sizes = [7, 32], strides = [1, 1]} : vector<13x32xf32> to vector<7x32xf32>
    %45 = vector.extract_strided_slice %2 {offsets = [6, 0], sizes = [1, 32], strides = [1, 1]} : vector<7x32xf32> to vector<1x32xf32>
    %46 = vector.shape_cast %45 : vector<1x32xf32> to vector<32xf32>
    %47 = vector.shape_cast %46 : vector<32xf32> to vector<1x32xf32>
    %48 = vector.broadcast %47 : vector<1x32xf32> to vector<7x32xf32>
    %49 = arith.mulf %44, %48 : vector<7x32xf32>
    %50 = arith.addf %43, %49 : vector<7x32xf32>
    %c0_4 = arith.constant 0 : index
    %c0_5 = arith.constant 0 : index
    %51 = vector.load %arg4[%c0_4, %c0_5] : memref<1x32xf32, #tpu.memory_space<vmem>>, vector<1x32xf32>
    %52 = vector.broadcast %51 : vector<1x32xf32> to vector<7x32xf32>
    %53 = arith.mulf %50, %52 : vector<7x32xf32>
    %c0_6 = arith.constant 0 : index
    %c0_7 = arith.constant 0 : index
    %54 = vector.load %arg5[%c0_6, %c0_7] : memref<1x32xf32, #tpu.memory_space<vmem>>, vector<1x32xf32>
    %55 = vector.broadcast %54 : vector<1x32xf32> to vector<7x32xf32>
    %56 = arith.addf %53, %55 : vector<7x32xf32>
    %57 = arith.negf %56 : vector<7x32xf32>
    %58 = math.exp %57 : vector<7x32xf32>
    %cst = arith.constant 1.000000e+00 : f32
    %59 = vector.broadcast %cst : f32 to vector<7x32xf32>
    %60 = arith.addf %59, %58 : vector<7x32xf32>
    %61 = arith.divf %59, %60 : vector<7x32xf32>
    %62 = arith.mulf %56, %61 : vector<7x32xf32>
    %c0_8 = arith.constant 0 : index
    %c0_9 = arith.constant 0 : index
    %c0_10 = arith.constant 0 : index
    %63 = vector.load %arg2[%c0_8, %c0_9, %c0_10] : memref<1x7x32xf32, #tpu.memory_space<vmem>>, vector<1x7x32xf32>
    %64 = vector.shape_cast %63 : vector<1x7x32xf32> to vector<7x32xf32>
    %c0_11 = arith.constant 0 : index
    %c0_12 = arith.constant 0 : index
    %65 = vector.load %arg6[%c0_11, %c0_12] : memref<32x32xf32, #tpu.memory_space<vmem>>, vector<32x32xf32>
    %66 = arith.truncf %62 : vector<7x32xf32> to vector<7x32xbf16>
    %67 = arith.truncf %65 : vector<32x32xf32> to vector<32x32xbf16>
    %cst_13 = arith.constant dense<0.000000e+00> : vector<7x32xf32>
    %68 = tpu.matmul %66, %67, %cst_13 {dimension_numbers = #tpu.dot_dimension_numbers<[1], [0], [0], [1], [0, 0, 1, 1], [], []>} : vector<7x32xbf16>, vector<32x32xbf16>, vector<7x32xf32> -> vector<7x32xf32>
    %69 = arith.addf %64, %68 : vector<7x32xf32>
    %c0_14 = arith.constant 0 : index
    %c0_15 = arith.constant 0 : index
    %70 = vector.load %arg7[%c0_14, %c0_15] : memref<1x32xf32, #tpu.memory_space<vmem>>, vector<1x32xf32>
    %71 = vector.broadcast %70 : vector<1x32xf32> to vector<7x32xf32>
    %72 = arith.addf %69, %71 : vector<7x32xf32>
    %c0_16 = arith.constant 0 : index
    %c0_17 = arith.constant 0 : index
    %c0_18 = arith.constant 0 : index
    %73 = vector.load %arg8[%c0_16, %c0_17, %c0_18] : memref<1x7x32xf32, #tpu.memory_space<vmem>>, vector<1x7x32xf32>
    %74 = vector.shape_cast %73 : vector<1x7x32xf32> to vector<7x32xf32>
    %75 = vector.shape_cast %72 : vector<7x32xf32> to vector<1x7x32xf32>
    tpu.vector_store %arg8[%c0_16, %c0_17, %c0_18], %75 {strides = array<i32>} : memref<1x7x32xf32, #tpu.memory_space<vmem>>, vector<1x7x32xf32>,
    return
  }
  func.func @transform_0(%arg0: i32) -> (i32, i32, i32) {
    %c0_i32 = arith.constant 0 : i32
    %c0_i32_0 = arith.constant 0 : i32
    %c0_i32_1 = arith.constant 0 : i32
    return %arg0, %c0_i32, %c0_i32_0 : i32, i32, i32
  }
  func.func @transform_1(%arg0: i32) -> (i32, i32, i32) {
    %c0_i32 = arith.constant 0 : i32
    %c0_i32_0 = arith.constant 0 : i32
    %c0_i32_1 = arith.constant 0 : i32
    return %arg0, %c0_i32, %c0_i32_0 : i32, i32, i32
  }
  func.func @transform_2(%arg0: i32) -> (i32, i32) {
    %c0_i32 = arith.constant 0 : i32
    %c0_i32_0 = arith.constant 0 : i32
    %c0_i32_1 = arith.constant 0 : i32
    return %c0_i32, %c0_i32_0 : i32, i32
  }
  func.func @transform_3(%arg0: i32) -> (i32, i32) {
    %c0_i32 = arith.constant 0 : i32
    %c0_i32_0 = arith.constant 0 : i32
    %c0_i32_1 = arith.constant 0 : i32
    return %c0_i32, %c0_i32_0 : i32, i32
  }
  func.func @transform_4(%arg0: i32) -> (i32, i32) {
    %c0_i32 = arith.constant 0 : i32
    %c0_i32_0 = arith.constant 0 : i32
    %c0_i32_1 = arith.constant 0 : i32
    return %c0_i32, %c0_i32_0 : i32, i32
  }
  func.func @transform_5(%arg0: i32) -> (i32, i32) {
    %c0_i32 = arith.constant 0 : i32
    %c0_i32_0 = arith.constant 0 : i32
    %c0_i32_1 = arith.constant 0 : i32
    return %c0_i32, %c0_i32_0 : i32, i32
  }
  func.func @transform_6(%arg0: i32) -> (i32, i32) {
    %c0_i32 = arith.constant 0 : i32
    %c0_i32_0 = arith.constant 0 : i32
    %c0_i32_1 = arith.constant 0 : i32
    return %c0_i32, %c0_i32_0 : i32, i32
  }
  func.func @transform_7(%arg0: i32) -> (i32, i32, i32) {
    %c0_i32 = arith.constant 0 : i32
    %c0_i32_0 = arith.constant 0 : i32
    %c0_i32_1 = arith.constant 0 : i32
    return %arg0, %c0_i32, %c0_i32_0 : i32, i32, i32
  }
}

module attributes {stable_mosaic.version = 11 : i64} {
  func.func @_ff_ln_kernel(%arg0: i32, %arg1: memref<16x32xf32, #tpu.memory_space<vmem>>, %arg2: memref<1x32xf32, #tpu.memory_space<vmem>>, %arg3: memref<1x32xf32, #tpu.memory_space<vmem>>, %arg4: memref<32x128xf32, #tpu.memory_space<vmem>>, %arg5: memref<1x128xf32, #tpu.memory_space<vmem>>, %arg6: memref<128x32xf32, #tpu.memory_space<vmem>>, %arg7: memref<1x32xf32, #tpu.memory_space<vmem>>, %arg8: memref<1x32xf32, #tpu.memory_space<vmem>>, %arg9: memref<1x32xf32, #tpu.memory_space<vmem>>, %arg10: memref<16x32xf32, #tpu.memory_space<vmem>>) attributes {dimension_semantics = [#tpu.dimension_semantics<parallel>], iteration_bounds = array<i64: 1>, scalar_prefetch = 0 : i64, scratch_operands = 0 : i64, tpu.core_type = #tpu.core_type<tc>, window_params = [{transform_indices = @transform_0, window_bounds = array<i64: 16, 32>}, {pipeline_mode = #tpu.pipeline_mode<synchronous>, transform_indices = @transform_1, window_bounds = array<i64: 1, 32>}, {pipeline_mode = #tpu.pipeline_mode<synchronous>, transform_indices = @transform_2, window_bounds = array<i64: 1, 32>}, {pipeline_mode = #tpu.pipeline_mode<synchronous>, transform_indices = @transform_3, window_bounds = array<i64: 32, 128>}, {pipeline_mode = #tpu.pipeline_mode<synchronous>, transform_indices = @transform_4, window_bounds = array<i64: 1, 128>}, {pipeline_mode = #tpu.pipeline_mode<synchronous>, transform_indices = @transform_5, window_bounds = array<i64: 128, 32>}, {pipeline_mode = #tpu.pipeline_mode<synchronous>, transform_indices = @transform_6, window_bounds = array<i64: 1, 32>}, {pipeline_mode = #tpu.pipeline_mode<synchronous>, transform_indices = @transform_7, window_bounds = array<i64: 1, 32>}, {pipeline_mode = #tpu.pipeline_mode<synchronous>, transform_indices = @transform_8, window_bounds = array<i64: 1, 32>}, {transform_indices = @transform_9, window_bounds = array<i64: 16, 32>}]} {
    %c0 = arith.constant 0 : index
    %c0_0 = arith.constant 0 : index
    %0 = vector.load %arg1[%c0, %c0_0] : memref<16x32xf32, #tpu.memory_space<vmem>>, vector<16x32xf32>
    %c0_1 = arith.constant 0 : index
    %c0_2 = arith.constant 0 : index
    %1 = vector.load %arg2[%c0_1, %c0_2] : memref<1x32xf32, #tpu.memory_space<vmem>>, vector<1x32xf32>
    %c0_3 = arith.constant 0 : index
    %c0_4 = arith.constant 0 : index
    %2 = vector.load %arg3[%c0_3, %c0_4] : memref<1x32xf32, #tpu.memory_space<vmem>>, vector<1x32xf32>
    %c0_5 = arith.constant 0 : index
    %c0_6 = arith.constant 0 : index
    %3 = vector.load %arg4[%c0_5, %c0_6] : memref<32x128xf32, #tpu.memory_space<vmem>>, vector<32x128xf32>
    %c0_7 = arith.constant 0 : index
    %c0_8 = arith.constant 0 : index
    %4 = vector.load %arg5[%c0_7, %c0_8] : memref<1x128xf32, #tpu.memory_space<vmem>>, vector<1x128xf32>
    %c0_9 = arith.constant 0 : index
    %c0_10 = arith.constant 0 : index
    %5 = vector.load %arg6[%c0_9, %c0_10] : memref<128x32xf32, #tpu.memory_space<vmem>>, vector<128x32xf32>
    %c0_11 = arith.constant 0 : index
    %c0_12 = arith.constant 0 : index
    %6 = vector.load %arg7[%c0_11, %c0_12] : memref<1x32xf32, #tpu.memory_space<vmem>>, vector<1x32xf32>
    %cst = arith.constant dense<0.000000e+00> : vector<16xf32>
    %7 = vector.multi_reduction <add>, %0, %cst [1] : vector<16x32xf32> to vector<16xf32>
    %8 = vector.shape_cast %7 : vector<16xf32> to vector<16x1xf32>
    %cst_13 = arith.constant 3.200000e+01 : f32
    %9 = vector.broadcast %cst_13 : f32 to vector<16x1xf32>
    %10 = arith.divf %8, %9 : vector<16x1xf32>
    %11 = vector.broadcast %10 : vector<16x1xf32> to vector<16x32xf32>
    %12 = arith.subf %0, %11 : vector<16x32xf32>
    %13 = arith.mulf %12, %12 : vector<16x32xf32>
    %cst_14 = arith.constant dense<0.000000e+00> : vector<16xf32>
    %14 = vector.multi_reduction <add>, %13, %cst_14 [1] : vector<16x32xf32> to vector<16xf32>
    %15 = vector.shape_cast %14 : vector<16xf32> to vector<16x1xf32>
    %cst_15 = arith.constant 3.200000e+01 : f32
    %16 = vector.broadcast %cst_15 : f32 to vector<16x1xf32>
    %17 = arith.divf %15, %16 : vector<16x1xf32>
    %18 = vector.broadcast %10 : vector<16x1xf32> to vector<16x32xf32>
    %19 = arith.subf %0, %18 : vector<16x32xf32>
    %cst_16 = arith.constant 9.99999974E-6 : f32
    %20 = vector.broadcast %cst_16 : f32 to vector<16x1xf32>
    %21 = arith.addf %17, %20 : vector<16x1xf32>
    %22 = math.rsqrt %21 : vector<16x1xf32>
    %23 = vector.broadcast %22 : vector<16x1xf32> to vector<16x32xf32>
    %24 = arith.mulf %19, %23 : vector<16x32xf32>
    %25 = vector.broadcast %1 : vector<1x32xf32> to vector<16x32xf32>
    %26 = arith.mulf %24, %25 : vector<16x32xf32>
    %27 = vector.broadcast %2 : vector<1x32xf32> to vector<16x32xf32>
    %28 = arith.addf %26, %27 : vector<16x32xf32>
    %29 = arith.truncf %28 : vector<16x32xf32> to vector<16x32xbf16>
    %30 = arith.truncf %3 : vector<32x128xf32> to vector<32x128xbf16>
    %cst_17 = arith.constant dense<0.000000e+00> : vector<16x128xf32>
    %31 = tpu.matmul %29, %30, %cst_17 {dimension_numbers = #tpu.dot_dimension_numbers<[1], [0], [0], [1], [0, 0, 1, 1], [], []>} : vector<16x32xbf16>, vector<32x128xbf16>, vector<16x128xf32> -> vector<16x128xf32>
    %32 = vector.broadcast %4 : vector<1x128xf32> to vector<16x128xf32>
    %33 = arith.addf %31, %32 : vector<16x128xf32>
    %34 = arith.negf %33 : vector<16x128xf32>
    %35 = math.exp %34 : vector<16x128xf32>
    %cst_18 = arith.constant 1.000000e+00 : f32
    %36 = vector.broadcast %cst_18 : f32 to vector<16x128xf32>
    %37 = arith.addf %36, %35 : vector<16x128xf32>
    %38 = arith.divf %36, %37 : vector<16x128xf32>
    %39 = arith.mulf %33, %38 : vector<16x128xf32>
    %40 = arith.truncf %39 : vector<16x128xf32> to vector<16x128xbf16>
    %41 = arith.truncf %5 : vector<128x32xf32> to vector<128x32xbf16>
    %cst_19 = arith.constant dense<0.000000e+00> : vector<16x32xf32>
    %42 = tpu.matmul %40, %41, %cst_19 {dimension_numbers = #tpu.dot_dimension_numbers<[1], [0], [0], [1], [0, 0, 1, 1], [], []>} : vector<16x128xbf16>, vector<128x32xbf16>, vector<16x32xf32> -> vector<16x32xf32>
    %43 = vector.broadcast %6 : vector<1x32xf32> to vector<16x32xf32>
    %44 = arith.addf %42, %43 : vector<16x32xf32>
    %cst_20 = arith.constant 5.000000e-01 : f32
    %45 = vector.broadcast %cst_20 : f32 to vector<16x32xf32>
    %46 = arith.mulf %45, %44 : vector<16x32xf32>
    %47 = arith.addf %0, %46 : vector<16x32xf32>
    %c0_21 = arith.constant 0 : index
    %c0_22 = arith.constant 0 : index
    %48 = vector.load %arg8[%c0_21, %c0_22] : memref<1x32xf32, #tpu.memory_space<vmem>>, vector<1x32xf32>
    %c0_23 = arith.constant 0 : index
    %c0_24 = arith.constant 0 : index
    %49 = vector.load %arg9[%c0_23, %c0_24] : memref<1x32xf32, #tpu.memory_space<vmem>>, vector<1x32xf32>
    %cst_25 = arith.constant dense<0.000000e+00> : vector<16xf32>
    %50 = vector.multi_reduction <add>, %47, %cst_25 [1] : vector<16x32xf32> to vector<16xf32>
    %51 = vector.shape_cast %50 : vector<16xf32> to vector<16x1xf32>
    %cst_26 = arith.constant 3.200000e+01 : f32
    %52 = vector.broadcast %cst_26 : f32 to vector<16x1xf32>
    %53 = arith.divf %51, %52 : vector<16x1xf32>
    %54 = vector.broadcast %53 : vector<16x1xf32> to vector<16x32xf32>
    %55 = arith.subf %47, %54 : vector<16x32xf32>
    %56 = arith.mulf %55, %55 : vector<16x32xf32>
    %cst_27 = arith.constant dense<0.000000e+00> : vector<16xf32>
    %57 = vector.multi_reduction <add>, %56, %cst_27 [1] : vector<16x32xf32> to vector<16xf32>
    %58 = vector.shape_cast %57 : vector<16xf32> to vector<16x1xf32>
    %cst_28 = arith.constant 3.200000e+01 : f32
    %59 = vector.broadcast %cst_28 : f32 to vector<16x1xf32>
    %60 = arith.divf %58, %59 : vector<16x1xf32>
    %61 = vector.broadcast %53 : vector<16x1xf32> to vector<16x32xf32>
    %62 = arith.subf %47, %61 : vector<16x32xf32>
    %cst_29 = arith.constant 9.99999974E-6 : f32
    %63 = vector.broadcast %cst_29 : f32 to vector<16x1xf32>
    %64 = arith.addf %60, %63 : vector<16x1xf32>
    %65 = math.rsqrt %64 : vector<16x1xf32>
    %66 = vector.broadcast %65 : vector<16x1xf32> to vector<16x32xf32>
    %67 = arith.mulf %62, %66 : vector<16x32xf32>
    %68 = vector.broadcast %48 : vector<1x32xf32> to vector<16x32xf32>
    %69 = arith.mulf %67, %68 : vector<16x32xf32>
    %70 = vector.broadcast %49 : vector<1x32xf32> to vector<16x32xf32>
    %71 = arith.addf %69, %70 : vector<16x32xf32>
    %c0_30 = arith.constant 0 : index
    %c0_31 = arith.constant 0 : index
    %72 = vector.load %arg10[%c0_30, %c0_31] : memref<16x32xf32, #tpu.memory_space<vmem>>, vector<16x32xf32>
    tpu.vector_store %arg10[%c0_30, %c0_31], %71 {strides = array<i32>} : memref<16x32xf32, #tpu.memory_space<vmem>>, vector<16x32xf32>,
    return
  }
  func.func @transform_0(%arg0: i32) -> (i32, i32) {
    %c0_i32 = arith.constant 0 : i32
    %c0_i32_0 = arith.constant 0 : i32
    return %arg0, %c0_i32 : i32, i32
  }
  func.func @transform_1(%arg0: i32) -> (i32, i32) {
    %c0_i32 = arith.constant 0 : i32
    %c0_i32_0 = arith.constant 0 : i32
    %c0_i32_1 = arith.constant 0 : i32
    return %c0_i32, %c0_i32_0 : i32, i32
  }
  func.func @transform_2(%arg0: i32) -> (i32, i32) {
    %c0_i32 = arith.constant 0 : i32
    %c0_i32_0 = arith.constant 0 : i32
    %c0_i32_1 = arith.constant 0 : i32
    return %c0_i32, %c0_i32_0 : i32, i32
  }
  func.func @transform_3(%arg0: i32) -> (i32, i32) {
    %c0_i32 = arith.constant 0 : i32
    %c0_i32_0 = arith.constant 0 : i32
    %c0_i32_1 = arith.constant 0 : i32
    return %c0_i32, %c0_i32_0 : i32, i32
  }
  func.func @transform_4(%arg0: i32) -> (i32, i32) {
    %c0_i32 = arith.constant 0 : i32
    %c0_i32_0 = arith.constant 0 : i32
    %c0_i32_1 = arith.constant 0 : i32
    return %c0_i32, %c0_i32_0 : i32, i32
  }
  func.func @transform_5(%arg0: i32) -> (i32, i32) {
    %c0_i32 = arith.constant 0 : i32
    %c0_i32_0 = arith.constant 0 : i32
    %c0_i32_1 = arith.constant 0 : i32
    return %c0_i32, %c0_i32_0 : i32, i32
  }
  func.func @transform_6(%arg0: i32) -> (i32, i32) {
    %c0_i32 = arith.constant 0 : i32
    %c0_i32_0 = arith.constant 0 : i32
    %c0_i32_1 = arith.constant 0 : i32
    return %c0_i32, %c0_i32_0 : i32, i32
  }
  func.func @transform_7(%arg0: i32) -> (i32, i32) {
    %c0_i32 = arith.constant 0 : i32
    %c0_i32_0 = arith.constant 0 : i32
    %c0_i32_1 = arith.constant 0 : i32
    return %c0_i32, %c0_i32_0 : i32, i32
  }
  func.func @transform_8(%arg0: i32) -> (i32, i32) {
    %c0_i32 = arith.constant 0 : i32
    %c0_i32_0 = arith.constant 0 : i32
    %c0_i32_1 = arith.constant 0 : i32
    return %c0_i32, %c0_i32_0 : i32, i32
  }
  func.func @transform_9(%arg0: i32) -> (i32, i32) {
    %c0_i32 = arith.constant 0 : i32
    %c0_i32_0 = arith.constant 0 : i32
    return %arg0, %c0_i32 : i32, i32
  }
}

module attributes {stable_mosaic.version = 11 : i64} {
  func.func @_fc_logsoftmax_kernel(%arg0: i32, %arg1: memref<16x32xf32, #tpu.memory_space<vmem>>, %arg2: memref<32x128xf32, #tpu.memory_space<vmem>>, %arg3: memref<16x128xf32, #tpu.memory_space<vmem>>) attributes {dimension_semantics = [#tpu.dimension_semantics<parallel>], iteration_bounds = array<i64: 1>, scalar_prefetch = 0 : i64, scratch_operands = 0 : i64, tpu.core_type = #tpu.core_type<tc>, window_params = [{transform_indices = @transform_0, window_bounds = array<i64: 16, 32>}, {pipeline_mode = #tpu.pipeline_mode<synchronous>, transform_indices = @transform_1, window_bounds = array<i64: 32, 128>}, {transform_indices = @transform_2, window_bounds = array<i64: 16, 128>}]} {
    %c0 = arith.constant 0 : index
    %c0_0 = arith.constant 0 : index
    %0 = vector.load %arg1[%c0, %c0_0] : memref<16x32xf32, #tpu.memory_space<vmem>>, vector<16x32xf32>
    %c0_1 = arith.constant 0 : index
    %c0_2 = arith.constant 0 : index
    %1 = vector.load %arg2[%c0_1, %c0_2] : memref<32x128xf32, #tpu.memory_space<vmem>>, vector<32x128xf32>
    %2 = arith.truncf %0 : vector<16x32xf32> to vector<16x32xbf16>
    %3 = arith.truncf %1 : vector<32x128xf32> to vector<32x128xbf16>
    %cst = arith.constant dense<0.000000e+00> : vector<16x128xf32>
    %4 = tpu.matmul %2, %3, %cst {dimension_numbers = #tpu.dot_dimension_numbers<[1], [0], [0], [1], [0, 0, 1, 1], [], []>} : vector<16x32xbf16>, vector<32x128xbf16>, vector<16x128xf32> -> vector<16x128xf32>
    %5 = tpu.iota {dimensions = array<i32: 1>} : vector<16x128xi32>
    %c12_i32 = arith.constant 12 : i32
    %6 = vector.broadcast %c12_i32 : i32 to vector<16x128xi32>
    %7 = arith.cmpi slt, %5, %6 : vector<16x128xi32>
    %cst_3 = arith.constant -1.000000e+30 : f32
    %8 = vector.broadcast %cst_3 : f32 to vector<16x128xf32>
    %9 = arith.select %7, %4, %8 : vector<16x128xi1>, vector<16x128xf32>
    %cst_4 = arith.constant dense<0xFF800000> : vector<16xf32>
    %10 = vector.multi_reduction <maximumf>, %9, %cst_4 [1] : vector<16x128xf32> to vector<16xf32>
    %11 = vector.shape_cast %10 : vector<16xf32> to vector<16x1xf32>
    %12 = vector.broadcast %11 : vector<16x1xf32> to vector<16x128xf32>
    %13 = arith.subf %9, %12 : vector<16x128xf32>
    %14 = math.exp %13 : vector<16x128xf32>
    %cst_5 = arith.constant dense<0.000000e+00> : vector<16xf32>
    %15 = vector.multi_reduction <add>, %14, %cst_5 [1] : vector<16x128xf32> to vector<16xf32>
    %16 = vector.shape_cast %15 : vector<16xf32> to vector<16x1xf32>
    %17 = math.log %16 : vector<16x1xf32>
    %18 = vector.broadcast %17 : vector<16x1xf32> to vector<16x128xf32>
    %19 = arith.subf %13, %18 : vector<16x128xf32>
    %c0_6 = arith.constant 0 : index
    %c0_7 = arith.constant 0 : index
    %20 = vector.load %arg3[%c0_6, %c0_7] : memref<16x128xf32, #tpu.memory_space<vmem>>, vector<16x128xf32>
    tpu.vector_store %arg3[%c0_6, %c0_7], %19 {strides = array<i32>} : memref<16x128xf32, #tpu.memory_space<vmem>>, vector<16x128xf32>,
    return
  }
  func.func @transform_0(%arg0: i32) -> (i32, i32) {
    %c0_i32 = arith.constant 0 : i32
    %c0_i32_0 = arith.constant 0 : i32
    return %arg0, %c0_i32 : i32, i32
  }
  func.func @transform_1(%arg0: i32) -> (i32, i32) {
    %c0_i32 = arith.constant 0 : i32
    %c0_i32_0 = arith.constant 0 : i32
    %c0_i32_1 = arith.constant 0 : i32
    return %c0_i32, %c0_i32_0 : i32, i32
  }
  func.func @transform_2(%arg0: i32) -> (i32, i32) {
    %c0_i32 = arith.constant 0 : i32
    %c0_i32_0 = arith.constant 0 : i32
    return %arg0, %c0_i32 : i32, i32
  }
}

</mosaic_0001>

<bundles_post_ra>
// kernel: conformer_forward.22
= control target key start
LH: loop header
LB: loop body
LE: loop exit
PB: predicated region body
PF: predicated region fallthrough
CT: control target
= control target key end

     0   :  { %vm109_vm0 = vcmask 1043456   ;;  %vm110_vm1 = vcmask 1044480   ;;  %v382_v2 = vmov 65535   ;;  %vm66_vm2 = vcmask 72704   ;;  %s644_s1 = inlined_call_operand.vmem [shape: f32[9,32], index: 1, kind: input, shape index: {}]   ;;  %s645_s0 = inlined_call_operand.vmem [shape: f32[216,9], index: 0, kind: input, shape index: {}]   ;;  %s646_s2 = inlined_call_operand.vmem [shape: f32[1,32], index: 2, kind: input, shape index: {}]   ;;  %s647_s3 = inlined_call_operand.vmem [shape: f32[216,32], index: 3, kind: output, shape index: {}]  }
   0x1   :  { %v42_v0 = vld [vmem:[%s644_s1] sm:$0xff]  ;;  %v43_v1 = vld [vmem:[%s644_s1 + $0x8] sm:$0x1]  ;;  %v111_v3 = vsel %vm109_vm0, 4294967295, %v382_v2  ;;  %v17_v8 = vld [vmem:[%s645_s0 + $0x10] sm:$0xff]  ;;  %vm287_vm3 = vcmask 261120  }
   0x2   :  { %v15_v4 = vld [vmem:[%s645_s0] sm:$0xff]  ;;  %v58_v5 = vpack.c.bf16 %v43_v1, %v42_v0  ;;  %v112_v6 = vsel %vm110_vm1, %v111_v3, 0  ;;  %v16_v7 = vld [vmem:[%s645_s0 + $0x8] sm:$0xff]  ;;  %v18_v9 = vld [vmem:[%s645_s0 + $0x18] sm:$0xff] }
   0x3   :  { %v44_v10 = vpack.c.bf16 %v16_v7, %v15_v4  ;;  %v31_v11 = vld [vmem:[%s645_s0 + $0x80] sm:$0xff]  ;;  %v32_v12 = vld [vmem:[%s645_s0 + $0x88] sm:$0xff]  ;;  %v33_v13 = vld [vmem:[%s645_s0 + $0x90] sm:$0xff]  ;;  %v45_v20 = vpack.c.bf16 %v18_v9, %v17_v8 }
   0x4   :  { %v114_v14 = vand.u32 %v112_v6, %v58_v5  ;;  %v52_v15 = vpack.c.bf16 %v32_v12, %v31_v11  ;;  %v34_v16 = vld [vmem:[%s645_s0 + $0x98] sm:$0xff]  ;;  %v19_v17 = vld [vmem:[%s645_s0 + $0x20] sm:$0xff]  ;;  %v20_v18 = vld [vmem:[%s645_s0 + $0x28] sm:$0xff] }
   0x5   :  { %351 = vmatprep.mubr.msk.bf16.mxu0 %vm66_vm2, %v44_v10  ;;  %v35_v19 = vld [vmem:[%s645_s0 + $0xa0] sm:$0xff]  ;;  %v53_v21 = vpack.c.bf16 %v34_v16, %v33_v13  ;;  %v36_v22 = vld [vmem:[%s645_s0 + $0xa8] sm:$0xff]  ;;  %v46_v23 = vpack.c.bf16 %v20_v18, %v19_v17  ;;  %v21_v25 = vld [vmem:[%s645_s0 + $0x30] sm:$0xff] }
   0x6   :  { %349 = vmatprep.subr.bf16.mxu0 %v114_v14  ;;  %379 = vmatprep.subr.bf16.mxu1 %v114_v14  ;;  %v54_v24 = vpack.c.bf16 %v36_v22, %v35_v19  ;;  %v22_v26 = vld [vmem:[%s645_s0 + $0x38] sm:$0xff]  ;;  %v37_v27 = vld [vmem:[%s645_s0 + $0xb0] sm:$0xff]  ;;  %v23_v29 = vld [vmem:[%s645_s0 + $0x40] sm:$0xff] }
   0x7   :  { %350 = vmatpush3.bf16.msra.mxu0 %v114_v14  ;;  %380 = vmatpush3.bf16.msra.mxu1 %v114_v14  ;;  %v38_v28 = vld [vmem:[%s645_s0 + $0xb8] sm:$0xff]  ;;  %v24_v30 = vld [vmem:[%s645_s0 + $0x48] sm:$0xff]  ;;  %v39_v31 = vld [vmem:[%s645_s0 + $0xc0] sm:$0xff]  ;;  %v47_v33 = vpack.c.bf16 %v22_v26, %v21_v25 }
   0x8   :  { %367 = vmatprep.mubr.msk.bf16.mxu1 %vm66_vm2, %v52_v15  ;;  %v40_v32 = vld [vmem:[%s645_s0 + $0xc8] sm:$0xff]  ;;  %v55_v34 = vpack.c.bf16 %v38_v28, %v37_v27  ;;  %v48_v35 = vpack.c.bf16 %v24_v30, %v23_v29  ;;  %v25_v37 = vld [vmem:[%s645_s0 + $0x50] sm:$0xff]  ;;  %v26_v38 = vld [vmem:[%s645_s0 + $0x58] sm:$0xff] }
   0x9   :  { %v56_v36 = vpack.c.bf16 %v40_v32, %v39_v31  ;;  %v41_v39 = vld [vmem:[%s645_s0 + $0xd0] sm:$0xff]  ;;  %v27_v40 = vld [vmem:[%s645_s0 + $0x60] sm:$0xff]  ;;  %v28_v41 = vld [vmem:[%s645_s0 + $0x68] sm:$0xff]  ;;  %v49_v42 = vpack.c.bf16 %v26_v38, %v25_v37 }
   0xa   :  { %352 = vmatmul.mubr.msk.bf16.vlgmr.msra.gmra.mxu0 %vm66_vm2, %v45_v20  ;;  %368 = vmatmul.mubr.msk.bf16.vlgmr.msra.gmra.mxu1 %vm66_vm2, %v53_v21  ;;  %v57_v43 = vpack.c.bf16 %v41_v39, %v41_v39  ;;  %v50_v44 = vpack.c.bf16 %v28_v41, %v27_v40  ;;  %v29_v45 = vld [vmem:[%s645_s0 + $0x70] sm:$0xff]  ;;  %v30_v46 = vld [vmem:[%s645_s0 + $0x78] sm:$0xff]  ;;  %v507_v48 = vld [vmem:[%s646_s2] ss:$0 sm:$0xff] }
   0xb   :  { %355 = vmatprep.mubr.msk.bf16.mxu0 %vm66_vm2, %v46_v23  ;;  %371 = vmatprep.mubr.msk.bf16.mxu1 %vm66_vm2, %v54_v24  ;;  %v51_v47 = vpack.c.bf16 %v30_v46, %v29_v45 }
  0x12   :  { %356 = vmatmul.mubr.msk.bf16.gmra.mxu0 %vm66_vm2, %v47_v33  ;;  %372 = vmatmul.mubr.msk.bf16.gmra.mxu1 %vm66_vm2, %v55_v34 }
  0x13   :  { %359 = vmatprep.mubr.msk.bf16.mxu0 %vm66_vm2, %v48_v35  ;;  %375 = vmatprep.mubr.msk.bf16.mxu1 %vm66_vm2, %v56_v36 }
  0x1a   :  { %360 = vmatmul.mubr.msk.bf16.gmra.mxu0 %vm66_vm2, %v49_v42  ;;  %376 = vmatmul.mubr.msk.bf16.gmra.mxu1 %vm66_vm2, %v57_v43 }
  0x1b   :  { %363 = vmatprep.mubr.msk.bf16.mxu0 %vm66_vm2, %v50_v44 }
  0x22   :  { %364 = vmatmul.mubr.msk.bf16.gmra.mxu0 %vm66_vm2, %v51_v47 }
  0xca   :  { %v353_v49 = vpop.f32.mrf.mxu0  ;;  %v369_v50 = vpop.f32.mrf.mxu1 }
  0xcb   :  { %v159_v51 = vadd.f32 %v353_v49, %v507_v48  ;;  %v223_v52 = vadd.f32 %v369_v50, %v507_v48 }
  0xcc   :  { %v150_v53 = vpop.f32.mrf.mxu0  ;;  %v214_v54 = vpop.f32.mrf.mxu1 }
  0xcd   :  { %v262_v55 = vmax.f32 %v159_v51, 0.0  ;;  %v151_v56 = vadd.f32 %v507_v48, %v150_v53  ;;  %v278_v57 = vmax.f32 %v223_v52, 0.0  ;;  %v215_v58 = vadd.f32 %v507_v48, %v214_v54 }
  0xce   :  { %v354_v59 = vpop.f32.mrf.mxu0  ;;  %v370_v60 = vpop.f32.mrf.mxu1 }
  0xcf   :  { %290 = vst.msk [vmem:[%s647_s3 + $0x10] sm:$0xff] %vm287_vm3, %v262_v55  ;;  %v260_v61 = vmax.f32 %v151_v56, 0.0  ;;  %306 = vst.msk [vmem:[%s647_s3 + $0x90] sm:$0xff] %vm287_vm3, %v278_v57  ;;  %v162_v62 = vadd.f32 %v354_v59, %v507_v48  ;;  %v276_v63 = vmax.f32 %v215_v58, 0.0  ;;  %v226_v0 = vadd.f32 %v370_v60, %v507_v48 }
  0xd0   :  { %v153_v1 = vpop.f32.mrf.mxu0  ;;  %v217_v2 = vpop.f32.mrf.mxu1 }
  0xd1   :  { %288 = vst.msk [vmem:[%s647_s3] sm:$0xff] %vm287_vm3, %v260_v61  ;;  %v263_v3 = vmax.f32 %v162_v62, 0.0  ;;  %304 = vst.msk [vmem:[%s647_s3 + $0x80] sm:$0xff] %vm287_vm3, %v276_v63  ;;  %v154_v4 = vadd.f32 %v507_v48, %v153_v1  ;;  %v279_v5 = vmax.f32 %v226_v0, 0.0  ;;  %v218_v6 = vadd.f32 %v507_v48, %v217_v2 }
  0xd2   :  { %v357_v7 = vpop.f32.mrf.mxu0  ;;  %v373_v8 = vpop.f32.mrf.mxu1 }
  0xd3   :  { %291 = vst.msk [vmem:[%s647_s3 + $0x18] sm:$0xff] %vm287_vm3, %v263_v3  ;;  %v261_v9 = vmax.f32 %v154_v4, 0.0  ;;  %307 = vst.msk [vmem:[%s647_s3 + $0x98] sm:$0xff] %vm287_vm3, %v279_v5  ;;  %v175_v10 = vadd.f32 %v357_v7, %v507_v48  ;;  %v277_v11 = vmax.f32 %v218_v6, 0.0  ;;  %v239_v12 = vadd.f32 %v373_v8, %v507_v48 }
  0xd4   :  { %v166_v13 = vpop.f32.mrf.mxu0  ;;  %v230_v14 = vpop.f32.mrf.mxu1 }
  0xd5   :  { %289 = vst.msk [vmem:[%s647_s3 + $0x8] sm:$0xff] %vm287_vm3, %v261_v9  ;;  %v266_v15 = vmax.f32 %v175_v10, 0.0  ;;  %305 = vst.msk [vmem:[%s647_s3 + $0x88] sm:$0xff] %vm287_vm3, %v277_v11  ;;  %v167_v16 = vadd.f32 %v507_v48, %v166_v13  ;;  %v282_v17 = vmax.f32 %v239_v12, 0.0  ;;  %v231_v18 = vadd.f32 %v507_v48, %v230_v14 }
  0xd6   :  { %v358_v19 = vpop.f32.mrf.mxu0  ;;  %v374_v20 = vpop.f32.mrf.mxu1 }
  0xd7   :  { %294 = vst.msk [vmem:[%s647_s3 + $0x30] sm:$0xff] %vm287_vm3, %v266_v15  ;;  %v264_v21 = vmax.f32 %v167_v16, 0.0  ;;  %310 = vst.msk [vmem:[%s647_s3 + $0xb0] sm:$0xff] %vm287_vm3, %v282_v17  ;;  %v178_v22 = vadd.f32 %v358_v19, %v507_v48  ;;  %v280_v23 = vmax.f32 %v231_v18, 0.0  ;;  %v242_v24 = vadd.f32 %v374_v20, %v507_v48 }
  0xd8   :  { %v169_v25 = vpop.f32.mrf.mxu0  ;;  %v233_v26 = vpop.f32.mrf.mxu1 }
  0xd9   :  { %292 = vst.msk [vmem:[%s647_s3 + $0x20] sm:$0xff] %vm287_vm3, %v264_v21  ;;  %v267_v27 = vmax.f32 %v178_v22, 0.0  ;;  %308 = vst.msk [vmem:[%s647_s3 + $0xa0] sm:$0xff] %vm287_vm3, %v280_v23  ;;  %v170_v28 = vadd.f32 %v507_v48, %v169_v25  ;;  %v283_v29 = vmax.f32 %v242_v24, 0.0  ;;  %v234_v30 = vadd.f32 %v507_v48, %v233_v26 }
  0xda   :  { %v361_v31 = vpop.f32.mrf.mxu0  ;;  %v377_v32 = vpop.f32.mrf.mxu1 }
  0xdb   :  { %295 = vst.msk [vmem:[%s647_s3 + $0x38] sm:$0xff] %vm287_vm3, %v267_v27  ;;  %v265_v33 = vmax.f32 %v170_v28, 0.0  ;;  %311 = vst.msk [vmem:[%s647_s3 + $0xb8] sm:$0xff] %vm287_vm3, %v283_v29  ;;  %v191_v34 = vadd.f32 %v361_v31, %v507_v48  ;;  %v281_v35 = vmax.f32 %v234_v30, 0.0  ;;  %v255_v36 = vadd.f32 %v377_v32, %v507_v48 }
  0xdc   :  { %v182_v37 = vpop.f32.mrf.mxu0  ;;  %v246_v38 = vpop.f32.mrf.mxu1 }
  0xdd   :  { %293 = vst.msk [vmem:[%s647_s3 + $0x28] sm:$0xff] %vm287_vm3, %v265_v33  ;;  %v270_v39 = vmax.f32 %v191_v34, 0.0  ;;  %309 = vst.msk [vmem:[%s647_s3 + $0xa8] sm:$0xff] %vm287_vm3, %v281_v35  ;;  %v183_v40 = vadd.f32 %v507_v48, %v182_v37  ;;  %v286_v41 = vmax.f32 %v255_v36, 0.0  ;;  %v247_v42 = vadd.f32 %v507_v48, %v246_v38 }
  0xde   :  { %v362_v43 = vpop.f32.mrf.mxu0  ;;  %v378_v44 = vpop.f32.mrf.mxu1 }
  0xdf   :  { %298 = vst.msk [vmem:[%s647_s3 + $0x50] sm:$0xff] %vm287_vm3, %v270_v39  ;;  %v268_v45 = vmax.f32 %v183_v40, 0.0  ;;  %314 = vst.msk [vmem:[%s647_s3 + $0xd0] sm:$0xff] %vm287_vm3, %v286_v41  ;;  %v194_v46 = vadd.f32 %v362_v43, %v507_v48  ;;  %v284_v47 = vmax.f32 %v247_v42, 0.0 }
  0xe0   :  { %v185_v49 = vpop.f32.mrf.mxu0  ;;  %v249_v50 = vpop.f32.mrf.mxu1 }
  0xe1   :  { %296 = vst.msk [vmem:[%s647_s3 + $0x40] sm:$0xff] %vm287_vm3, %v268_v45  ;;  %v271_v51 = vmax.f32 %v194_v46, 0.0  ;;  %312 = vst.msk [vmem:[%s647_s3 + $0xc0] sm:$0xff] %vm287_vm3, %v284_v47  ;;  %v186_v52 = vadd.f32 %v507_v48, %v185_v49  ;;  %v250_v53 = vadd.f32 %v507_v48, %v249_v50 }
  0xe2   :  { %v365_v54 = vpop.f32.mrf.mxu0 }
  0xe3   :  { %299 = vst.msk [vmem:[%s647_s3 + $0x58] sm:$0xff] %vm287_vm3, %v271_v51  ;;  %v269_v55 = vmax.f32 %v186_v52, 0.0  ;;  %v207_v56 = vadd.f32 %v365_v54, %v507_v48  ;;  %v285_v57 = vmax.f32 %v250_v53, 0.0 }
  0xe4   :  { %v198_v58 = vpop.f32.mrf.mxu0 }
  0xe5   :  { %297 = vst.msk [vmem:[%s647_s3 + $0x48] sm:$0xff] %vm287_vm3, %v269_v55  ;;  %v274_v59 = vmax.f32 %v207_v56, 0.0  ;;  %313 = vst.msk [vmem:[%s647_s3 + $0xc8] sm:$0xff] %vm287_vm3, %v285_v57  ;;  %v199_v60 = vadd.f32 %v507_v48, %v198_v58 }
  0xe6   :  { %v366_v61 = vpop.f32.mrf.mxu0 }
  0xe7   :  { %302 = vst.msk [vmem:[%s647_s3 + $0x70] sm:$0xff] %vm287_vm3, %v274_v59  ;;  %v272_v62 = vmax.f32 %v199_v60, 0.0  ;;  %v210_v63 = vadd.f32 %v366_v61, %v507_v48 }
  0xe8   :  { %v201_v0 = vpop.f32.mrf.mxu0 }
  0xe9   :  { %300 = vst.msk [vmem:[%s647_s3 + $0x60] sm:$0xff] %vm287_vm3, %v272_v62  ;;  %v275_v1 = vmax.f32 %v210_v63, 0.0  ;;  %v202_v2 = vadd.f32 %v507_v48, %v201_v0 }
  0xeb   :  { %303 = vst.msk [vmem:[%s647_s3 + $0x78] sm:$0xff] %vm287_vm3, %v275_v1  ;;  %v273_v3 = vmax.f32 %v202_v2, 0.0 }
  0xed   :  { %301 = vst.msk [vmem:[%s647_s3 + $0x68] sm:$0xff] %vm287_vm3, %v273_v3 }

// kernel: conformer_forward.23
= control target key start
LH: loop header
LB: loop body
LE: loop exit
PB: predicated region body
PF: predicated region fallthrough
CT: control target
= control target key end

     0   :  { %v304_v3 = vmov 0.0   ;;  %vm305_vm0 = vmmov 0   ;;  %vm103_vm1 = vcmask 261120   ;;  %s526_s1 = inlined_call_operand.vmem [shape: f32[288,32], index: 1, kind: input, shape index: {}]   ;;  %s527_s0 = inlined_call_operand.vmem [shape: f32[48,288], index: 0, kind: input, shape index: {}]   ;;  %s528_s2 = inlined_call_operand.vmem [shape: f32[1,32], index: 2, kind: input, shape index: {}]   ;;  %s529_s3 = inlined_call_operand.vmem [shape: f32[48,32], index: 3, kind: output, shape index: {}]  }
   0x1   :  { %v63_v0 = vld [vmem:[%s526_s1 + $0xf0] sm:$0xff]  ;;  %v64_v1 = vld [vmem:[%s526_s1 + $0xf8] sm:$0xff]  ;;  %286 = vmatprep.subr.bf16.mxu1 %v304_v3  ;;  %290 = vmatprep.mubr.msk.bf16.mxu1 %vm305_vm0, %v304_v3  ;;  %v61_v6 = vld [vmem:[%s526_s1 + $0xe0] sm:$0xff] }
   0x2   :  { %v47_v2 = vld [vmem:[%s526_s1 + $0x70] sm:$0xff]  ;;  %v93_v4 = vpack.c.bf16 %v64_v1, %v63_v0  ;;  %v48_v5 = vld [vmem:[%s526_s1 + $0x78] sm:$0xff]  ;;  %v62_v7 = vld [vmem:[%s526_s1 + $0xe8] sm:$0xff] }
   0x3   :  { %v85_v8 = vpack.c.bf16 %v48_v5, %v47_v2  ;;  %v92_v9 = vpack.c.bf16 %v62_v7, %v61_v6  ;;  %v45_v10 = vld [vmem:[%s526_s1 + $0x60] sm:$0xff]  ;;  %v46_v11 = vld [vmem:[%s526_s1 + $0x68] sm:$0xff]  ;;  %v59_v12 = vld [vmem:[%s526_s1 + $0xd0] sm:$0xff] }
   0x4   :  { %247 = vmatprep.subr.bf16.mxu0 %v93_v4  ;;  %v60_v13 = vld [vmem:[%s526_s1 + $0xd8] sm:$0xff]  ;;  %v84_v14 = vpack.c.bf16 %v46_v11, %v45_v10  ;;  %v43_v16 = vld [vmem:[%s526_s1 + $0x50] sm:$0xff]  ;;  %v57_v18 = vld [vmem:[%s526_s1 + $0xc0] sm:$0xff] }
   0x5   :  { %248 = vmatpush3.bf16.msra.mxu0 %v85_v8  ;;  %v91_v15 = vpack.c.bf16 %v60_v13, %v59_v12  ;;  %v44_v17 = vld [vmem:[%s526_s1 + $0x58] sm:$0xff]  ;;  %v58_v19 = vld [vmem:[%s526_s1 + $0xc8] sm:$0xff]  ;;  %v41_v21 = vld [vmem:[%s526_s1 + $0x40] sm:$0xff] }
   0x6   :  { %249 = vmatprep.subr.bf16.mxu0 %v92_v9  ;;  %v83_v20 = vpack.c.bf16 %v44_v17, %v43_v16  ;;  %v90_v22 = vpack.c.bf16 %v58_v19, %v57_v18  ;;  %v42_v23 = vld [vmem:[%s526_s1 + $0x48] sm:$0xff]  ;;  %v67_v24 = vld [vmem:[%s526_s1 + $0x110] sm:$0xff]  ;;  %v68_v25 = vld [vmem:[%s526_s1 + $0x118] sm:$0xff] }
   0x7   :  { %v55_v26 = vld [vmem:[%s526_s1 + $0xb0] sm:$0xff]  ;;  %v56_v27 = vld [vmem:[%s526_s1 + $0xb8] sm:$0xff]  ;;  %v95_v28 = vpack.c.bf16 %v68_v25, %v67_v24  ;;  %v65_v29 = vld [vmem:[%s526_s1 + $0x100] sm:$0xff]  ;;  %v82_v31 = vpack.c.bf16 %v42_v23, %v41_v21 }
   0x8   :  { %v66_v30 = vld [vmem:[%s526_s1 + $0x108] sm:$0xff]  ;;  %v39_v32 = vld [vmem:[%s526_s1 + $0x30] sm:$0xff]  ;;  %v19_v35 = vld [vmem:[%s527_s0 + $0x20] sm:$0xff]  ;;  %v89_v36 = vpack.c.bf16 %v56_v27, %v55_v26 }
   0x9   :  { %250 = vmatpush3.bf16.msra.mxu0 %v84_v14  ;;  %287 = vmatpush3.bf16.msra.mxu1 %v95_v28  ;;  %v94_v33 = vpack.c.bf16 %v66_v30, %v65_v29  ;;  %v16_v34 = vld [vmem:[%s527_s0 + $0x8] sm:$0xff]  ;;  %v40_v37 = vld [vmem:[%s526_s1 + $0x38] sm:$0xff]  ;;  %v17_v39 = vld [vmem:[%s527_s0 + $0x10] sm:$0xff] }
   0xa   :  { %251 = vmatprep.subr.bf16.mxu0 %v91_v15  ;;  %288 = vmatprep.subr.bf16.mxu1 %v304_v3  ;;  %v70_v38 = vpack.c.bf16 %v19_v35, %v16_v34  ;;  %v20_v40 = vld [vmem:[%s527_s0 + $0x28] sm:$0xff]  ;;  %v53_v41 = vld [vmem:[%s526_s1 + $0xa0] sm:$0xff]  ;;  %v81_v44 = vpack.c.bf16 %v40_v37, %v39_v32  ;;  %v51_v48 = vld [vmem:[%s526_s1 + $0x90] sm:$0xff] }
   0xb   :  { %v54_v42 = vld [vmem:[%s526_s1 + $0xa8] sm:$0xff]  ;;  %v71_v43 = vpack.c.bf16 %v20_v40, %v17_v39  ;;  %v37_v46 = vld [vmem:[%s526_s1 + $0x20] sm:$0xff]  ;;  %v52_v49 = vld [vmem:[%s526_s1 + $0x98] sm:$0xff] }
   0xc   :  { %145 = vmatprep.mubr.bf16.mxu0 %v70_v38  ;;  %v88_v45 = vpack.c.bf16 %v54_v42, %v53_v41  ;;  %v38_v47 = vld [vmem:[%s526_s1 + $0x28] sm:$0xff]  ;;  %v23_v51 = vld [vmem:[%s527_s0 + $0x40] sm:$0xff]  ;;  %v26_v52 = vld [vmem:[%s527_s0 + $0x58] sm:$0xff]  ;;  %v87_v53 = vpack.c.bf16 %v52_v49, %v51_v48 }
   0xd   :  { %252 = vmatpush3.bf16.msra.mxu0 %v83_v20  ;;  %289 = vmatpush3.bf16.msra.mxu1 %v94_v33  ;;  %v80_v50 = vpack.c.bf16 %v38_v47, %v37_v46  ;;  %v35_v54 = vld [vmem:[%s526_s1 + $0x10] sm:$0xff]  ;;  %v36_v55 = vld [vmem:[%s526_s1 + $0x18] sm:$0xff]  ;;  %v49_v56 = vld [vmem:[%s526_s1 + $0x80] sm:$0xff]  ;;  %v74_v58 = vpack.c.bf16 %v26_v52, %v23_v51 }
   0xe   :  { %253 = vmatprep.subr.bf16.mxu0 %v90_v22  ;;  %v50_v57 = vld [vmem:[%s526_s1 + $0x88] sm:$0xff]  ;;  %v79_v59 = vpack.c.bf16 %v36_v55, %v35_v54  ;;  %v33_v61 = vld [vmem:[%s526_s1] sm:$0xff]  ;;  %v18_v1 = vld [vmem:[%s527_s0 + $0x18] sm:$0xff] }
   0xf   :  { %v86_v60 = vpack.c.bf16 %v50_v57, %v49_v56  ;;  %v34_v62 = vld [vmem:[%s526_s1 + $0x8] sm:$0xff]  ;;  %v15_v63 = vld [vmem:[%s527_s0] sm:$0xff]  ;;  %v29_v2 = vld [vmem:[%s527_s0 + $0x70] sm:$0xff] }
  0x10   :  { %291 = vmatmul.mubr.msk.bf16.vlgmr.msra.gmra.mxu1 %vm103_vm1, %v71_v43  ;;  %v78_v0 = vpack.c.bf16 %v34_v62, %v33_v61  ;;  %v32_v4 = vld [vmem:[%s527_s0 + $0x88] sm:$0xff]  ;;  %v22_v5 = vld [vmem:[%s527_s0 + $0x38] sm:$0xff]  ;;  %v25_v6 = vld [vmem:[%s527_s0 + $0x50] sm:$0xff]  ;;  %v69_v7 = vpack.c.bf16 %v18_v1, %v15_v63 }
  0x11   :  { %254 = vmatpush3.bf16.msra.mxu0 %v82_v31  ;;  %294 = vmatprep.mubr.msk.bf16.mxu1 %vm305_vm0, %v304_v3  ;;  %v77_v8 = vpack.c.bf16 %v32_v4, %v29_v2  ;;  %v21_v9 = vld [vmem:[%s527_s0 + $0x30] sm:$0xff]  ;;  %v24_v10 = vld [vmem:[%s527_s0 + $0x48] sm:$0xff]  ;;  %v31_v12 = vld [vmem:[%s527_s0 + $0x80] sm:$0xff] }
  0x12   :  { %255 = vmatprep.subr.bf16.mxu0 %v89_v36  ;;  %v28_v11 = vld [vmem:[%s527_s0 + $0x68] sm:$0xff]  ;;  %v72_v13 = vpack.c.bf16 %v24_v10, %v21_v9  ;;  %v27_v15 = vld [vmem:[%s527_s0 + $0x60] sm:$0xff]  ;;  %v30_v16 = vld [vmem:[%s527_s0 + $0x78] sm:$0xff] }
  0x13   :  { %v76_v14 = vpack.c.bf16 %v31_v12, %v28_v11  ;;  %v75_v17 = vpack.c.bf16 %v30_v16, %v27_v15  ;;  %v243_v28 = vld [vmem:[%s528_s2] ss:$0 sm:$0xff] }
  0x15   :  { %256 = vmatpush3.bf16.msra.mxu0 %v81_v44 }
  0x16   :  { %257 = vmatprep.subr.bf16.mxu0 %v88_v45 }
  0x18   :  { %295 = vmatmul.mubr.msk.bf16.gmra.mxu1 %vm103_vm1, %v74_v58 }
  0x19   :  { %258 = vmatpush3.bf16.msra.mxu0 %v80_v50  ;;  %298 = vmatprep.mubr.msk.bf16.mxu1 %vm305_vm0, %v304_v3  ;;  %v73_v3 = vpack.c.bf16 %v25_v6, %v22_v5 }
  0x1a   :  { %259 = vmatprep.subr.bf16.mxu0 %v87_v53 }
  0x1d   :  { %260 = vmatpush3.bf16.msra.mxu0 %v79_v59 }
  0x1e   :  { %261 = vmatprep.subr.bf16.mxu0 %v86_v60 }
  0x20   :  { %299 = vmatmul.mubr.msk.bf16.gmra.mxu1 %vm103_vm1, %v77_v8 }
  0x21   :  { %262 = vmatpush3.bf16.msra.mxu0 %v78_v0 }
  0x24   :  { %146 = vmatmul.mubr.bf16.vlgmr.msra.gmra.mxu0 %v69_v7 }
  0x25   :  { %153 = vmatprep.mubr.bf16.mxu0 %v73_v3 }
  0x2c   :  { %154 = vmatmul.mubr.bf16.gmra.mxu0 %v72_v13 }
  0x2d   :  { %161 = vmatprep.mubr.bf16.mxu0 %v76_v14 }
  0x34   :  { %162 = vmatmul.mubr.bf16.gmra.mxu0 %v75_v17 }
  0xd0   :  { %v204_v18 = vpop.f32.mrf.mxu1 }
  0xd2   :  { %v292_v19 = vpop.f32.mrf.mxu1 }
  0xd4   :  { %v207_v20 = vpop.f32.mrf.mxu1 }
  0xd6   :  { %v293_v21 = vpop.f32.mrf.mxu1 }
  0xd8   :  { %v212_v22 = vpop.f32.mrf.mxu1 }
  0xda   :  { %v296_v23 = vpop.f32.mrf.mxu1 }
  0xdc   :  { %v215_v24 = vpop.f32.mrf.mxu1 }
  0xde   :  { %v297_v25 = vpop.f32.mrf.mxu1 }
  0xe0   :  { %v220_v27 = vpop.f32.mrf.mxu1 }
  0xe2   :  { %v300_v30 = vpop.f32.mrf.mxu1 }
  0xe4   :  { %v263_v26 = vpop.f32.mrf.mxu0  ;;  %v223_v33 = vpop.f32.mrf.mxu1 }
  0xe6   :  { %v264_v29 = vpop.f32.mrf.mxu0  ;;  %v301_v36 = vpop.f32.mrf.mxu1 }
  0xe7   :  { %v265_v31 = vadd.f32 %v264_v29, %v263_v26 }
  0xe8   :  { %v266_v32 = vpop.f32.mrf.mxu0 }
  0xe9   :  { %v148_v34 = vadd.f32 %v265_v31, %v243_v28 }
  0xea   :  { %v267_v35 = vpop.f32.mrf.mxu0 }
  0xeb   :  { %v205_v37 = vadd.f32 %v204_v18, %v148_v34  ;;  %v268_v38 = vadd.f32 %v267_v35, %v266_v32 }
  0xec   :  { %v269_v39 = vpop.f32.mrf.mxu0 }
  0xed   :  { %v227_v40 = vmax.f32 %v205_v37, 0.0  ;;  %v151_v41 = vadd.f32 %v268_v38, %v243_v28 }
  0xee   :  { %v270_v42 = vpop.f32.mrf.mxu0 }
  0xef   :  { %233 = vst.msk [vmem:[%s529_s3] sm:$0xff] %vm103_vm1, %v227_v40  ;;  %v208_v43 = vadd.f32 %v207_v20, %v151_v41  ;;  %v271_v44 = vadd.f32 %v270_v42, %v269_v39 }
  0xf0   :  { %v272_v45 = vpop.f32.mrf.mxu0 }
  0xf1   :  { %v228_v46 = vmax.f32 %v208_v43, 0.0  ;;  %v156_v47 = vadd.f32 %v271_v44, %v243_v28 }
  0xf2   :  { %v273_v48 = vpop.f32.mrf.mxu0 }
  0xf3   :  { %234 = vst.msk [vmem:[%s529_s3 + $0x8] sm:$0xff] %vm103_vm1, %v228_v46  ;;  %v213_v49 = vadd.f32 %v212_v22, %v156_v47  ;;  %v274_v50 = vadd.f32 %v273_v48, %v272_v45 }
  0xf4   :  { %v275_v51 = vpop.f32.mrf.mxu0 }
  0xf5   :  { %v229_v52 = vmax.f32 %v213_v49, 0.0  ;;  %v159_v53 = vadd.f32 %v274_v50, %v243_v28 }
  0xf6   :  { %v276_v54 = vpop.f32.mrf.mxu0 }
  0xf7   :  { %235 = vst.msk [vmem:[%s529_s3 + $0x10] sm:$0xff] %vm103_vm1, %v229_v52  ;;  %v216_v55 = vadd.f32 %v215_v24, %v159_v53  ;;  %v277_v56 = vadd.f32 %v276_v54, %v275_v51 }
  0xf8   :  { %v278_v57 = vpop.f32.mrf.mxu0 }
  0xf9   :  { %v230_v58 = vmax.f32 %v216_v55, 0.0  ;;  %v164_v59 = vadd.f32 %v277_v56, %v243_v28 }
  0xfa   :  { %v279_v60 = vpop.f32.mrf.mxu0 }
  0xfb   :  { %236 = vst.msk [vmem:[%s529_s3 + $0x18] sm:$0xff] %vm103_vm1, %v230_v58  ;;  %v221_v61 = vadd.f32 %v220_v27, %v164_v59  ;;  %v280_v62 = vadd.f32 %v279_v60, %v278_v57 }
  0xfd   :  { %v231_v63 = vmax.f32 %v221_v61, 0.0  ;;  %v167_v0 = vadd.f32 %v280_v62, %v243_v28 }
  0xff   :  { %237 = vst.msk [vmem:[%s529_s3 + $0x20] sm:$0xff] %vm103_vm1, %v231_v63  ;;  %v224_v1 = vadd.f32 %v223_v33, %v167_v0 }
 0x101   :  { %v232_v2 = vmax.f32 %v224_v1, 0.0 }
 0x103   :  { %238 = vst.msk [vmem:[%s529_s3 + $0x28] sm:$0xff] %vm103_vm1, %v232_v2 }

// kernel: conformer_forward.24
= control target key start
LH: loop header
LB: loop body
LE: loop exit
PB: predicated region body
PF: predicated region fallthrough
CT: control target
= control target key end

     0   :  { %v122_v0 = vmov 0.0   ;;  %vm123_vm0 = vmmov 0   ;;  %vm43_vm1 = vcmask 785408   ;;  %vm88_vm2 = vcmask 261120   ;;  %s195_s1 = inlined_call_operand.vmem [shape: f32[96,32], index: 1, kind: input, shape index: {}]   ;;  %s196_s0 = inlined_call_operand.vmem [shape: f32[16,96], index: 0, kind: input, shape index: {}]   ;;  %s197_s2 = inlined_call_operand.vmem [shape: f32[1,32], index: 2, kind: input, shape index: {}]   ;;  %s198_s3 = inlined_call_operand.vmem [shape: f32[16,32], index: 3, kind: output, shape index: {}]  }
   0x1   :  { %104 = vmatprep.subr.bf16.mxu0 %v122_v0  ;;  %v27_v1 = vld [vmem:[%s195_s1 + $0x50] sm:$0xff]  ;;  %v28_v2 = vld [vmem:[%s195_s1 + $0x58] sm:$0xff]  ;;  %v25_v3 = vld [vmem:[%s195_s1 + $0x40] sm:$0xff]  ;;  %116 = vmatprep.mubr.msk.bf16.mxu0 %vm123_vm0, %v122_v0 }
   0x2   :  { %v35_v4 = vpack.c.bf16 %v28_v2, %v27_v1  ;;  %v26_v5 = vld [vmem:[%s195_s1 + $0x48] sm:$0xff]  ;;  %v23_v7 = vld [vmem:[%s195_s1 + $0x30] sm:$0xff]  ;;  %v24_v8 = vld [vmem:[%s195_s1 + $0x38] sm:$0xff] }
   0x3   :  { %v34_v6 = vpack.c.bf16 %v26_v5, %v25_v3  ;;  %v33_v9 = vpack.c.bf16 %v24_v8, %v23_v7  ;;  %v21_v10 = vld [vmem:[%s195_s1 + $0x20] sm:$0xff]  ;;  %v22_v11 = vld [vmem:[%s195_s1 + $0x28] sm:$0xff]  ;;  %v19_v13 = vld [vmem:[%s195_s1 + $0x10] sm:$0xff] }
   0x4   :  { %105 = vmatpush3.bf16.msra.mxu0 %v35_v4  ;;  %v32_v12 = vpack.c.bf16 %v22_v11, %v21_v10  ;;  %v20_v14 = vld [vmem:[%s195_s1 + $0x18] sm:$0xff]  ;;  %v17_v16 = vld [vmem:[%s195_s1] sm:$0xff]  ;;  %v18_v17 = vld [vmem:[%s195_s1 + $0x8] sm:$0xff] }
   0x5   :  { %106 = vmatprep.subr.bf16.mxu0 %v122_v0  ;;  %v31_v15 = vpack.c.bf16 %v20_v14, %v19_v13  ;;  %v30_v18 = vpack.c.bf16 %v18_v17, %v17_v16  ;;  %v15_v19 = vld [vmem:[%s196_s0] sm:$0xff]  ;;  %v16_v20 = vld [vmem:[%s196_s0 + $0x8] sm:$0xff] }
   0x6   :  { %v29_v21 = vpack.c.bf16 %v16_v20, %v15_v19  ;;  %v95_v22 = vld [vmem:[%s197_s2] ss:$0 sm:$0xff] }
   0x8   :  { %107 = vmatpush3.bf16.msra.mxu0 %v34_v6 }
   0x9   :  { %108 = vmatprep.subr.bf16.mxu0 %v122_v0 }
   0xc   :  { %109 = vmatpush3.bf16.msra.mxu0 %v33_v9 }
   0xd   :  { %110 = vmatprep.subr.bf16.mxu0 %v122_v0 }
  0x10   :  { %111 = vmatpush3.bf16.msra.mxu0 %v32_v12 }
  0x11   :  { %112 = vmatprep.subr.bf16.mxu0 %v122_v0 }
  0x14   :  { %113 = vmatpush3.bf16.msra.mxu0 %v31_v15 }
  0x15   :  { %114 = vmatprep.subr.bf16.mxu0 %v122_v0 }
  0x18   :  { %115 = vmatpush3.bf16.msra.mxu0 %v30_v18 }
  0x1b   :  { %117 = vmatmul.mubr.msk.bf16.vlgmr.msra.gmra.mxu0 %vm43_vm1, %v29_v21 }
  0xdb   :  { %v81_v23 = vpop.f32.mrf.mxu0 }
  0xdc   :  { %v82_v24 = vadd.f32 %v95_v22, %v81_v23 }
  0xdd   :  { %v118_v25 = vpop.f32.mrf.mxu0 }
  0xde   :  { %89 = vst.msk [vmem:[%s198_s3] sm:$0xff] %vm88_vm2, %v82_v24 }
  0xdf   :  { %v84_v26 = vpop.f32.mrf.mxu0 }
  0xe0   :  { %v85_v27 = vadd.f32 %v95_v22, %v84_v26 }
  0xe1   :  { %v119_v28 = vpop.f32.mrf.mxu0 }
  0xe2   :  { %90 = vst.msk [vmem:[%s198_s3 + $0x8] sm:$0xff] %vm88_vm2, %v85_v27 }

// kernel: conformer_forward.26
= control target key start
LH: loop header
LB: loop body
LE: loop exit
PB: predicated region body
PF: predicated region fallthrough
CT: control target
= control target key end

     0   :  { %vm40_vm0 = vcmask 261120   ;;  %v315_v14 = vmov 0.0   ;;  %vm316_vm1 = vmmov 0   ;;  %s468_s0 = inlined_call_operand.vmem [shape: f32[16,32], index: 0, kind: input, shape index: {}]   ;;  %s469_s3 = inlined_call_operand.vmem [shape: f32[32,32], index: 3, kind: input, shape index: {}]   ;;  %s470_s5 = inlined_call_operand.vmem [shape: f32[32,32], index: 5, kind: input, shape index: {}]   ;;  %s471_s1 = inlined_call_operand.vmem [shape: f32[1,32], index: 1, kind: input, shape index: {}]   ;;  %s472_s2 = inlined_call_operand.vmem [shape: f32[1,32], index: 2, kind: input, shape index: {}]   ;;  %s473_s7 = inlined_call_operand.vmem [shape: f32[32,32], index: 7, kind: input, shape index: {}]   ;;  %s474_s4 = inlined_call_operand.vmem [shape: f32[1,32], index: 4, kind: input, shape index: {}]   ;;  %s475_s6 = inlined_call_operand.vmem [shape: f32[1,32], index: 6, kind: input, shape index: {}]   ;;  %s476_s9 = inlined_call_operand.vmem [shape: f32[16,32], index: 9, kind: output, shape index: {0}]   ;;  %s477_s10 = inlined_call_operand.vmem [shape: f32[16,32], index: 10, kind: output, shape index: {1}]   ;;  %s478_s8 = inlined_call_operand.vmem [shape: f32[1,32], index: 8, kind: input, shape index: {}]   ;;  %s479_s11 = inlined_call_operand.vmem [shape: f32[16,32], index: 11, kind: output, shape index: {2}]  }
   0x1   :  { %v36_v0 = vld [vmem:[%s468_s0] sm:$0xff]  ;;  %v37_v1 = vld [vmem:[%s468_s0 + $0x8] sm:$0xff]  ;;  %285 = vmatprep.subr.bf16.mxu0 %v315_v14  ;;  %v86_v15 = vld [vmem:[%s469_s3 + $0x10] sm:$0xff]  ;;  %293 = vmatprep.subr.bf16.mxu1 %v315_v14 }
   0x2   :  { %v41_v2 = vsel %vm40_vm0, %v36_v0, 0.0  ;;  %v44_v3 = vsel %vm40_vm0, %v37_v1, 0.0  ;;  %v87_v16 = vld [vmem:[%s469_s3 + $0x18] sm:$0xff]  ;;  %v146_v17 = vld [vmem:[%s470_s5 + $0x10] sm:$0xff]  ;;  %v84_v20 = vld [vmem:[%s469_s3] sm:$0xff]  ;;  %289 = vmatprep.mubr.msk.bf16.mxu0 %vm316_vm1, %v315_v14  ;;  %297 = vmatprep.mubr.msk.bf16.mxu1 %vm316_vm1, %v315_v14 }
   0x3   :  { %42 = vadd.xlane.f32.xlu0 %v41_v2  ;;  %v90_v18 = vpack.c.bf16 %v87_v16, %v86_v15  ;;  %v147_v19 = vld [vmem:[%s470_s5 + $0x18] sm:$0xff]  ;;  %v85_v21 = vld [vmem:[%s469_s3 + $0x8] sm:$0xff]  ;;  %v144_v23 = vld [vmem:[%s470_s5] sm:$0xff] }
   0x4   :  { %v149_v22 = vpack.c.bf16 %v147_v19, %v146_v17  ;;  %v145_v24 = vld [vmem:[%s470_s5 + $0x8] sm:$0xff]  ;;  %v89_v25 = vpack.c.bf16 %v85_v21, %v84_v20  ;;  %v268_v35 = vld [vmem:[%s471_s1] ss:$0 sm:$0xff]  ;;  %v202_v41 = vld [vmem:[%s473_s7 + $0x10] sm:$0xff] }
   0x5   :  { %286 = vmatpush3.bf16.msra.mxu0 %v90_v18  ;;  %v148_v26 = vpack.c.bf16 %v145_v24, %v144_v23  ;;  %v269_v39 = vld [vmem:[%s472_s2] ss:$0 sm:$0xff]  ;;  %v203_v42 = vld [vmem:[%s473_s7 + $0x18] sm:$0xff]  ;;  %v201_v48 = vld [vmem:[%s473_s7 + $0x8] sm:$0xff] }
   0x6   :  { %294 = vmatpush3.bf16.msra.mxu1 %v149_v22  ;;  %287 = vmatprep.subr.bf16.mxu0 %v315_v14  ;;  %v205_v45 = vpack.c.bf16 %v203_v42, %v202_v41  ;;  %v200_v47 = vld [vmem:[%s473_s7] sm:$0xff] }
   0x7   :  { %45 = vadd.xlane.f32.xlu0 %v44_v3  ;;  %295 = vmatprep.subr.bf16.mxu1 %v315_v14  ;;  %v204_v49 = vpack.c.bf16 %v201_v48, %v200_v47  ;;  %v270_v50 = vld [vmem:[%s474_s4] ss:$0 sm:$0xff] }
   0x8   :  { %v272_v51 = vld [vmem:[%s475_s6] ss:$0 sm:$0xff] }
   0x9   :  { %288 = vmatpush3.bf16.msra.mxu0 %v89_v25 }
   0xa   :  { %296 = vmatpush3.bf16.msra.mxu1 %v148_v26  ;;  %301 = vmatprep.subr.bf16.mxu0 %v315_v14 }
  0x8c   :  { %v43_v4 = vpop.xlane.xlu0 %42 }
  0x8d   :  { %v48_v5 = vmul.f32 0.03125, %v43_v4 }
  0x8f   :  { %v50_v6 = vsub.f32 %v36_v0, %v48_v5  ;;  %v274_v0 = vld [vmem:[%s478_s8] ss:$0 sm:$0xff] }
  0x90   :  { %v46_v7 = vpop.xlane.xlu0 %45 }
  0x91   :  { %v49_v8 = vmul.f32 0.03125, %v46_v7  ;;  %v52_v9 = vmul.f32 %v50_v6, %v50_v6 }
  0x93   :  { %v51_v10 = vsub.f32 %v37_v1, %v49_v8  ;;  %v54_v11 = vsel %vm40_vm0, %v52_v9, 0.0 }
  0x94   :  { %55 = vadd.xlane.f32.xlu1 %v54_v11 }
  0x95   :  { %v53_v12 = vmul.f32 %v51_v10, %v51_v10 }
  0x97   :  { %v57_v13 = vsel %vm40_vm0, %v53_v12, 0.0 }
  0x98   :  { %58 = vadd.xlane.f32.xlu1 %v57_v13 }
 0x11d   :  { %v56_v27 = vpop.xlane.xlu1 %55 }
 0x11e   :  { %v60_v28 = vmul.f32 0.03125, %v56_v27 }
 0x120   :  { %v62_v29 = vadd.f32 1e-05, %v60_v28 }
 0x121   :  { %v59_v30 = vpop.xlane.xlu1 %58 }
 0x122   :  { %311 = vrsqrt.f32 %v62_v29  ;;  %v61_v31 = vmul.f32 0.03125, %v59_v30 }
 0x124   :  { %v63_v32 = vadd.f32 1e-05, %v61_v31 }
 0x126   :  { %313 = vrsqrt.f32 %v63_v32 }
 0x12f   :  { %v312_v33 = vpop.eup %311 }
 0x130   :  { %v66_v34 = vmul.f32 %v312_v33, %v50_v6 }
 0x132   :  { %v74_v38 = vmul.f32 %v268_v35, %v66_v34 }
 0x133   :  { %v314_v36 = vpop.eup %313 }
 0x134   :  { %v67_v37 = vmul.f32 %v314_v36, %v51_v10  ;;  %v82_v43 = vadd.f32 %v269_v39, %v74_v38 }
 0x136   :  { %v75_v40 = vmul.f32 %v268_v35, %v67_v37 }
 0x138   :  { %v83_v44 = vadd.f32 %v269_v39, %v75_v40 }
 0x13a   :  { %v88_v46 = vpack.c.bf16 %v83_v44, %v82_v43 }
 0x13c   :  { %290 = vmatmul.mubr.msk.bf16.vlgmr.msra.gmra.mxu0 %vm40_vm0, %v88_v46  ;;  %298 = vmatmul.mubr.msk.bf16.vlgmr.msra.gmra.mxu1 %vm40_vm0, %v88_v46 }
 0x13d   :  { %302 = vmatpush3.bf16.msra.mxu0 %v205_v45  ;;  %305 = vmatprep.mubr.msk.bf16.mxu0 %vm316_vm1, %v315_v14 }
 0x13e   :  { %303 = vmatprep.subr.bf16.mxu0 %v315_v14 }
 0x141   :  { %304 = vmatpush3.bf16.msra.mxu0 %v204_v49 }
 0x144   :  { %306 = vmatmul.mubr.msk.bf16.vlgmr.msra.gmra.mxu0 %vm40_vm0, %v88_v46 }
 0x1fc   :  { %v135_v52 = vpop.f32.mrf.mxu0  ;;  %v191_v53 = vpop.f32.mrf.mxu1 }
 0x1fd   :  { %v136_v54 = vadd.f32 %v270_v50, %v135_v52  ;;  %v192_v55 = vadd.f32 %v272_v51, %v191_v53 }
 0x1fe   :  { %v291_v56 = vpop.f32.mrf.mxu0  ;;  %v299_v57 = vpop.f32.mrf.mxu1 }
 0x1ff   :  { %142 = vst.msk [vmem:[%s476_s9] sm:$0xff] %vm40_vm0, %v136_v54  ;;  %198 = vst.msk [vmem:[%s477_s10] sm:$0xff] %vm40_vm0, %v192_v55 }
 0x200   :  { %v138_v58 = vpop.f32.mrf.mxu0  ;;  %v194_v59 = vpop.f32.mrf.mxu1 }
 0x201   :  { %v139_v60 = vadd.f32 %v270_v50, %v138_v58  ;;  %v195_v61 = vadd.f32 %v272_v51, %v194_v59 }
 0x202   :  { %v292_v62 = vpop.f32.mrf.mxu0  ;;  %v300_v63 = vpop.f32.mrf.mxu1 }
 0x203   :  { %143 = vst.msk [vmem:[%s476_s9 + $0x8] sm:$0xff] %vm40_vm0, %v139_v60  ;;  %199 = vst.msk [vmem:[%s477_s10 + $0x8] sm:$0xff] %vm40_vm0, %v195_v61 }
 0x204   :  { %v247_v1 = vpop.f32.mrf.mxu0 }
 0x205   :  { %v248_v2 = vadd.f32 %v274_v0, %v247_v1 }
 0x206   :  { %v307_v3 = vpop.f32.mrf.mxu0 }
 0x207   :  { %254 = vst.msk [vmem:[%s479_s11] sm:$0xff] %vm40_vm0, %v248_v2 }
 0x208   :  { %v250_v4 = vpop.f32.mrf.mxu0 }
 0x209   :  { %v251_v5 = vadd.f32 %v274_v0, %v250_v4 }
 0x20a   :  { %v308_v6 = vpop.f32.mrf.mxu0 }
 0x20b   :  { %255 = vst.msk [vmem:[%s479_s11 + $0x8] sm:$0xff] %vm40_vm0, %v251_v5 }

// kernel: conformer_forward.25
= control target key start
LH: loop header
LB: loop body
LE: loop exit
PB: predicated region body
PF: predicated region fallthrough
CT: control target
= control target key end

     0   :  { %vm53_vm0 = vcmask 261120   ;;  %v291_v14 = vmov 0.0   ;;  %vm292_vm1 = vmmov 0   ;;  %s446_s0 = inlined_call_operand.vmem [shape: f32[16,32], index: 0, kind: input, shape index: {}]   ;;  %s447_s3 = inlined_call_operand.vmem [shape: f32[32,128], index: 3, kind: input, shape index: {}]   ;;  %s448_s1 = inlined_call_operand.vmem [shape: f32[1,32], index: 1, kind: input, shape index: {}]   ;;  %s449_s2 = inlined_call_operand.vmem [shape: f32[1,32], index: 2, kind: input, shape index: {}]   ;;  %s450_s5 = inlined_call_operand.vmem [shape: f32[128,32], index: 5, kind: input, shape index: {}]   ;;  %s451_s4 = inlined_call_operand.vmem [shape: f32[1,128], index: 4, kind: input, shape index: {}]   ;;  %s452_s6 = inlined_call_operand.vmem [shape: f32[1,32], index: 6, kind: input, shape index: {}]   ;;  %s453_s7 = inlined_call_operand.vmem [shape: f32[16,32], index: 7, kind: output, shape index: {}]  }
   0x1   :  { %v336_v0 = vld [vmem:[%s446_s0] sm:$0xff]  ;;  %v341_v1 = vld [vmem:[%s446_s0 + $0x8] sm:$0xff]  ;;  %249 = vmatprep.subr.bf16.mxu0 %v291_v14  ;;  %v33_v15 = vld [vmem:[%s447_s3 + $0x10] sm:$0xff]  ;;  %253 = vmatprep.mubr.msk.bf16.mxu0 %vm292_vm1, %v291_v14 }
   0x2   :  { %v54_v2 = vsel %vm53_vm0, %v336_v0, 0.0  ;;  %v57_v3 = vsel %vm53_vm0, %v341_v1, 0.0  ;;  %v34_v16 = vld [vmem:[%s447_s3 + $0x18] sm:$0xff]  ;;  %v31_v17 = vld [vmem:[%s447_s3] sm:$0xff]  ;;  %v32_v19 = vld [vmem:[%s447_s3 + $0x8] sm:$0xff]  ;;  %257 = vmatprep.subr.bf16.mxu1 %v291_v14  ;;  %273 = vmatprep.mubr.msk.bf16.mxu1 %vm292_vm1, %v291_v14 }
   0x3   :  { %55 = vadd.xlane.f32.xlu0 %v54_v2  ;;  %v99_v18 = vpack.c.bf16 %v34_v16, %v33_v15  ;;  %v98_v20 = vpack.c.bf16 %v32_v19, %v31_v17  ;;  %v230_v29 = vld [vmem:[%s448_s1] ss:$0 sm:$0xff]  ;;  %v50_v38 = vld [vmem:[%s450_s5 + $0x70] sm:$0xff]  ;;  %v51_v39 = vld [vmem:[%s450_s5 + $0x78] sm:$0xff] }
   0x4   :  { %v231_v33 = vld [vmem:[%s449_s2] ss:$0 sm:$0xff]  ;;  %v172_v40 = vpack.c.bf16 %v51_v39, %v50_v38  ;;  %v49_v42 = vld [vmem:[%s450_s5 + $0x68] sm:$0xff]  ;;  %v46_v44 = vld [vmem:[%s450_s5 + $0x50] sm:$0xff] }
   0x5   :  { %250 = vmatpush3.bf16.msra.mxu0 %v99_v18  ;;  %v48_v41 = vld [vmem:[%s450_s5 + $0x60] sm:$0xff]  ;;  %v47_v45 = vld [vmem:[%s450_s5 + $0x58] sm:$0xff]  ;;  %v45_v48 = vld [vmem:[%s450_s5 + $0x48] sm:$0xff] }
   0x6   :  { %251 = vmatprep.subr.bf16.mxu0 %v291_v14  ;;  %258 = vmatpush3.bf16.msra.mxu1 %v172_v40  ;;  %v171_v43 = vpack.c.bf16 %v49_v42, %v48_v41  ;;  %v170_v46 = vpack.c.bf16 %v47_v45, %v46_v44  ;;  %v44_v47 = vld [vmem:[%s450_s5 + $0x40] sm:$0xff]  ;;  %v42_v50 = vld [vmem:[%s450_s5 + $0x30] sm:$0xff]  ;;  %v43_v51 = vld [vmem:[%s450_s5 + $0x38] sm:$0xff] }
   0x7   :  { %58 = vadd.xlane.f32.xlu0 %v57_v3  ;;  %259 = vmatprep.subr.bf16.mxu1 %v291_v14  ;;  %v169_v49 = vpack.c.bf16 %v45_v48, %v44_v47  ;;  %v168_v52 = vpack.c.bf16 %v43_v51, %v42_v50  ;;  %v40_v53 = vld [vmem:[%s450_s5 + $0x20] sm:$0xff]  ;;  %v41_v54 = vld [vmem:[%s450_s5 + $0x28] sm:$0xff]  ;;  %v38_v56 = vld [vmem:[%s450_s5 + $0x10] sm:$0xff] }
   0x8   :  { %v167_v55 = vpack.c.bf16 %v41_v54, %v40_v53  ;;  %v39_v57 = vld [vmem:[%s450_s5 + $0x18] sm:$0xff]  ;;  %v36_v59 = vld [vmem:[%s450_s5] sm:$0xff]  ;;  %v37_v60 = vld [vmem:[%s450_s5 + $0x8] sm:$0xff] }
   0x9   :  { %252 = vmatpush3.bf16.msra.mxu0 %v98_v20  ;;  %v166_v58 = vpack.c.bf16 %v39_v57, %v38_v56  ;;  %v165_v61 = vpack.c.bf16 %v37_v60, %v36_v59  ;;  %v232_v62 = vld [vmem:[%s451_s4] ss:$0 sm:$0xff] }
   0xa   :  { %260 = vmatpush3.bf16.msra.mxu1 %v171_v43  ;;  %v236_v18 = vld [vmem:[%s452_s6] ss:$0 sm:$0xff] }
   0xb   :  { %261 = vmatprep.subr.bf16.mxu1 %v291_v14 }
   0xe   :  { %262 = vmatpush3.bf16.msra.mxu1 %v170_v46 }
   0xf   :  { %263 = vmatprep.subr.bf16.mxu1 %v291_v14 }
  0x12   :  { %264 = vmatpush3.bf16.msra.mxu1 %v169_v49 }
  0x13   :  { %265 = vmatprep.subr.bf16.mxu1 %v291_v14 }
  0x16   :  { %266 = vmatpush3.bf16.msra.mxu1 %v168_v52 }
  0x17   :  { %267 = vmatprep.subr.bf16.mxu1 %v291_v14 }
  0x1a   :  { %268 = vmatpush3.bf16.msra.mxu1 %v167_v55 }
  0x1b   :  { %269 = vmatprep.subr.bf16.mxu1 %v291_v14 }
  0x1e   :  { %270 = vmatpush3.bf16.msra.mxu1 %v166_v58 }
  0x1f   :  { %271 = vmatprep.subr.bf16.mxu1 %v291_v14 }
  0x22   :  { %272 = vmatpush3.bf16.msra.mxu1 %v165_v61 }
  0x8c   :  { %v56_v4 = vpop.xlane.xlu0 %55 }
  0x8d   :  { %v61_v5 = vmul.f32 0.03125, %v56_v4 }
  0x8f   :  { %v63_v6 = vsub.f32 %v336_v0, %v61_v5 }
  0x90   :  { %v59_v7 = vpop.xlane.xlu0 %58 }
  0x91   :  { %v62_v8 = vmul.f32 0.03125, %v59_v7  ;;  %v65_v9 = vmul.f32 %v63_v6, %v63_v6 }
  0x93   :  { %v64_v10 = vsub.f32 %v341_v1, %v62_v8  ;;  %v67_v11 = vsel %vm53_vm0, %v65_v9, 0.0 }
  0x94   :  { %68 = vadd.xlane.f32.xlu1 %v67_v11 }
  0x95   :  { %v66_v12 = vmul.f32 %v64_v10, %v64_v10 }
  0x97   :  { %v70_v13 = vsel %vm53_vm0, %v66_v12, 0.0 }
  0x98   :  { %71 = vadd.xlane.f32.xlu1 %v70_v13 }
 0x11d   :  { %v69_v21 = vpop.xlane.xlu1 %68 }
 0x11e   :  { %v73_v22 = vmul.f32 0.03125, %v69_v21 }
 0x120   :  { %v75_v23 = vadd.f32 1e-05, %v73_v22 }
 0x121   :  { %v72_v24 = vpop.xlane.xlu1 %71 }
 0x122   :  { %279 = vrsqrt.f32 %v75_v23  ;;  %v74_v25 = vmul.f32 0.03125, %v72_v24 }
 0x124   :  { %v76_v26 = vadd.f32 1e-05, %v74_v25 }
 0x126   :  { %281 = vrsqrt.f32 %v76_v26 }
 0x12f   :  { %v280_v27 = vpop.eup %279 }
 0x130   :  { %v79_v28 = vmul.f32 %v280_v27, %v63_v6 }
 0x132   :  { %v87_v32 = vmul.f32 %v230_v29, %v79_v28 }
 0x133   :  { %v282_v30 = vpop.eup %281 }
 0x134   :  { %v80_v31 = vmul.f32 %v282_v30, %v64_v10  ;;  %v95_v35 = vadd.f32 %v231_v33, %v87_v32 }
 0x136   :  { %v88_v34 = vmul.f32 %v230_v29, %v80_v31 }
 0x138   :  { %v96_v36 = vadd.f32 %v231_v33, %v88_v34 }
 0x13a   :  { %v97_v37 = vpack.c.bf16 %v96_v36, %v95_v35 }
 0x13c   :  { %254 = vmatmul.mubr.msk.bf16.vlgmr.msra.gmra.mxu0 %vm53_vm0, %v97_v37 }
 0x1fc   :  { %v143_v63 = vpop.f32.mrf.mxu0 }
 0x1fd   :  { %v144_v2 = vadd.f32 %v232_v62, %v143_v63 }
 0x1fe   :  { %v255_v3 = vpop.f32.mrf.mxu0 }
 0x1ff   :  { %v234_v4 = vmul.f32 -1.442695, %v144_v2 }
 0x200   :  { %v146_v5 = vpop.f32.mrf.mxu0 }
 0x201   :  { %283 = vpow2.f32 %v234_v4  ;;  %v147_v6 = vadd.f32 %v232_v62, %v146_v5 }
 0x202   :  { %v256_v7 = vpop.f32.mrf.mxu0 }
 0x203   :  { %v235_v8 = vmul.f32 -1.442695, %v147_v6 }
 0x205   :  { %285 = vpow2.f32 %v235_v8 }
 0x20e   :  { %v284_v9 = vpop.eup %283 }
 0x20f   :  { %v156_v10 = vadd.f32 1.0, %v284_v9 }
 0x211   :  { %287 = vrcp.f32 %v156_v10 }
 0x212   :  { %v286_v11 = vpop.eup %285 }
 0x213   :  { %v157_v12 = vadd.f32 1.0, %v286_v11 }
 0x215   :  { %289 = vrcp.f32 %v157_v12 }
 0x21e   :  { %v288_v13 = vpop.eup %287 }
 0x21f   :  { %v162_v15 = vmul.f32 %v288_v13, %v144_v2 }
 0x222   :  { %v290_v14 = vpop.eup %289 }
 0x223   :  { %v163_v16 = vmul.f32 %v290_v14, %v147_v6 }
 0x225   :  { %v164_v17 = vpack.c.bf16 %v163_v16, %v162_v15 }
 0x227   :  { %274 = vmatmul.mubr.bf16.vlgmr.msra.gmra.mxu1 %v164_v17 }
 0x2e7   :  { %v213_v19 = vpop.f32.mrf.mxu1 }
 0x2e8   :  { %v214_v20 = vadd.f32 %v236_v18, %v213_v19 }
 0x2e9   :  { %v275_v21 = vpop.f32.mrf.mxu1 }
 0x2ea   :  { %v220_v22 = vmul.f32 0.5, %v214_v20 }
 0x2eb   :  { %v216_v23 = vpop.f32.mrf.mxu1 }
 0x2ec   :  { %v222_v24 = vadd.f32 %v220_v22, %v336_v0  ;;  %v217_v25 = vadd.f32 %v236_v18, %v216_v23 }
 0x2ed   :  { %v276_v26 = vpop.f32.mrf.mxu1 }
 0x2ee   :  { %224 = vst.msk [vmem:[%s453_s7] sm:$0xff] %vm53_vm0, %v222_v24  ;;  %v221_v27 = vmul.f32 0.5, %v217_v25 }
 0x2f0   :  { %v223_v28 = vadd.f32 %v221_v27, %v341_v1 }
 0x2f2   :  { %225 = vst.msk [vmem:[%s453_s7 + $0x8] sm:$0xff] %vm53_vm0, %v223_v28 }

// kernel: conformer_forward.28
= control target key start
LH: loop header
LB: loop body
LE: loop exit
PB: predicated region body
PF: predicated region fallthrough
CT: control target
= control target key end

     0   :  { %s490_s9 = smov 0   ;;  %s531_s0 = inlined_call_operand.vmem [shape: f32[2,4,7,8], index: 0, kind: input, shape index: {}]   ;;  %s532_s1 = inlined_call_operand.vmem [shape: f32[4,7,8], index: 1, kind: input, shape index: {}]   ;;  %s533_s2 = inlined_call_operand.vmem [shape: f32[2,4,7,7], index: 2, kind: output, shape index: {}]  }
   0x1 LB: > { %s406_s10 = sadd.s32 4294967295, %s471_s9   ;;  %p410_p0 = scmp.ge.s32.totalorder %s471_s9, 1  ;;  %s471_s9 = sphi %s490_s9, %s12_s9  }
   0x2   : > { %p112_p1 = scmp.lt.s32.totalorder %s471_s9, 3 }
   0x4   : > { %p113_p2 = pnand %p410_p0, %p112_p1 }
   0x5   : > { %p134_p3 = scmp.lt.s32.totalorder (!%p113_p2), %s406_s10, 1 }
   0x6   : > { %116 = sbr.rel (%p113_p2) target bundleno = 229 (0xe5), region = 28 }
   0xb   : > { %v153_v0 = vld [vmem:[%s532_s1] sm:$0x7f]  ;;  %vm161_vm0 = vcmask 64512   ;;  %v154_v1 = vld [vmem:[%s532_s1 + $0x8] sm:$0x7f]  ;;  %v473_v2 = vmov 0.0  }
   0xc   : > { %431 = vmatprep.subr.bf16.mxu0 %v473_v2  ;;  %437 = vmatprep.subr.bf16.mxu1 %v473_v2  ;;  %v157_v3 = vpack.c.bf16 %v153_v0, %v153_v0  ;;  %v158_v4 = vpack.c.bf16 %v154_v1, %v154_v1  ;;  %vm474_vm1 = vmmov 0   ;;  %v155_v5 = vld [vmem:[%s532_s1 + $0x10] sm:$0x7f]  ;;  %v156_v6 = vld [vmem:[%s532_s1 + $0x18] sm:$0x7f]  ;;  %s535_s10 = smov (!%p134_p3, %s406_s10), 1 }
   0xd   : > { %433 = vmatprep.mubr.msk.bf16.mxu0 %vm474_vm1, %v473_v2  ;;  %439 = vmatprep.mubr.msk.bf16.mxu1 %vm474_vm1, %v473_v2  ;;  %s421_s19 = sshll.u32 %s535_s10, 5  ;;  %v159_v9 = vpack.c.bf16 %v155_v5, %v155_v5  ;;  %v160_v10 = vpack.c.bf16 %v156_v6, %v156_v6  ;;  %vm346_vm2 = vcmask 55296  }
   0xe   : > { %v166_v7 = vsel %vm161_vm0, %v157_v3, 0  ;;  %v212_v8 = vsel %vm161_vm0, %v158_v4, 0  ;;  %s138_s22 = scalar_lea.vmem %s531_s0, %s421_s19  ;;  %s143_s25 = scalar_lea.vmem %s533_s2, %s421_s19 }
   0xf   : > { %432 = vmatpush3.bf16.xpose.msra.mxu0 %v166_v7  ;;  %438 = vmatpush3.bf16.xpose.msra.mxu1 %v212_v8  ;;  %v145_v11 = vld [vmem:[%s138_s22] sm:$0x7f]  ;;  %v146_v12 = vld [vmem:[%s138_s22 + $0x8] sm:$0x7f]  ;;  %v258_v15 = vsel %vm161_vm0, %v159_v9, 0  ;;  %v304_v16 = vsel %vm161_vm0, %v160_v10, 0 }
  0x10   : > { %443 = vmatprep.subr.bf16.mxu0 %v473_v2  ;;  %449 = vmatprep.subr.bf16.mxu1 %v473_v2  ;;  %v149_v13 = vpack.c.bf16 %v145_v11, %v145_v11  ;;  %v150_v14 = vpack.c.bf16 %v146_v12, %v146_v12  ;;  %v147_v17 = vld [vmem:[%s138_s22 + $0x10] sm:$0x7f]  ;;  %v148_v18 = vld [vmem:[%s138_s22 + $0x18] sm:$0x7f] }
  0x11   : > { %v151_v19 = vpack.c.bf16 %v147_v17, %v147_v17  ;;  %v152_v20 = vpack.c.bf16 %v148_v18, %v148_v18 }
  0x16   : > { %434 = vmatmul.mubr.msk.bf16.vlgmr.msra.gmra.mxu0 %vm161_vm0, %v149_v13  ;;  %440 = vmatmul.mubr.msk.bf16.vlgmr.msra.gmra.mxu1 %vm161_vm0, %v150_v14 }
  0x17   : > { %444 = vmatpush3.bf16.xpose.msra.mxu0 %v258_v15  ;;  %450 = vmatpush3.bf16.xpose.msra.mxu1 %v304_v16 }
  0x18   : > { %445 = vmatprep.mubr.msk.bf16.mxu0 %vm474_vm1, %v473_v2  ;;  %451 = vmatprep.mubr.msk.bf16.mxu1 %vm474_vm1, %v473_v2 }
  0x1e   : > { %446 = vmatmul.mubr.msk.bf16.vlgmr.msra.gmra.mxu0 %vm161_vm0, %v151_v19  ;;  %452 = vmatmul.mubr.msk.bf16.vlgmr.msra.gmra.mxu1 %vm161_vm0, %v152_v20 }
  0xd6   : > { %v202_v21 = vpop.f32.mrf.mxu0  ;;  %v248_v22 = vpop.f32.mrf.mxu1 }
  0xd7   : > { %347 = vst.msk [vmem:[%s143_s25] sm:$0x7f] %vm346_vm2, %v202_v21  ;;  %348 = vst.msk [vmem:[%s143_s25 + $0x8] sm:$0x7f] %vm346_vm2, %v248_v22 }
  0xd8   : > { %v435_v23 = vpop.f32.mrf.mxu0  ;;  %v441_v24 = vpop.f32.mrf.mxu1 }
  0xda   : > { %v205_v25 = vpop.f32.mrf.mxu0  ;;  %v251_v26 = vpop.f32.mrf.mxu1 }
  0xdc   : > { %v436_v27 = vpop.f32.mrf.mxu0  ;;  %v442_v28 = vpop.f32.mrf.mxu1 }
  0xde   : > { %v294_v29 = vpop.f32.mrf.mxu0  ;;  %v340_v30 = vpop.f32.mrf.mxu1 }
  0xdf   : > { %349 = vst.msk [vmem:[%s143_s25 + $0x10] sm:$0x7f] %vm346_vm2, %v294_v29  ;;  %350 = vst.msk [vmem:[%s143_s25 + $0x18] sm:$0x7f] %vm346_vm2, %v340_v30 }
  0xe0   : > { %v447_v31 = vpop.f32.mrf.mxu0  ;;  %v453_v32 = vpop.f32.mrf.mxu1 }
  0xe2   : > { %v297_v33 = vpop.f32.mrf.mxu0  ;;  %v343_v34 = vpop.f32.mrf.mxu1 }
  0xe4   : > { %v448_v35 = vpop.f32.mrf.mxu0  ;;  %v454_v36 = vpop.f32.mrf.mxu1 }
  0xe5 PF: > { %s12_s9 = sadd.s32 1, %s471_s9  }
  0xe6   : > { %p9_p4 = scmp.ge.s32.totalorder %s12_s9, 4  }
  0xe8   :  { %11 = sbr.rel (!%p9_p4) target bundleno = 1 (0x1), region = 58 }

// kernel: conformer_forward.27
= control target key start
LH: loop header
LB: loop body
LE: loop exit
PB: predicated region body
PF: predicated region fallthrough
CT: control target
= control target key end

     0   :  { %v94_v0 = vmov 0.0   ;;  %vm95_vm0 = vmmov 0   ;;  %vm30_vm1 = vcmask 261120   ;;  %s137_s1 = inlined_call_operand.vmem [shape: f32[32,32], index: 1, kind: input, shape index: {}]   ;;  %s138_s0 = inlined_call_operand.vmem [shape: f32[8,32], index: 0, kind: input, shape index: {}]   ;;  %s139_s2 = inlined_call_operand.vmem [shape: f32[1,32], index: 2, kind: input, shape index: {}]   ;;  %s140_s3 = inlined_call_operand.vmem [shape: f32[8,32], index: 3, kind: output, shape index: {}]  }
   0x1   :  { %84 = vmatprep.subr.bf16.mxu0 %v94_v0  ;;  %v18_v1 = vld [vmem:[%s137_s1 + $0x10] sm:$0xff]  ;;  %v19_v2 = vld [vmem:[%s137_s1 + $0x18] sm:$0xff]  ;;  %v16_v3 = vld [vmem:[%s137_s1] sm:$0xff]  ;;  %88 = vmatprep.mubr.msk.bf16.mxu0 %vm95_vm0, %v94_v0 }
   0x2   :  { %v22_v4 = vpack.c.bf16 %v19_v2, %v18_v1  ;;  %v17_v5 = vld [vmem:[%s137_s1 + $0x8] sm:$0xff]  ;;  %v15_v7 = vld [vmem:[%s138_s0] sm:$0xff] }
   0x3   :  { %v21_v6 = vpack.c.bf16 %v17_v5, %v16_v3  ;;  %v20_v8 = vpack.c.bf16 %v15_v7, %v15_v7  ;;  %v79_v9 = vld [vmem:[%s139_s2] ss:$0 sm:$0xff] }
   0x4   :  { %85 = vmatpush3.bf16.msra.mxu0 %v22_v4 }
   0x5   :  { %86 = vmatprep.subr.bf16.mxu0 %v94_v0 }
   0x8   :  { %87 = vmatpush3.bf16.msra.mxu0 %v21_v6 }
   0xb   :  { %89 = vmatmul.mubr.msk.bf16.vlgmr.msra.gmra.mxu0 %vm30_vm1, %v20_v8 }
  0xcb   :  { %v68_v10 = vpop.f32.mrf.mxu0 }
  0xcc   :  { %v69_v11 = vadd.f32 %v79_v9, %v68_v10 }
  0xcd   :  { %v90_v12 = vpop.f32.mrf.mxu0 }
  0xce   :  { %74 = vst.msk [vmem:[%s140_s3] sm:$0xff] %vm30_vm1, %v69_v11 }
  0xcf   :  { %v71_v13 = vpop.f32.mrf.mxu0 }
  0xd1   :  { %v91_v14 = vpop.f32.mrf.mxu0 }

// kernel: conformer_forward.30
= control target key start
LH: loop header
LB: loop body
LE: loop exit
PB: predicated region body
PF: predicated region fallthrough
CT: control target
= control target key end

     0   :  { %v106_v0 = vmov 0.0   ;;  %vm107_vm0 = vmmov 0   ;;  %vm29_vm1 = vcmask 261120   ;;  %s169_s2 = inlined_call_operand.vmem [shape: f32[32,32], index: 2, kind: input, shape index: {}]   ;;  %s170_s0 = inlined_call_operand.vmem [shape: f32[16,32], index: 0, kind: input, shape index: {}]   ;;  %s171_s1 = inlined_call_operand.vmem [shape: f32[16,32], index: 1, kind: input, shape index: {}]   ;;  %s172_s3 = inlined_call_operand.vmem [shape: f32[1,32], index: 3, kind: input, shape index: {}]   ;;  %s173_s4 = inlined_call_operand.vmem [shape: f32[16,32], index: 4, kind: output, shape index: {}]  }
   0x1   :  { %96 = vmatprep.subr.bf16.mxu0 %v106_v0  ;;  %v24_v1 = vld [vmem:[%s169_s2 + $0x10] sm:$0xff]  ;;  %v25_v2 = vld [vmem:[%s169_s2 + $0x18] sm:$0xff]  ;;  %v22_v3 = vld [vmem:[%s169_s2] sm:$0xff]  ;;  %100 = vmatprep.mubr.msk.bf16.mxu0 %vm107_vm0, %v106_v0 }
   0x2   :  { %v28_v4 = vpack.c.bf16 %v25_v2, %v24_v1  ;;  %v23_v5 = vld [vmem:[%s169_s2 + $0x8] sm:$0xff]  ;;  %v20_v7 = vld [vmem:[%s170_s0] sm:$0xff] }
   0x3   :  { %v27_v6 = vpack.c.bf16 %v23_v5, %v22_v3  ;;  %v21_v8 = vld [vmem:[%s170_s0 + $0x8] sm:$0xff]  ;;  %v18_v10 = vld [vmem:[%s171_s1] sm:$0xff] }
   0x4   :  { %97 = vmatpush3.bf16.msra.mxu0 %v28_v4  ;;  %v26_v9 = vpack.c.bf16 %v21_v8, %v20_v7  ;;  %v92_v12 = vld [vmem:[%s172_s3] ss:$0 sm:$0xff]  ;;  %v19_v15 = vld [vmem:[%s171_s1 + $0x8] sm:$0xff] }
   0x5   :  { %98 = vmatprep.subr.bf16.mxu0 %v106_v0 }
   0x8   :  { %99 = vmatpush3.bf16.msra.mxu0 %v27_v6 }
   0xb   :  { %101 = vmatmul.mubr.msk.bf16.vlgmr.msra.gmra.mxu0 %vm29_vm1, %v26_v9 }
  0xcb   :  { %v67_v11 = vpop.f32.mrf.mxu0 }
  0xcc   :  { %v74_v13 = vadd.f32 %v67_v11, %v18_v10 }
  0xcd   :  { %v102_v14 = vpop.f32.mrf.mxu0 }
  0xce   :  { %v83_v16 = vadd.f32 %v92_v12, %v74_v13 }
  0xcf   :  { %v70_v17 = vpop.f32.mrf.mxu0 }
  0xd0   :  { %85 = vst.msk [vmem:[%s173_s4] sm:$0xff] %vm29_vm1, %v83_v16  ;;  %v75_v18 = vadd.f32 %v70_v17, %v19_v15 }
  0xd1   :  { %v103_v19 = vpop.f32.mrf.mxu0 }
  0xd2   :  { %v84_v20 = vadd.f32 %v92_v12, %v75_v18 }
  0xd4   :  { %86 = vst.msk [vmem:[%s173_s4 + $0x8] sm:$0xff] %vm29_vm1, %v84_v20 }

// kernel: conformer_forward.29
= control target key start
LH: loop header
LB: loop body
LE: loop exit
PB: predicated region body
PF: predicated region fallthrough
CT: control target
= control target key end

     0   :  { %s967_s15 = smov 0   ;;  %s1048_s0 = inlined_call_operand.vmem [shape: f32[2,4,7,8], index: 0, kind: input, shape index: {}]   ;;  %s1049_s1 = inlined_call_operand.vmem [shape: f32[2,4,7,8], index: 1, kind: input, shape index: {}]   ;;  %s1050_s2 = inlined_call_operand.vmem [shape: f32[2,4,7,8], index: 2, kind: input, shape index: {}]   ;;  %s1051_s3 = inlined_call_operand.vmem [shape: f32[2,4,7,7], index: 3, kind: input, shape index: {}]   ;;  %s1052_s4 = inlined_call_operand.vmem [shape: f32[2,4,7,8], index: 4, kind: output, shape index: {}]  }
   0x1 LB: > { %s810_s16 = sadd.s32 4294967295, %s937_s15   ;;  %p814_p0 = scmp.ge.s32.totalorder %s937_s15, 1  ;;  %s937_s15 = sphi %s967_s15, %s14_s15  }
   0x2   : > { %p192_p1 = scmp.lt.s32.totalorder %s937_s15, 3 }
   0x4   : > { %p193_p2 = pnand %p814_p0, %p192_p1 }
   0x5   : > { %p233_p3 = scmp.lt.s32.totalorder (!%p193_p2), %s810_s16, 1 }
   0x6   : > { %196 = sbr.rel (%p193_p2) target bundleno = 747 (0x2eb), region = 36 }
   0xb   : > { %v939_v0 = vmov 0.0   ;;  %s1054_s16 = smov (!%p233_p3, %s810_s16), 1  ;;  %vm940_vm0 = vmmov 0   ;;  %vm279_vm1 = vcmask 64512   ;;  %vm468_vm2 = vcmask 55296  }
   0xc   : > { %856 = vmatprep.subr.bf16.mxu0 %v939_v0  ;;  %862 = vmatprep.subr.bf16.mxu1 %v939_v0  ;;  %s981_s17 = sshll.u32 %s1054_s16, 5  ;;  %vm529_vm3 = vcmask 1042432   ;;  %vm530_vm4 = vcmask 1043456   ;;  %vm525_vm5 = vcmask 56320   ;;  %vm714_vm6 = vcmask 63488  }
   0xd   : > { %858 = vmatprep.mubr.msk.bf16.mxu0 %vm940_vm0, %v939_v0  ;;  %864 = vmatprep.mubr.msk.bf16.mxu1 %vm940_vm0, %v939_v0  ;;  %s242_s20 = scalar_lea.vmem %s1049_s1, %s981_s17  ;;  %s237_s23 = scalar_lea.vmem %s1048_s0, %s981_s17 }
   0xe   : > { %v267_v1 = vld [vmem:[%s242_s20] sm:$0x7f]  ;;  %v268_v2 = vld [vmem:[%s242_s20 + $0x8] sm:$0x7f]  ;;  %v269_v5 = vld [vmem:[%s242_s20 + $0x10] sm:$0x7f]  ;;  %s252_s26 = scalar_lea.vmem %s1051_s3, %s981_s17  ;;  %s247_s29 = scalar_lea.vmem %s1050_s2, %s981_s17 }
   0xf   : > { %v271_v3 = vpack.c.bf16 %v267_v1, %v267_v1  ;;  %v272_v4 = vpack.c.bf16 %v268_v2, %v268_v2  ;;  %v270_v6 = vld [vmem:[%s242_s20 + $0x18] sm:$0x7f]  ;;  %v259_v9 = vld [vmem:[%s237_s23] sm:$0x7f]  ;;  %v260_v10 = vld [vmem:[%s237_s23 + $0x8] sm:$0x7f]  ;;  %v273_v11 = vpack.c.bf16 %v269_v5, %v269_v5  ;;  %s257_s6 = scalar_lea.vmem %s1052_s4, %s981_s17 }
  0x10   : > { %v274_v12 = vpack.c.bf16 %v270_v6, %v270_v6  ;;  %v263_v13 = vpack.c.bf16 %v259_v9, %v259_v9  ;;  %v264_v14 = vpack.c.bf16 %v260_v10, %v260_v10  ;;  %v261_v17 = vld [vmem:[%s237_s23 + $0x10] sm:$0x7f]  ;;  %v262_v18 = vld [vmem:[%s237_s23 + $0x18] sm:$0x7f]  ;;  %v275_v21 = vld [vmem:[%s252_s26] sm:$0x7f] }
  0x11   : > { %v284_v7 = vsel %vm279_vm1, %v271_v3, 0  ;;  %v330_v8 = vsel %vm279_vm1, %v272_v4, 0  ;;  %v376_v15 = vsel %vm279_vm1, %v273_v11, 0  ;;  %v265_v19 = vpack.c.bf16 %v261_v17, %v261_v17  ;;  %v276_v22 = vld [vmem:[%s252_s26 + $0x8] sm:$0x7f] }
  0x12   : > { %857 = vmatpush3.bf16.xpose.msra.mxu0 %v284_v7  ;;  %863 = vmatpush3.bf16.xpose.msra.mxu1 %v330_v8  ;;  %v422_v16 = vsel %vm279_vm1, %v274_v12, 0  ;;  %v266_v20 = vpack.c.bf16 %v262_v18, %v262_v18  ;;  %v277_v36 = vld [vmem:[%s252_s26 + $0x10] sm:$0x7f]  ;;  %v278_v37 = vld [vmem:[%s252_s26 + $0x18] sm:$0x7f]  ;;  %v941_v12 = vmov 65535  }
  0x13   : > { %868 = vmatprep.subr.bf16.mxu0 %v939_v0  ;;  %874 = vmatprep.subr.bf16.mxu1 %v939_v0  ;;  %v517_v10 = vld [vmem:[%s247_s29] sm:$0x7f] }
  0x14   : > { %v521_v11 = vpack.c.bf16 %v517_v10, %v517_v10 }
  0x19   : > { %859 = vmatmul.mubr.msk.bf16.vlgmr.msra.gmra.mxu0 %vm279_vm1, %v263_v13  ;;  %865 = vmatmul.mubr.msk.bf16.vlgmr.msra.gmra.mxu1 %vm279_vm1, %v264_v14  ;;  %v531_v13 = vsel %vm529_vm3, 4294967295, %v941_v12 }
  0x1a   : > { %869 = vmatpush3.bf16.xpose.msra.mxu0 %v376_v15  ;;  %875 = vmatpush3.bf16.xpose.msra.mxu1 %v422_v16  ;;  %v532_v14 = vsel %vm530_vm4, %v531_v13, 0  ;;  %v518_v15 = vld [vmem:[%s247_s29 + $0x8] sm:$0x7f] }
  0x1b   : > { %870 = vmatprep.mubr.msk.bf16.mxu0 %vm940_vm0, %v939_v0  ;;  %876 = vmatprep.mubr.msk.bf16.mxu1 %vm940_vm0, %v939_v0  ;;  %v534_v16 = vand.u32 %v532_v14, %v521_v11  ;;  %v522_v17 = vpack.c.bf16 %v518_v15, %v518_v15 }
  0x1c   : > { %880 = vmatprep.subr.bf16.mxu0 %v939_v0  ;;  %886 = vmatprep.subr.bf16.mxu1 %v939_v0 }
  0x1d   : > { %v580_v18 = vand.u32 %v532_v14, %v522_v17 }
  0x21   : > { %871 = vmatmul.mubr.msk.bf16.vlgmr.msra.gmra.mxu0 %vm279_vm1, %v265_v19  ;;  %877 = vmatmul.mubr.msk.bf16.vlgmr.msra.gmra.mxu1 %vm279_vm1, %v266_v20  ;;  %v519_v19 = vld [vmem:[%s247_s29 + $0x10] sm:$0x7f] }
  0x22   : > { %882 = vmatprep.mubr.msk.bf16.mxu0 %vm940_vm0, %v939_v0  ;;  %888 = vmatprep.mubr.msk.bf16.mxu1 %vm940_vm0, %v939_v0  ;;  %v523_v20 = vpack.c.bf16 %v519_v19, %v519_v19 }
  0x23   : > { %881 = vmatpush3.bf16.msra.mxu0 %v534_v16  ;;  %887 = vmatpush3.bf16.msra.mxu1 %v580_v18 }
  0x24   : > { %892 = vmatprep.subr.bf16.mxu0 %v939_v0  ;;  %898 = vmatprep.subr.bf16.mxu1 %v939_v0 }
  0xd9   : > { %v320_v23 = vpop.f32.mrf.mxu0  ;;  %v366_v24 = vpop.f32.mrf.mxu1 }
  0xda   : > { %v321_v25 = vadd.f32 %v320_v23, %v275_v21  ;;  %v367_v26 = vadd.f32 %v366_v24, %v276_v22  ;;  %v626_v21 = vand.u32 %v532_v14, %v523_v20  ;;  %v520_v22 = vld [vmem:[%s247_s29 + $0x18] sm:$0x7f] }
  0xdb   : > { %v860_v27 = vpop.f32.mrf.mxu0  ;;  %v866_v28 = vpop.f32.mrf.mxu1  ;;  %v524_v23 = vpack.c.bf16 %v520_v22, %v520_v22 }
  0xdc   : > { %v464_v29 = vmul.f32 0.17677669, %v321_v25  ;;  %v465_v30 = vmul.f32 0.17677669, %v367_v26 }
  0xdd   : > { %v323_v31 = vpop.f32.mrf.mxu0  ;;  %v369_v32 = vpop.f32.mrf.mxu1  ;;  %v672_v24 = vand.u32 %v532_v14, %v524_v23 }
  0xde   : > { %v469_v33 = vsel %vm468_vm2, %v464_v29, -inf  ;;  %v472_v38 = vsel %vm468_vm2, %v465_v30, -inf }
  0xdf   : > { %v867_v34 = vpop.f32.mrf.mxu1  ;;  %470 = vmax.xlane.f32.xlu0 %v469_v33  ;;  %v861_v35 = vpop.f32.mrf.mxu0 }
  0xe1   : > { %v412_v39 = vpop.f32.mrf.mxu0  ;;  %v458_v40 = vpop.f32.mrf.mxu1 }
  0xe2   : > { %v413_v41 = vadd.f32 %v412_v39, %v277_v36  ;;  %v459_v42 = vadd.f32 %v458_v40, %v278_v37 }
  0xe3   : > { %v878_v43 = vpop.f32.mrf.mxu1  ;;  %473 = vmax.xlane.f32.xlu0 %v472_v38  ;;  %v872_v44 = vpop.f32.mrf.mxu0 }
  0xe4   : > { %v466_v45 = vmul.f32 0.17677669, %v413_v41  ;;  %v467_v46 = vmul.f32 0.17677669, %v459_v42 }
  0xe5   : > { %v415_v47 = vpop.f32.mrf.mxu0  ;;  %v461_v48 = vpop.f32.mrf.mxu1 }
  0xe6   : > { %v475_v49 = vsel %vm468_vm2, %v466_v45, -inf  ;;  %v478_v52 = vsel %vm468_vm2, %v467_v46, -inf }
  0xe7   : > { %v879_v50 = vpop.f32.mrf.mxu1  ;;  %476 = vmax.xlane.f32.xlu1 %v475_v49  ;;  %v873_v51 = vpop.f32.mrf.mxu0 }
  0xeb   : > { %479 = vmax.xlane.f32.xlu1 %v478_v52 }
 0x168   : > { %v471_v53 = vpop.xlane.xlu0 %470 }
 0x169   : > { %v481_v54 = vsub.f32 %v464_v29, %v471_v53 }
 0x16b   : > { %v485_v55 = vmul.f32 1.442695, %v481_v54 }
 0x16c   : > { %v474_v56 = vpop.xlane.xlu0 %473 }
 0x16d   : > { %915 = vpow2.f32 %v485_v55  ;;  %v482_v57 = vsub.f32 %v465_v30, %v474_v56 }
 0x16f   : > { %v487_v58 = vmul.f32 1.442695, %v482_v57 }
 0x170   : > { %v477_v59 = vpop.xlane.xlu1 %476 }
 0x171   : > { %917 = vpow2.f32 %v487_v58  ;;  %v483_v60 = vsub.f32 %v466_v45, %v477_v59 }
 0x173   : > { %v489_v61 = vmul.f32 1.442695, %v483_v60 }
 0x174   : > { %v480_v62 = vpop.xlane.xlu1 %479 }
 0x175   : > { %919 = vpow2.f32 %v489_v61  ;;  %v484_v63 = vsub.f32 %v467_v46, %v480_v62 }
 0x177   : > { %v491_v1 = vmul.f32 1.442695, %v484_v63 }
 0x179   : > { %921 = vpow2.f32 %v491_v1 }
 0x17a   : > { %v916_v2 = vpop.eup %915 }
 0x17b   : > { %v493_v3 = vsel %vm468_vm2, %v916_v2, 0.0 }
 0x17c   : > { %494 = vadd.xlane.f32.xlu0 %v493_v3 }
 0x17e   : > { %v918_v4 = vpop.eup %917 }
 0x17f   : > { %v496_v5 = vsel %vm468_vm2, %v918_v4, 0.0 }
 0x180   : > { %497 = vadd.xlane.f32.xlu1 %v496_v5 }
 0x182   : > { %v920_v6 = vpop.eup %919 }
 0x183   : > { %v499_v7 = vsel %vm468_vm2, %v920_v6, 0.0 }
 0x184   : > { %500 = vadd.xlane.f32.xlu0 %v499_v7 }
 0x186   : > { %v922_v8 = vpop.eup %921 }
 0x187   : > { %v502_v9 = vsel %vm468_vm2, %v922_v8, 0.0 }
 0x188   : > { %503 = vadd.xlane.f32.xlu1 %v502_v9 }
 0x205   : > { %v495_v25 = vpop.xlane.xlu0 %494 }
 0x206   : > { %923 = vrcp.f32 %v495_v25 }
 0x209   : > { %v498_v26 = vpop.xlane.xlu1 %497 }
 0x20a   : > { %925 = vrcp.f32 %v498_v26 }
 0x20d   : > { %v501_v27 = vpop.xlane.xlu0 %500 }
 0x20e   : > { %927 = vrcp.f32 %v501_v27 }
 0x211   : > { %v504_v28 = vpop.xlane.xlu1 %503 }
 0x212   : > { %929 = vrcp.f32 %v504_v28 }
 0x213   : > { %v924_v29 = vpop.eup %923 }
 0x214   : > { %v509_v30 = vmul.f32 %v924_v29, %v916_v2 }
 0x216   : > { %v513_v31 = vpack.c.bf16 %v509_v30, %v509_v30 }
 0x217   : > { %v926_v32 = vpop.eup %925 }
 0x218   : > { %883 = vmatmul.mubr.msk.bf16.vlgmr.msra.gmra.mxu0 %vm525_vm5, %v513_v31  ;;  %v510_v33 = vmul.f32 %v926_v32, %v918_v4 }
 0x219   : > { %893 = vmatpush3.bf16.msra.mxu0 %v626_v21  ;;  %894 = vmatprep.mubr.msk.bf16.mxu0 %vm940_vm0, %v939_v0 }
 0x21a   : > { %v514_v34 = vpack.c.bf16 %v510_v33, %v510_v33 }
 0x21b   : > { %v928_v35 = vpop.eup %927 }
 0x21c   : > { %889 = vmatmul.mubr.msk.bf16.vlgmr.msra.gmra.mxu1 %vm525_vm5, %v514_v34  ;;  %v511_v36 = vmul.f32 %v928_v35, %v920_v6 }
 0x21d   : > { %899 = vmatpush3.bf16.msra.mxu1 %v672_v24  ;;  %900 = vmatprep.mubr.msk.bf16.mxu1 %vm940_vm0, %v939_v0 }
 0x21e   : > { %v515_v37 = vpack.c.bf16 %v511_v36, %v511_v36 }
 0x21f   : > { %v930_v38 = vpop.eup %929 }
 0x220   : > { %895 = vmatmul.mubr.msk.bf16.vlgmr.msra.gmra.mxu0 %vm525_vm5, %v515_v37  ;;  %v512_v39 = vmul.f32 %v930_v38, %v922_v8 }
 0x222   : > { %v516_v40 = vpack.c.bf16 %v512_v39, %v512_v39 }
 0x224   : > { %901 = vmatmul.mubr.msk.bf16.vlgmr.msra.gmra.mxu1 %vm525_vm5, %v516_v40 }
 0x2d8   : > { %v570_v41 = vpop.f32.mrf.mxu0 }
 0x2d9   : > { %715 = vst.msk [vmem:[%s257_s6] sm:$0x7f] %vm714_vm6, %v570_v41 }
 0x2da   : > { %v884_v42 = vpop.f32.mrf.mxu0 }
 0x2dc   : > { %v573_v43 = vpop.f32.mrf.mxu0  ;;  %v616_v44 = vpop.f32.mrf.mxu1 }
 0x2dd   : > { %716 = vst.msk [vmem:[%s257_s6 + $0x8] sm:$0x7f] %vm714_vm6, %v616_v44 }
 0x2de   : > { %v885_v0 = vpop.f32.mrf.mxu0  ;;  %v890_v45 = vpop.f32.mrf.mxu1 }
 0x2e0   : > { %v619_v46 = vpop.f32.mrf.mxu1  ;;  %v662_v47 = vpop.f32.mrf.mxu0 }
 0x2e1   : > { %717 = vst.msk [vmem:[%s257_s6 + $0x10] sm:$0x7f] %vm714_vm6, %v662_v47 }
 0x2e2   : > { %v891_v48 = vpop.f32.mrf.mxu1  ;;  %v896_v49 = vpop.f32.mrf.mxu0 }
 0x2e4   : > { %v665_v50 = vpop.f32.mrf.mxu0  ;;  %v708_v51 = vpop.f32.mrf.mxu1 }
 0x2e5   : > { %718 = vst.msk [vmem:[%s257_s6 + $0x18] sm:$0x7f] %vm714_vm6, %v708_v51 }
 0x2e6   : > { %v897_v52 = vpop.f32.mrf.mxu0  ;;  %v902_v53 = vpop.f32.mrf.mxu1 }
 0x2e8   : > { %v711_v54 = vpop.f32.mrf.mxu1 }
 0x2ea   : > { %v903_v55 = vpop.f32.mrf.mxu1 }
 0x2eb PF: > { %s14_s15 = sadd.s32 1, %s937_s15  }
 0x2ec   : > { %p11_p4 = scmp.ge.s32.totalorder %s14_s15, 4  }
 0x2ee   :  { %13 = sbr.rel (!%p11_p4) target bundleno = 1 (0x1), region = 75 }

// kernel: conformer_forward.31
= control target key start
LH: loop header
LB: loop body
LE: loop exit
PB: predicated region body
PF: predicated region fallthrough
CT: control target
= control target key end

     0   :  { %vm31_vm0 = vcmask 261120   ;;  %v251_v14 = vmov 0.0   ;;  %vm252_vm1 = vmmov 0   ;;  %s349_s0 = inlined_call_operand.vmem [shape: f32[16,32], index: 0, kind: input, shape index: {}]   ;;  %s350_s3 = inlined_call_operand.vmem [shape: f32[32,32], index: 3, kind: input, shape index: {}]   ;;  %s351_s5 = inlined_call_operand.vmem [shape: f32[32,32], index: 5, kind: input, shape index: {}]   ;;  %s352_s1 = inlined_call_operand.vmem [shape: f32[1,32], index: 1, kind: input, shape index: {}]   ;;  %s353_s2 = inlined_call_operand.vmem [shape: f32[1,32], index: 2, kind: input, shape index: {}]   ;;  %s354_s6 = inlined_call_operand.vmem [shape: f32[1,32], index: 6, kind: input, shape index: {}]   ;;  %s355_s4 = inlined_call_operand.vmem [shape: f32[1,32], index: 4, kind: input, shape index: {}]   ;;  %s356_s7 = inlined_call_operand.vmem [shape: f32[16,32], index: 7, kind: output, shape index: {}]  }
   0x1   :  { %v27_v0 = vld [vmem:[%s349_s0] sm:$0xff]  ;;  %v28_v1 = vld [vmem:[%s349_s0 + $0x8] sm:$0xff]  ;;  %221 = vmatprep.subr.bf16.mxu0 %v251_v14  ;;  %229 = vmatprep.subr.bf16.mxu1 %v251_v14  ;;  %v77_v15 = vld [vmem:[%s350_s3 + $0x10] sm:$0xff] }
   0x2   :  { %v32_v2 = vsel %vm31_vm0, %v27_v0, 0.0  ;;  %v35_v3 = vsel %vm31_vm0, %v28_v1, 0.0  ;;  %v78_v16 = vld [vmem:[%s350_s3 + $0x18] sm:$0xff]  ;;  %v135_v17 = vld [vmem:[%s351_s5 + $0x10] sm:$0xff]  ;;  %v75_v20 = vld [vmem:[%s350_s3] sm:$0xff]  ;;  %225 = vmatprep.mubr.msk.bf16.mxu0 %vm252_vm1, %v251_v14  ;;  %233 = vmatprep.mubr.msk.bf16.mxu1 %vm252_vm1, %v251_v14 }
   0x3   :  { %33 = vadd.xlane.f32.xlu0 %v32_v2  ;;  %v81_v18 = vpack.c.bf16 %v78_v16, %v77_v15  ;;  %v136_v19 = vld [vmem:[%s351_s5 + $0x18] sm:$0xff]  ;;  %v76_v21 = vld [vmem:[%s350_s3 + $0x8] sm:$0xff]  ;;  %v133_v23 = vld [vmem:[%s351_s5] sm:$0xff] }
   0x4   :  { %v138_v22 = vpack.c.bf16 %v136_v19, %v135_v17  ;;  %v134_v24 = vld [vmem:[%s351_s5 + $0x8] sm:$0xff]  ;;  %v80_v25 = vpack.c.bf16 %v76_v21, %v75_v20  ;;  %v207_v35 = vld [vmem:[%s352_s1] ss:$0 sm:$0xff] }
   0x5   :  { %222 = vmatpush3.bf16.msra.mxu0 %v81_v18  ;;  %v137_v26 = vpack.c.bf16 %v134_v24, %v133_v23  ;;  %v208_v39 = vld [vmem:[%s353_s2] ss:$0 sm:$0xff] }
   0x6   :  { %230 = vmatpush3.bf16.msra.mxu1 %v138_v22  ;;  %223 = vmatprep.subr.bf16.mxu0 %v251_v14  ;;  %v211_v44 = vld [vmem:[%s354_s6] ss:$0 sm:$0xff] }
   0x7   :  { %36 = vadd.xlane.f32.xlu0 %v35_v3  ;;  %231 = vmatprep.subr.bf16.mxu1 %v251_v14  ;;  %v209_v61 = vld [vmem:[%s355_s4] ss:$0 sm:$0xff] }
   0x9   :  { %224 = vmatpush3.bf16.msra.mxu0 %v80_v25 }
   0xa   :  { %232 = vmatpush3.bf16.msra.mxu1 %v137_v26 }
  0x8c   :  { %v34_v4 = vpop.xlane.xlu0 %33 }
  0x8d   :  { %v39_v5 = vmul.f32 0.03125, %v34_v4 }
  0x8f   :  { %v41_v6 = vsub.f32 %v27_v0, %v39_v5 }
  0x90   :  { %v37_v7 = vpop.xlane.xlu0 %36 }
  0x91   :  { %v40_v8 = vmul.f32 0.03125, %v37_v7  ;;  %v43_v9 = vmul.f32 %v41_v6, %v41_v6 }
  0x93   :  { %v42_v10 = vsub.f32 %v28_v1, %v40_v8  ;;  %v45_v11 = vsel %vm31_vm0, %v43_v9, 0.0 }
  0x94   :  { %46 = vadd.xlane.f32.xlu1 %v45_v11 }
  0x95   :  { %v44_v12 = vmul.f32 %v42_v10, %v42_v10 }
  0x97   :  { %v48_v13 = vsel %vm31_vm0, %v44_v12, 0.0 }
  0x98   :  { %49 = vadd.xlane.f32.xlu1 %v48_v13 }
 0x11d   :  { %v47_v27 = vpop.xlane.xlu1 %46 }
 0x11e   :  { %v51_v28 = vmul.f32 0.03125, %v47_v27 }
 0x120   :  { %v53_v29 = vadd.f32 1e-05, %v51_v28 }
 0x121   :  { %v50_v30 = vpop.xlane.xlu1 %49 }
 0x122   :  { %239 = vrsqrt.f32 %v53_v29  ;;  %v52_v31 = vmul.f32 0.03125, %v50_v30 }
 0x124   :  { %v54_v32 = vadd.f32 1e-05, %v52_v31 }
 0x126   :  { %241 = vrsqrt.f32 %v54_v32 }
 0x12f   :  { %v240_v33 = vpop.eup %239 }
 0x130   :  { %v57_v34 = vmul.f32 %v240_v33, %v41_v6 }
 0x132   :  { %v65_v38 = vmul.f32 %v207_v35, %v57_v34 }
 0x133   :  { %v242_v36 = vpop.eup %241 }
 0x134   :  { %v58_v37 = vmul.f32 %v242_v36, %v42_v10  ;;  %v73_v41 = vadd.f32 %v208_v39, %v65_v38 }
 0x136   :  { %v66_v40 = vmul.f32 %v207_v35, %v58_v37 }
 0x138   :  { %v74_v42 = vadd.f32 %v208_v39, %v66_v40 }
 0x13a   :  { %v79_v43 = vpack.c.bf16 %v74_v42, %v73_v41 }
 0x13c   :  { %226 = vmatmul.mubr.msk.bf16.vlgmr.msra.gmra.mxu0 %vm31_vm0, %v79_v43  ;;  %234 = vmatmul.mubr.msk.bf16.vlgmr.msra.gmra.mxu1 %vm31_vm0, %v79_v43 }
 0x1fc   :  { %v126_v45 = vpop.f32.mrf.mxu0  ;;  %v180_v46 = vpop.f32.mrf.mxu1 }
 0x1fd   :  { %v181_v47 = vadd.f32 %v211_v44, %v180_v46  ;;  %v127_v62 = vadd.f32 %v209_v61, %v126_v45 }
 0x1fe   :  { %v227_v48 = vpop.f32.mrf.mxu0  ;;  %v235_v49 = vpop.f32.mrf.mxu1 }
 0x1ff   :  { %v213_v50 = vmul.f32 -1.442695, %v181_v47 }
 0x200   :  { %v129_v51 = vpop.f32.mrf.mxu0  ;;  %v183_v52 = vpop.f32.mrf.mxu1 }
 0x201   :  { %243 = vpow2.f32 %v213_v50  ;;  %v184_v53 = vadd.f32 %v211_v44, %v183_v52  ;;  %v130_v1 = vadd.f32 %v209_v61, %v129_v51 }
 0x202   :  { %v228_v54 = vpop.f32.mrf.mxu0  ;;  %v236_v55 = vpop.f32.mrf.mxu1 }
 0x203   :  { %v214_v56 = vmul.f32 -1.442695, %v184_v53 }
 0x205   :  { %245 = vpow2.f32 %v214_v56 }
 0x20e   :  { %v244_v57 = vpop.eup %243 }
 0x20f   :  { %v193_v58 = vadd.f32 1.0, %v244_v57 }
 0x211   :  { %247 = vrcp.f32 %v193_v58 }
 0x212   :  { %v246_v59 = vpop.eup %245 }
 0x213   :  { %v194_v60 = vadd.f32 1.0, %v246_v59 }
 0x215   :  { %249 = vrcp.f32 %v194_v60 }
 0x21e   :  { %v248_v63 = vpop.eup %247 }
 0x21f   :  { %v199_v0 = vmul.f32 %v248_v63, %v127_v62 }
 0x221   :  { %201 = vst.msk [vmem:[%s356_s7] sm:$0xff] %vm31_vm0, %v199_v0 }
 0x222   :  { %v250_v2 = vpop.eup %249 }
 0x223   :  { %v200_v3 = vmul.f32 %v250_v2, %v130_v1 }
 0x225   :  { %202 = vst.msk [vmem:[%s356_s7 + $0x8] sm:$0xff] %vm31_vm0, %v200_v3 }

// kernel: conformer_forward.32
= control target key start
LH: loop header
LB: loop body
LE: loop exit
PB: predicated region body
PF: predicated region fallthrough
CT: control target
= control target key end

     0   :  { %s625_s24 = smov 0   ;;  %s675_s0 = inlined_call_operand.vmem [shape: f32[2,13,32], index: 0, kind: input, shape index: {}]   ;;  %s676_s1 = inlined_call_operand.vmem [shape: f32[2,7,32], index: 1, kind: input, shape index: {}]   ;;  %s677_s2 = inlined_call_operand.vmem [shape: f32[7,32], index: 2, kind: input, shape index: {}]   ;;  %s678_s3 = inlined_call_operand.vmem [shape: f32[1,32], index: 3, kind: input, shape index: {}]   ;;  %s679_s4 = inlined_call_operand.vmem [shape: f32[1,32], index: 4, kind: input, shape index: {}]   ;;  %s680_s5 = inlined_call_operand.vmem [shape: f32[32,32], index: 5, kind: input, shape index: {}]   ;;  %s681_s6 = inlined_call_operand.vmem [shape: f32[1,32], index: 6, kind: input, shape index: {}]   ;;  %s682_s7 = inlined_call_operand.vmem [shape: f32[2,7,32], index: 7, kind: output, shape index: {}]  }
   0x1 LB: > { %s533_s25 = sadd.s32 4294967295, %s581_s24   ;;  %p537_p0 = scmp.ge.s32.totalorder %s581_s24, 1  ;;  %s581_s24 = sphi %s625_s24, %s17_s24  }
   0x2   : > { %p246_p1 = scmp.lt.s32.totalorder %s581_s24, 3 }
   0x4   : > { %p247_p2 = pnand %p537_p0, %p246_p1 }
   0x5   : > { %p281_p3 = scmp.lt.s32.totalorder (!%p247_p2), %s533_s25, 1 }
   0x6   : > { %250 = sbr.rel (%p247_p2) target bundleno = 274 (0x112), region = 48 }
   0xb   : > { %v408_v0 = vld [vmem:[%s680_s5 + $0x10] sm:$0xff]  ;;  %v409_v1 = vld [vmem:[%s680_s5 + $0x18] sm:$0xff]  ;;  %v406_v2 = vld [vmem:[%s680_s5] sm:$0xff]  ;;  %v298_v3 = vlaneseq  ;;  %v583_v4 = vmov 0.0   ;;  %vm584_vm0 = vmmov 0   ;;  %s684_s25 = smov (!%p281_p3, %s533_s25), 1 }
   0xc   : > { %553 = vmatprep.subr.bf16.mxu0 %v583_v4  ;;  %v412_v5 = vpack.c.bf16 %v409_v1, %v408_v0  ;;  %v407_v6 = vld [vmem:[%s680_s5 + $0x8] sm:$0xff]  ;;  %557 = vmatprep.mubr.msk.bf16.mxu0 %vm584_vm0, %v583_v4  ;;  %v297_v9 = vld [vmem:[%s677_s2] sm:$0x7f]  ;;  %s549_s13 = sshll.u32 %s684_s25, 4  ;;  %vm320_vm1 = vcmask 1045504   ;;  %vm334_vm2 = vcmask 1044480  }
   0xd   : > { %v299_v7 = vshrl.u32 %v298_v3, 7  ;;  %v411_v8 = vpack.c.bf16 %v407_v6, %v406_v2  ;;  %s285_s16 = scalar_lea.vmem %s675_s0, %s549_s13  ;;  %vm348_vm3 = vcmask 1043456   ;;  %vm362_vm4 = vcmask 1042432   ;;  %v542_v59 = vld [vmem:[%s678_s3] ss:$0 sm:$0xff]  ;;  %s540_s21 = sshll.u32 %s684_s25, 3 }
   0xe   : > { %554 = vmatpush3.bf16.msra.mxu0 %v412_v5  ;;  %v295_v17 = vld [vmem:[%s285_s16] sm:$0xff]  ;;  %v296_v18 = vld [vmem:[%s285_s16 + $0x8] sm:$0x1f]  ;;  %vm376_vm5 = vcmask 1041408   ;;  %vm413_vm6 = vcmask 261120   ;;  %s289_s26 = scalar_lea.vmem %s676_s1, %s540_s21  ;;  %s293_s8 = scalar_lea.vmem %s682_s7, %s540_s21  ;;  %vm466_vm7 = vcmask 260096  }
   0xf   : > { %555 = vmatprep.subr.bf16.mxu0 %v583_v4  ;;  %v300_v10 = vsub.s32 0, %v299_v7  ;;  %v305_v11 = vsub.s32 1, %v299_v7  ;;  %v314_v12 = vsub.s32 2, %v299_v7  ;;  %v328_v13 = vsub.s32 3, %v299_v7  ;;  %v543_v61 = vld [vmem:[%s679_s4] ss:$0 sm:$0xff] }
  0x10   : > { %v342_v14 = vsub.s32 4, %v299_v7  ;;  %v356_v15 = vsub.s32 5, %v299_v7  ;;  %v370_v16 = vsub.s32 6, %v299_v7  ;;  %v405_v6 = vld [vmem:[%s289_s26] sm:$0x7f] }
  0x11   : > { %v301_v19 = vrot.slane %v297_v9, %v300_v10  ;;  %v306_v20 = vrot.slane %v297_v9, %v305_v11  ;;  %v315_v21 = vrot.slane %v297_v9, %v314_v12  ;;  %v329_v22 = vrot.slane %v297_v9, %v328_v13 }
  0x12   : > { %556 = vmatpush3.bf16.msra.mxu0 %v411_v8  ;;  %v343_v23 = vrot.slane %v297_v9, %v342_v14  ;;  %v357_v24 = vrot.slane %v297_v9, %v356_v15  ;;  %v371_v25 = vrot.slane %v297_v9, %v370_v16  ;;  %v546_v8 = vld [vmem:[%s681_s6] ss:$0 sm:$0xff] }
  0x13   : > { %v302_v26 = vmul.f32 %v301_v19, %v295_v17  ;;  %v307_v27 = vmul.f32 %v306_v20, %v295_v17  ;;  %v316_v28 = vmul.f32 %v315_v21, %v295_v17  ;;  %v317_v29 = vmul.f32 %v315_v21, %v296_v18 }
  0x14   : > { %v330_v30 = vmul.f32 %v329_v22, %v295_v17  ;;  %v331_v31 = vmul.f32 %v329_v22, %v296_v18  ;;  %v344_v32 = vmul.f32 %v343_v23, %v295_v17  ;;  %v345_v33 = vmul.f32 %v343_v23, %v296_v18 }
  0x15   : > { %v309_v34 = vrot.slane %v307_v27, 1  ;;  %v321_v35 = vrot.slane %v316_v28, 2  ;;  %v322_v36 = vrot.slane %v317_v29, 2  ;;  %v358_v37 = vmul.f32 %v357_v24, %v295_v17 }
  0x16   : > { %v335_v38 = vrot.slane %v330_v30, 3  ;;  %v336_v39 = vrot.slane %v331_v31, 3  ;;  %v349_v40 = vrot.slane %v344_v32, 4  ;;  %v350_v41 = vrot.slane %v345_v33, 4 }
  0x17   : > { %v311_v42 = vadd.f32 %v309_v34, %v302_v26  ;;  %v323_v43 = vsel %vm320_vm1, %v321_v35, %v322_v36  ;;  %v359_v44 = vmul.f32 %v357_v24, %v296_v18  ;;  %v363_v46 = vrot.slane %v358_v37, 5 }
  0x18   : > { %v337_v45 = vsel %vm334_vm2, %v335_v38, %v336_v39  ;;  %v372_v47 = vmul.f32 %v371_v25, %v295_v17  ;;  %v373_v48 = vmul.f32 %v371_v25, %v296_v18  ;;  %v351_v51 = vsel %vm348_vm3, %v349_v40, %v350_v41 }
  0x19   : > { %v325_v49 = vadd.f32 %v323_v43, %v311_v42  ;;  %v364_v50 = vrot.slane %v359_v44, 5 }
  0x1a   : > { %v377_v52 = vrot.slane %v372_v47, 6  ;;  %v378_v53 = vrot.slane %v373_v48, 6 }
  0x1b   : > { %v339_v54 = vadd.f32 %v337_v45, %v325_v49  ;;  %v365_v55 = vsel %vm362_vm4, %v363_v46, %v364_v50 }
  0x1c   : > { %v379_v57 = vsel %vm376_vm5, %v377_v52, %v378_v53 }
  0x1d   : > { %v353_v56 = vadd.f32 %v351_v51, %v339_v54 }
  0x1f   : > { %v367_v58 = vadd.f32 %v365_v55, %v353_v56 }
  0x21   : > { %v381_v60 = vadd.f32 %v379_v57, %v367_v58 }
  0x23   : > { %v389_v62 = vmul.f32 %v542_v59, %v381_v60 }
  0x25   : > { %v397_v63 = vadd.f32 %v543_v61, %v389_v62 }
  0x27   : > { %v544_v0 = vmul.f32 -1.442695, %v397_v63 }
  0x29   : > { %571 = vpow2.f32 %v544_v0 }
  0x36   : > { %v572_v1 = vpop.eup %571 }
  0x37   : > { %v401_v2 = vadd.f32 1.0, %v572_v1 }
  0x39   : > { %573 = vrcp.f32 %v401_v2 }
  0x46   : > { %v574_v3 = vpop.eup %573 }
  0x47   : > { %v404_v4 = vmul.f32 %v574_v3, %v397_v63 }
  0x49   : > { %v410_v5 = vpack.c.bf16 %v404_v4, %v404_v4 }
  0x4b   : > { %558 = vmatmul.mubr.msk.bf16.vlgmr.msra.gmra.mxu0 %vm413_vm6, %v410_v5 }
 0x10b   : > { %v451_v7 = vpop.f32.mrf.mxu0 }
 0x10c   : > { %v457_v9 = vadd.f32 %v451_v7, %v405_v6 }
 0x10d   : > { %v559_v10 = vpop.f32.mrf.mxu0 }
 0x10e   : > { %v465_v11 = vadd.f32 %v546_v8, %v457_v9 }
 0x10f   : > { %v454_v12 = vpop.f32.mrf.mxu0 }
 0x110   : > { %467 = vst.msk [vmem:[%s293_s8] sm:$0x7f] %vm466_vm7, %v465_v11 }
 0x111   : > { %v560_v13 = vpop.f32.mrf.mxu0 }
 0x112 PF: > { %s17_s24 = sadd.s32 1, %s581_s24  }
 0x113   : > { %p14_p4 = scmp.ge.s32.totalorder %s17_s24, 4  }
 0x115   :  { %16 = sbr.rel (!%p14_p4) target bundleno = 1 (0x1), region = 81 }

// kernel: conformer_forward.33
= control target key start
LH: loop header
LB: loop body
LE: loop exit
PB: predicated region body
PF: predicated region fallthrough
CT: control target
= control target key end

     0   :  { %vm59_vm0 = vcmask 261120   ;;  %v347_v14 = vmov 0.0   ;;  %vm348_vm1 = vmmov 0   ;;  %s522_s0 = inlined_call_operand.vmem [shape: f32[16,32], index: 0, kind: input, shape index: {}]   ;;  %s523_s3 = inlined_call_operand.vmem [shape: f32[32,128], index: 3, kind: input, shape index: {}]   ;;  %s524_s1 = inlined_call_operand.vmem [shape: f32[1,32], index: 1, kind: input, shape index: {}]   ;;  %s525_s2 = inlined_call_operand.vmem [shape: f32[1,32], index: 2, kind: input, shape index: {}]   ;;  %s526_s5 = inlined_call_operand.vmem [shape: f32[128,32], index: 5, kind: input, shape index: {}]   ;;  %s527_s4 = inlined_call_operand.vmem [shape: f32[1,128], index: 4, kind: input, shape index: {}]   ;;  %s528_s6 = inlined_call_operand.vmem [shape: f32[1,32], index: 6, kind: input, shape index: {}]   ;;  %s529_s7 = inlined_call_operand.vmem [shape: f32[1,32], index: 7, kind: input, shape index: {}]   ;;  %s530_s8 = inlined_call_operand.vmem [shape: f32[1,32], index: 8, kind: input, shape index: {}]   ;;  %s531_s9 = inlined_call_operand.vmem [shape: f32[16,32], index: 9, kind: output, shape index: {}]  }
   0x1   :  { %v402_v0 = vld [vmem:[%s522_s0] sm:$0xff]  ;;  %v407_v1 = vld [vmem:[%s522_s0 + $0x8] sm:$0xff]  ;;  %301 = vmatprep.subr.bf16.mxu0 %v347_v14  ;;  %v39_v15 = vld [vmem:[%s523_s3 + $0x10] sm:$0xff]  ;;  %305 = vmatprep.mubr.msk.bf16.mxu0 %vm348_vm1, %v347_v14 }
   0x2   :  { %v60_v2 = vsel %vm59_vm0, %v402_v0, 0.0  ;;  %v63_v3 = vsel %vm59_vm0, %v407_v1, 0.0  ;;  %v40_v16 = vld [vmem:[%s523_s3 + $0x18] sm:$0xff]  ;;  %v37_v17 = vld [vmem:[%s523_s3] sm:$0xff]  ;;  %v38_v19 = vld [vmem:[%s523_s3 + $0x8] sm:$0xff]  ;;  %309 = vmatprep.subr.bf16.mxu1 %v347_v14  ;;  %325 = vmatprep.mubr.msk.bf16.mxu1 %vm348_vm1, %v347_v14 }
   0x3   :  { %61 = vadd.xlane.f32.xlu0 %v60_v2  ;;  %v105_v18 = vpack.c.bf16 %v40_v16, %v39_v15  ;;  %v104_v20 = vpack.c.bf16 %v38_v19, %v37_v17  ;;  %v280_v29 = vld [vmem:[%s524_s1] ss:$0 sm:$0xff]  ;;  %v56_v38 = vld [vmem:[%s526_s5 + $0x70] sm:$0xff]  ;;  %v57_v39 = vld [vmem:[%s526_s5 + $0x78] sm:$0xff] }
   0x4   :  { %v281_v33 = vld [vmem:[%s525_s2] ss:$0 sm:$0xff]  ;;  %v178_v40 = vpack.c.bf16 %v57_v39, %v56_v38  ;;  %v55_v42 = vld [vmem:[%s526_s5 + $0x68] sm:$0xff]  ;;  %v52_v44 = vld [vmem:[%s526_s5 + $0x50] sm:$0xff] }
   0x5   :  { %302 = vmatpush3.bf16.msra.mxu0 %v105_v18  ;;  %v54_v41 = vld [vmem:[%s526_s5 + $0x60] sm:$0xff]  ;;  %v53_v45 = vld [vmem:[%s526_s5 + $0x58] sm:$0xff]  ;;  %v51_v48 = vld [vmem:[%s526_s5 + $0x48] sm:$0xff] }
   0x6   :  { %303 = vmatprep.subr.bf16.mxu0 %v347_v14  ;;  %310 = vmatpush3.bf16.msra.mxu1 %v178_v40  ;;  %v177_v43 = vpack.c.bf16 %v55_v42, %v54_v41  ;;  %v176_v46 = vpack.c.bf16 %v53_v45, %v52_v44  ;;  %v50_v47 = vld [vmem:[%s526_s5 + $0x40] sm:$0xff]  ;;  %v48_v50 = vld [vmem:[%s526_s5 + $0x30] sm:$0xff]  ;;  %v49_v51 = vld [vmem:[%s526_s5 + $0x38] sm:$0xff] }
   0x7   :  { %64 = vadd.xlane.f32.xlu0 %v63_v3  ;;  %311 = vmatprep.subr.bf16.mxu1 %v347_v14  ;;  %v175_v49 = vpack.c.bf16 %v51_v48, %v50_v47  ;;  %v174_v52 = vpack.c.bf16 %v49_v51, %v48_v50  ;;  %v46_v53 = vld [vmem:[%s526_s5 + $0x20] sm:$0xff]  ;;  %v47_v54 = vld [vmem:[%s526_s5 + $0x28] sm:$0xff]  ;;  %v44_v56 = vld [vmem:[%s526_s5 + $0x10] sm:$0xff] }
   0x8   :  { %v173_v55 = vpack.c.bf16 %v47_v54, %v46_v53  ;;  %v45_v57 = vld [vmem:[%s526_s5 + $0x18] sm:$0xff]  ;;  %v42_v59 = vld [vmem:[%s526_s5] sm:$0xff]  ;;  %v43_v60 = vld [vmem:[%s526_s5 + $0x8] sm:$0xff] }
   0x9   :  { %304 = vmatpush3.bf16.msra.mxu0 %v104_v20  ;;  %v172_v58 = vpack.c.bf16 %v45_v57, %v44_v56  ;;  %v171_v61 = vpack.c.bf16 %v43_v60, %v42_v59  ;;  %v282_v62 = vld [vmem:[%s527_s4] ss:$0 sm:$0xff] }
   0xa   :  { %312 = vmatpush3.bf16.msra.mxu1 %v177_v43  ;;  %v286_v18 = vld [vmem:[%s528_s6] ss:$0 sm:$0xff] }
   0xb   :  { %313 = vmatprep.subr.bf16.mxu1 %v347_v14  ;;  %v288_v48 = vld [vmem:[%s530_s8] ss:$0 sm:$0xff] }
   0xe   :  { %314 = vmatpush3.bf16.msra.mxu1 %v176_v46  ;;  %v287_v46 = vld [vmem:[%s529_s7] ss:$0 sm:$0xff] }
   0xf   :  { %315 = vmatprep.subr.bf16.mxu1 %v347_v14 }
  0x12   :  { %316 = vmatpush3.bf16.msra.mxu1 %v175_v49 }
  0x13   :  { %317 = vmatprep.subr.bf16.mxu1 %v347_v14 }
  0x16   :  { %318 = vmatpush3.bf16.msra.mxu1 %v174_v52 }
  0x17   :  { %319 = vmatprep.subr.bf16.mxu1 %v347_v14 }
  0x1a   :  { %320 = vmatpush3.bf16.msra.mxu1 %v173_v55 }
  0x1b   :  { %321 = vmatprep.subr.bf16.mxu1 %v347_v14 }
  0x1e   :  { %322 = vmatpush3.bf16.msra.mxu1 %v172_v58 }
  0x1f   :  { %323 = vmatprep.subr.bf16.mxu1 %v347_v14 }
  0x22   :  { %324 = vmatpush3.bf16.msra.mxu1 %v171_v61 }
  0x8c   :  { %v62_v4 = vpop.xlane.xlu0 %61 }
  0x8d   :  { %v67_v5 = vmul.f32 0.03125, %v62_v4 }
  0x8f   :  { %v69_v6 = vsub.f32 %v402_v0, %v67_v5 }
  0x90   :  { %v65_v7 = vpop.xlane.xlu0 %64 }
  0x91   :  { %v68_v8 = vmul.f32 0.03125, %v65_v7  ;;  %v71_v9 = vmul.f32 %v69_v6, %v69_v6 }
  0x93   :  { %v70_v10 = vsub.f32 %v407_v1, %v68_v8  ;;  %v73_v11 = vsel %vm59_vm0, %v71_v9, 0.0 }
  0x94   :  { %74 = vadd.xlane.f32.xlu1 %v73_v11 }
  0x95   :  { %v72_v12 = vmul.f32 %v70_v10, %v70_v10 }
  0x97   :  { %v76_v13 = vsel %vm59_vm0, %v72_v12, 0.0 }
  0x98   :  { %77 = vadd.xlane.f32.xlu1 %v76_v13 }
 0x11d   :  { %v75_v21 = vpop.xlane.xlu1 %74 }
 0x11e   :  { %v79_v22 = vmul.f32 0.03125, %v75_v21 }
 0x120   :  { %v81_v23 = vadd.f32 1e-05, %v79_v22 }
 0x121   :  { %v78_v24 = vpop.xlane.xlu1 %77 }
 0x122   :  { %331 = vrsqrt.f32 %v81_v23  ;;  %v80_v25 = vmul.f32 0.03125, %v78_v24 }
 0x124   :  { %v82_v26 = vadd.f32 1e-05, %v80_v25 }
 0x126   :  { %333 = vrsqrt.f32 %v82_v26 }
 0x12f   :  { %v332_v27 = vpop.eup %331 }
 0x130   :  { %v85_v28 = vmul.f32 %v332_v27, %v69_v6 }
 0x132   :  { %v93_v32 = vmul.f32 %v280_v29, %v85_v28 }
 0x133   :  { %v334_v30 = vpop.eup %333 }
 0x134   :  { %v86_v31 = vmul.f32 %v334_v30, %v70_v10  ;;  %v101_v35 = vadd.f32 %v281_v33, %v93_v32 }
 0x136   :  { %v94_v34 = vmul.f32 %v280_v29, %v86_v31 }
 0x138   :  { %v102_v36 = vadd.f32 %v281_v33, %v94_v34 }
 0x13a   :  { %v103_v37 = vpack.c.bf16 %v102_v36, %v101_v35 }
 0x13c   :  { %306 = vmatmul.mubr.msk.bf16.vlgmr.msra.gmra.mxu0 %vm59_vm0, %v103_v37 }
 0x1fc   :  { %v149_v63 = vpop.f32.mrf.mxu0 }
 0x1fd   :  { %v150_v2 = vadd.f32 %v282_v62, %v149_v63 }
 0x1fe   :  { %v307_v3 = vpop.f32.mrf.mxu0 }
 0x1ff   :  { %v284_v4 = vmul.f32 -1.442695, %v150_v2 }
 0x200   :  { %v152_v5 = vpop.f32.mrf.mxu0 }
 0x201   :  { %335 = vpow2.f32 %v284_v4  ;;  %v153_v6 = vadd.f32 %v282_v62, %v152_v5 }
 0x202   :  { %v308_v7 = vpop.f32.mrf.mxu0 }
 0x203   :  { %v285_v8 = vmul.f32 -1.442695, %v153_v6 }
 0x205   :  { %337 = vpow2.f32 %v285_v8 }
 0x20e   :  { %v336_v9 = vpop.eup %335 }
 0x20f   :  { %v162_v10 = vadd.f32 1.0, %v336_v9 }
 0x211   :  { %339 = vrcp.f32 %v162_v10 }
 0x212   :  { %v338_v11 = vpop.eup %337 }
 0x213   :  { %v163_v12 = vadd.f32 1.0, %v338_v11 }
 0x215   :  { %341 = vrcp.f32 %v163_v12 }
 0x21e   :  { %v340_v13 = vpop.eup %339 }
 0x21f   :  { %v168_v15 = vmul.f32 %v340_v13, %v150_v2 }
 0x222   :  { %v342_v14 = vpop.eup %341 }
 0x223   :  { %v169_v16 = vmul.f32 %v342_v14, %v153_v6 }
 0x225   :  { %v170_v17 = vpack.c.bf16 %v169_v16, %v168_v15 }
 0x227   :  { %326 = vmatmul.mubr.bf16.vlgmr.msra.gmra.mxu1 %v170_v17 }
 0x2e7   :  { %v219_v19 = vpop.f32.mrf.mxu1 }
 0x2e8   :  { %v220_v20 = vadd.f32 %v286_v18, %v219_v19 }
 0x2e9   :  { %v327_v21 = vpop.f32.mrf.mxu1 }
 0x2ea   :  { %v226_v22 = vmul.f32 0.5, %v220_v20 }
 0x2eb   :  { %v222_v23 = vpop.f32.mrf.mxu1 }
 0x2ec   :  { %v223_v24 = vadd.f32 %v286_v18, %v222_v23  ;;  %v228_v25 = vadd.f32 %v226_v22, %v402_v0 }
 0x2ed   :  { %v328_v26 = vpop.f32.mrf.mxu1 }
 0x2ee   :  { %v227_v27 = vmul.f32 0.5, %v223_v24  ;;  %v232_v28 = vsel %vm59_vm0, %v228_v25, 0.0 }
 0x2ef   :  { %233 = vadd.xlane.f32.xlu0 %v232_v28 }
 0x2f0   :  { %v229_v29 = vadd.f32 %v227_v27, %v407_v1 }
 0x2f2   :  { %v235_v30 = vsel %vm59_vm0, %v229_v29, 0.0 }
 0x2f3   :  { %236 = vadd.xlane.f32.xlu1 %v235_v30 }
 0x378   :  { %v234_v31 = vpop.xlane.xlu0 %233 }
 0x379   :  { %v238_v32 = vmul.f32 0.03125, %v234_v31 }
 0x37b   :  { %v240_v33 = vsub.f32 %v228_v25, %v238_v32 }
 0x37c   :  { %v237_v34 = vpop.xlane.xlu1 %236 }
 0x37d   :  { %v239_v35 = vmul.f32 0.03125, %v237_v34  ;;  %v242_v36 = vmul.f32 %v240_v33, %v240_v33 }
 0x37f   :  { %v241_v37 = vsub.f32 %v229_v29, %v239_v35  ;;  %v244_v38 = vsel %vm59_vm0, %v242_v36, 0.0 }
 0x380   :  { %245 = vadd.xlane.f32.xlu0 %v244_v38 }
 0x381   :  { %v243_v0 = vmul.f32 %v241_v37, %v241_v37 }
 0x383   :  { %v247_v39 = vsel %vm59_vm0, %v243_v0, 0.0 }
 0x384   :  { %248 = vadd.xlane.f32.xlu1 %v247_v39 }
 0x409   :  { %v246_v40 = vpop.xlane.xlu0 %245 }
 0x40a   :  { %v250_v41 = vmul.f32 0.03125, %v246_v40 }
 0x40c   :  { %v252_v1 = vadd.f32 1e-05, %v250_v41 }
 0x40d   :  { %v249_v42 = vpop.xlane.xlu1 %248 }
 0x40e   :  { %343 = vrsqrt.f32 %v252_v1  ;;  %v251_v43 = vmul.f32 0.03125, %v249_v42 }
 0x410   :  { %v253_v44 = vadd.f32 1e-05, %v251_v43 }
 0x412   :  { %345 = vrsqrt.f32 %v253_v44 }
 0x41b   :  { %v344_v45 = vpop.eup %343 }
 0x41c   :  { %v256_v47 = vmul.f32 %v344_v45, %v240_v33 }
 0x41e   :  { %v264_v49 = vmul.f32 %v287_v46, %v256_v47 }
 0x41f   :  { %v346_v50 = vpop.eup %345 }
 0x420   :  { %v272_v51 = vadd.f32 %v288_v48, %v264_v49  ;;  %v257_v52 = vmul.f32 %v346_v50, %v241_v37 }
 0x422   :  { %274 = vst.msk [vmem:[%s531_s9] sm:$0xff] %vm59_vm0, %v272_v51  ;;  %v265_v53 = vmul.f32 %v287_v46, %v257_v52 }
 0x424   :  { %v273_v54 = vadd.f32 %v288_v48, %v265_v53 }
 0x426   :  { %275 = vst.msk [vmem:[%s531_s9 + $0x8] sm:$0xff] %vm59_vm0, %v273_v54 }

// kernel: conformer_forward.43
= control target key start
LH: loop header
LB: loop body
LE: loop exit
PB: predicated region body
PF: predicated region fallthrough
CT: control target
= control target key end

     0   :  { %v119_v0 = vmov 0.0   ;;  %vm120_vm0 = vmmov 0   ;;  %vm21_vm1 = vcmask 261120   ;;  %v66_v10 = vlaneseq  ;;  %s160_s1 = inlined_call_operand.vmem [shape: f32[32,128], index: 1, kind: input, shape index: {}]   ;;  %s161_s0 = inlined_call_operand.vmem [shape: f32[16,32], index: 0, kind: input, shape index: {}]   ;;  %s162_s2 = inlined_call_operand.vmem [shape: f32[16,128], index: 2, kind: output, shape index: {}]  }
   0x1   :  { %101 = vmatprep.subr.bf16.mxu0 %v119_v0  ;;  %v16_v1 = vld [vmem:[%s160_s1 + $0x10] sm:$0xff]  ;;  %v17_v2 = vld [vmem:[%s160_s1 + $0x18] sm:$0xff]  ;;  %v14_v3 = vld [vmem:[%s160_s1] sm:$0xff]  ;;  %105 = vmatprep.mubr.msk.bf16.mxu0 %vm120_vm0, %v119_v0 }
   0x2   :  { %v20_v4 = vpack.c.bf16 %v17_v2, %v16_v1  ;;  %v15_v5 = vld [vmem:[%s160_s1 + $0x8] sm:$0xff]  ;;  %v12_v7 = vld [vmem:[%s161_s0] sm:$0xff]  ;;  %v67_v11 = vand.u32 127, %v66_v10 }
   0x3   :  { %v19_v6 = vpack.c.bf16 %v15_v5, %v14_v3  ;;  %v13_v8 = vld [vmem:[%s161_s0 + $0x8] sm:$0xff] }
   0x4   :  { %102 = vmatpush3.bf16.msra.mxu0 %v20_v4  ;;  %v18_v9 = vpack.c.bf16 %v13_v8, %v12_v7  ;;  %vm68_vm2 = vcmp.lt.s32.totalorder %v67_v11, 12 }
   0x5   :  { %103 = vmatprep.subr.bf16.mxu0 %v119_v0 }
   0x8   :  { %104 = vmatpush3.bf16.msra.mxu0 %v19_v6 }
   0xb   :  { %106 = vmatmul.mubr.msk.bf16.vlgmr.msra.gmra.mxu0 %vm21_vm1, %v18_v9 }
  0xcb   :  { %v59_v12 = vpop.f32.mrf.mxu0 }
  0xcc   :  { %v69_v13 = vsel %vm68_vm2, %v59_v12, -1e+30 }
  0xcd   :  { %71 = vmax.xlane.f32.xlu0 %v69_v13  ;;  %v107_v14 = vpop.f32.mrf.mxu0 }
  0xcf   :  { %v62_v15 = vpop.f32.mrf.mxu0 }
  0xd0   :  { %v70_v16 = vsel %vm68_vm2, %v62_v15, -1e+30 }
  0xd1   :  { %73 = vmax.xlane.f32.xlu0 %v70_v16  ;;  %v108_v17 = vpop.f32.mrf.mxu0 }
 0x156   :  { %v72_v18 = vpop.xlane.xlu0 %71 }
 0x157   :  { %v75_v19 = vsub.f32 %v69_v13, %v72_v18 }
 0x159   :  { %v77_v20 = vmul.f32 1.442695, %v75_v19 }
 0x15a   :  { %v74_v21 = vpop.xlane.xlu0 %73 }
 0x15b   :  { %v76_v22 = vsub.f32 %v70_v16, %v74_v21  ;;  %111 = vpow2.f32 %v77_v20 }
 0x15d   :  { %v79_v23 = vmul.f32 1.442695, %v76_v22 }
 0x15f   :  { %113 = vpow2.f32 %v79_v23 }
 0x168   :  { %v112_v24 = vpop.eup %111 }
 0x169   :  { %81 = vadd.xlane.f32.xlu1 %v112_v24 }
 0x16c   :  { %v114_v25 = vpop.eup %113 }
 0x16d   :  { %83 = vadd.xlane.f32.xlu1 %v114_v25 }
 0x1f2   :  { %v82_v26 = vpop.xlane.xlu1 %81 }
 0x1f3   :  { %115 = vlog2.f32 %v82_v26 }
 0x1f6   :  { %v84_v27 = vpop.xlane.xlu1 %83 }
 0x1f7   :  { %117 = vlog2.f32 %v84_v27 }
 0x200   :  { %v116_v28 = vpop.eup %115 }
 0x201   :  { %v86_v29 = vmul.f32 0.6931472, %v116_v28 }
 0x203   :  { %v89_v30 = vsub.f32 %v75_v19, %v86_v29 }
 0x204   :  { %v118_v31 = vpop.eup %117 }
 0x205   :  { %91 = vst [vmem:[%s162_s2] sm:$0xff] %v89_v30  ;;  %v88_v32 = vmul.f32 0.6931472, %v118_v31 }
 0x207   :  { %v90_v33 = vsub.f32 %v76_v22, %v88_v32 }
 0x209   :  { %92 = vst [vmem:[%s162_s2 + $0x8] sm:$0xff] %v90_v33 }

</bundles_post_ra>
